<compile_context>
chip_gen: v7x
topology: tpu7x:2x2x1
jax: 0.10.0
libtpu: 0.0.40
codegen_flags: <defaults>
</compile_context>

<pallas_src>
import jax
import jax.numpy as jnp
from jax.experimental import pallas as pl
from jax.experimental.pallas import tpu as pltpu


# -----------------------------------------------------------------------------
# Fused Pallas kernel: whole block for one batch element
#   y = relu(sla1(x)); y = relu(sla2(y) + x)
# Each sla = conv3x3(pad=1) + 1x1 adapter bank + BN, pre-folded into a single
# (9*Cin, Cout) im2col weight + a (1, Cout) bias.
# -----------------------------------------------------------------------------
def _block_kernel(x_ref, wa_ref, ba_ref, wb_ref, bb_ref, out_ref,
                  xpad_ref, ypad_ref, col_ref):
    # x_ref   : (H, W, Cin)     NHWC activation for one batch element
    # wa_ref  : (9*Cin, C)      sla1 folded weight   ba_ref: (1, C) folded bias
    # wb_ref  : (9*C, C)        sla2 folded weight   bb_ref: (1, C) folded bias
    # out_ref : (H, W, C)
    # xpad_ref: (H+2, W+2, Cin) zero-padded scratch
    # ypad_ref: (H+2, W+2, C)   zero-padded scratch for the intermediate
    # col_ref : (H*W, 9*C)      im2col scratch       (Cin == C in this path)
    H, W, Cin = x_ref.shape
    C = out_ref.shape[-1]
    HW = H * W

    def sla(pad_ref, cin, w_ref, b_ref):
        # conv3x3 (+ folded 1x1 adapter + folded BN scale) as ONE K=9*cin
        # MXU matmul over an im2col patch assembled in VMEM scratch.
        k = 0
        for dy in range(3):
            for dx in range(3):
                col_ref[:, k * cin:(k + 1) * cin] = (
                    pad_ref[dy:dy + H, dx:dx + W, :].reshape(HW, cin))
                k += 1
        acc = jnp.dot(col_ref[:, :9 * cin], w_ref[...],
                      preferred_element_type=jnp.float32)
        return acc + b_ref[...]                       # (HW, C) + (1, C) bias

    # ---- sla1: zero-pad x in VMEM, conv, relu --------------------------------
    xpad_ref[...] = jnp.zeros_like(xpad_ref)
    xpad_ref[1:1 + H, 1:1 + W, :] = x_ref[...].astype(jnp.float32)
    y1 = jnp.maximum(sla(xpad_ref, Cin, wa_ref, ba_ref), 0.0)

    # ---- sla2 + residual + relu (intermediate never leaves VMEM) ------------
    ypad_ref[...] = jnp.zeros_like(ypad_ref)
    ypad_ref[1:1 + H, 1:1 + W, :] = y1.reshape(H, W, C)
    y2 = sla(ypad_ref, C, wb_ref, bb_ref)
    y2 = y2 + x_ref[...].reshape(HW, Cin)             # shortcut==0 → residual = x
    out_ref[...] = jnp.maximum(y2, 0.0).reshape(H, W, C).astype(out_ref.dtype)


# -----------------------------------------------------------------------------
# Parameter construction (deterministic, mirrors the PyTorch module's shapes)
# -----------------------------------------------------------------------------
def init_sla_params(key, num_adapters, cin, cout):
    ks = jax.random.split(key, 7)
    p = {}
    # conv3x3: OIHW, no bias
    p["w3"] = 0.1 * jax.random.normal(ks[0], (cout, cin, 3, 3), jnp.float32)
    # SparseBattery: bank of num_adapters 1x1 convs + gating logits
    p["battery_w"] = 0.1 * jax.random.normal(
        ks[1], (num_adapters, cout, cin, 1, 1), jnp.float32)
    p["alpha"] = jax.random.normal(ks[2], (num_adapters,), jnp.float32)
    # BatchNorm2d(planes): gamma, beta, running stats (inference mode)
    p["gamma"] = 1.0 + 0.1 * jax.random.normal(ks[3], (cout,), jnp.float32)
    p["beta"] = 0.1 * jax.random.normal(ks[4], (cout,), jnp.float32)
    p["running_mean"] = 0.1 * jax.random.normal(ks[5], (cout,), jnp.float32)
    p["running_var"] = 1.0 + 0.1 * jnp.abs(
        jax.random.normal(ks[6], (cout,), jnp.float32))
    return p


def _raw_sla(p, eps=1e-5):
    """PyTorch-layout params -> (w3_hwio, w1_io, scale, bias), unfused."""
    w3_hwio = jnp.transpose(p["w3"], (2, 3, 1, 0))                     # (3,3,Cin,Cout)
    coeff = jax.nn.softmax(p["alpha"])                                 # (A,)
    w1_io = jnp.einsum("a,aoi->io", coeff, p["battery_w"][..., 0, 0])  # (Cin,Cout)
    scale = p["gamma"] / jnp.sqrt(p["running_var"] + eps)              # (Cout,)
    bias = p["beta"] - p["running_mean"] * scale
    return w3_hwio, w1_io, scale, bias


def prepare_sla(p, eps=1e-5):
    """Fold 1x1 adapter into the 3x3 center tap and BN scale into the weight."""
    w3_hwio, w1_io, scale, bias = _raw_sla(p, eps)
    w3_hwio = w3_hwio.at[1, 1].add(w1_io)          # exact algebraic fusion of 1x1
    cin, cout = w3_hwio.shape[2], w3_hwio.shape[3]
    w_eff = (w3_hwio * scale).reshape(9 * cin, cout)   # fold BN scale into weight
    return w_eff, bias.reshape(1, cout)


# -----------------------------------------------------------------------------
# Block forward (single fused Pallas kernel call, grid over batch)
# -----------------------------------------------------------------------------
def sparse_latent_adapter_block(x_nchw, params1, params2):
    x = jnp.transpose(x_nchw, (0, 2, 3, 1)).astype(jnp.float32)        # NCHW->NHWC
    B, H, W, Cin = x.shape
    wa, ba = prepare_sla(params1)                                      # (9*Cin,C),(1,C)
    wb, bb = prepare_sla(params2)                                      # (9*C,C),(1,C)
    C = wa.shape[-1]
    assert Cin == C, "shortcut==0 path requires in_planes == planes"

    flops = int(2 * B * H * W * 9 * (Cin * C + C * C) + 4 * B * H * W * C)
    bytes_accessed = int(4 * (x.size + B * H * W * C
                              + wa.size + wb.size + ba.size + bb.size))

    out = pl.pallas_call(
        _block_kernel,
        out_shape=jax.ShapeDtypeStruct((B, H, W, C), jnp.float32),
        grid_spec=pltpu.PrefetchScalarGridSpec(
            num_scalar_prefetch=0,
            grid=(B,),
            in_specs=[
                pl.BlockSpec((None, H, W, Cin), lambda b: (b, 0, 0, 0)),
                pl.BlockSpec((9 * Cin, C), lambda b: (0, 0)),
                pl.BlockSpec((1, C), lambda b: (0, 0)),
                pl.BlockSpec((9 * C, C), lambda b: (0, 0)),
                pl.BlockSpec((1, C), lambda b: (0, 0)),
            ],
            out_specs=pl.BlockSpec((None, H, W, C), lambda b: (b, 0, 0, 0)),
            scratch_shapes=[
                pltpu.VMEM((H + 2, W + 2, Cin), jnp.float32),   # xpad
                pltpu.VMEM((H + 2, W + 2, C), jnp.float32),     # ypad
                pltpu.VMEM((H * W, 9 * C), jnp.float32),        # im2col
            ]),
        compiler_params=pltpu.CompilerParams(
            dimension_semantics=("parallel",)),
        cost_estimate=pl.CostEstimate(flops=flops, transcendentals=0,
                                      bytes_accessed=bytes_accessed),
    )(x, wa, ba, wb, bb)
    return jnp.transpose(out, (0, 3, 1, 2))                            # NHWC->NCHW


# -----------------------------------------------------------------------------
# Pure-JAX reference (uses the UNfused weights, checks the folding algebra too)
# -----------------------------------------------------------------------------
def _ref_sla(x_nhwc, w3_hwio, w1_io, scale, bias):
    y = jax.lax.conv_general_dilated(
        x_nhwc, w3_hwio, window_strides=(1, 1), padding="SAME",
        dimension_numbers=("NHWC", "HWIO", "NHWC"))
    y = y + jnp.einsum("bhwc,cd->bhwd", x_nhwc, w1_io)
    return y * scale + bias


def _ref_block(x_nchw, params1, params2):
    x = jnp.transpose(x_nchw, (0, 2, 3, 1)).astype(jnp.float32)
    y = jax.nn.relu(_ref_sla(x, *_raw_sla(params1)))
    y = _ref_sla(y, *_raw_sla(params2)) + x
    y = jax.nn.relu(y)
    return jnp.transpose(y, (0, 3, 1, 2))


# -----------------------------------------------------------------------------
if __name__ == "__main__":
    B, C, H, W = 2, 8, 16, 16          # in_planes == planes, stride=1, shortcut=0
    NUM_ADAPTERS = 4

    root = jax.random.PRNGKey(0)
    kx, k1, k2 = jax.random.split(root, 3)
    x = jax.random.normal(kx, (B, C, H, W), jnp.float32)           # NCHW input

    params1 = init_sla_params(k1, NUM_ADAPTERS, C, C)              # sla1
    params2 = init_sla_params(k2, NUM_ADAPTERS, C, C)              # sla2

    out = jax.jit(sparse_latent_adapter_block)(x, params1, params2)
    out = jax.block_until_ready(out)

    ref = _ref_block(x, params1, params2)
    assert out.shape == (B, C, H, W)
    assert jnp.allclose(out, ref, atol=1e-4, rtol=1e-4), "mismatch vs JAX reference"

    print("KERNEL_OK")
</pallas_src>

<mosaic_0001>
module attributes {stable_mosaic.version = 11 : i64} {
  func.func @_block_kernel(%arg0: i32, %arg1: memref<1x16x16x8xf32, #tpu.memory_space<vmem>>, %arg2: memref<72x8xf32, #tpu.memory_space<vmem>>, %arg3: memref<1x8xf32, #tpu.memory_space<vmem>>, %arg4: memref<72x8xf32, #tpu.memory_space<vmem>>, %arg5: memref<1x8xf32, #tpu.memory_space<vmem>>, %arg6: memref<1x16x16x8xf32, #tpu.memory_space<vmem>>, %arg7: memref<18x18x8xf32, #tpu.memory_space<vmem>>, %arg8: memref<18x18x8xf32, #tpu.memory_space<vmem>>, %arg9: memref<256x72xf32, #tpu.memory_space<vmem>>) attributes {dimension_semantics = [#tpu.dimension_semantics<parallel>], iteration_bounds = array<i64: 2>, scalar_prefetch = 0 : i64, scratch_operands = 3 : i64, tpu.core_type = #tpu.core_type<tc>, window_params = [{transform_indices = @transform_0, window_bounds = array<i64: 1, 16, 16, 8>}, {pipeline_mode = #tpu.pipeline_mode<synchronous>, transform_indices = @transform_1, window_bounds = array<i64: 72, 8>}, {pipeline_mode = #tpu.pipeline_mode<synchronous>, transform_indices = @transform_2, window_bounds = array<i64: 1, 8>}, {pipeline_mode = #tpu.pipeline_mode<synchronous>, transform_indices = @transform_3, window_bounds = array<i64: 72, 8>}, {pipeline_mode = #tpu.pipeline_mode<synchronous>, transform_indices = @transform_4, window_bounds = array<i64: 1, 8>}, {transform_indices = @transform_5, window_bounds = array<i64: 1, 16, 16, 8>}]} {
    %cst = arith.constant 0.000000e+00 : f32
    %0 = vector.broadcast %cst : f32 to vector<18x18x8xf32>
    %c0 = arith.constant 0 : index
    %c0_0 = arith.constant 0 : index
    %c0_1 = arith.constant 0 : index
    %1 = vector.load %arg7[%c0, %c0_0, %c0_1] : memref<18x18x8xf32, #tpu.memory_space<vmem>>, vector<18x18x8xf32>
    tpu.vector_store %arg7[%c0, %c0_0, %c0_1], %0 {strides = array<i32>} : memref<18x18x8xf32, #tpu.memory_space<vmem>>, vector<18x18x8xf32>,
    %c0_2 = arith.constant 0 : index
    %c0_3 = arith.constant 0 : index
    %c0_4 = arith.constant 0 : index
    %c0_5 = arith.constant 0 : index
    %2 = vector.load %arg1[%c0_2, %c0_3, %c0_4, %c0_5] : memref<1x16x16x8xf32, #tpu.memory_space<vmem>>, vector<1x16x16x8xf32>
    %3 = vector.shape_cast %2 : vector<1x16x16x8xf32> to vector<16x16x8xf32>
    %c1 = arith.constant 1 : index
    %c1_6 = arith.constant 1 : index
    %c0_7 = arith.constant 0 : index
    %4 = vector.load %arg7[%c1, %c1_6, %c0_7] : memref<18x18x8xf32, #tpu.memory_space<vmem>>, vector<16x16x8xf32>
    tpu.vector_store %arg7[%c1, %c1_6, %c0_7], %3 {strides = array<i32>} : memref<18x18x8xf32, #tpu.memory_space<vmem>>, vector<16x16x8xf32>,
    %c0_8 = arith.constant 0 : index
    %c0_9 = arith.constant 0 : index
    %c0_10 = arith.constant 0 : index
    %5 = vector.load %arg7[%c0_8, %c0_9, %c0_10] : memref<18x18x8xf32, #tpu.memory_space<vmem>>, vector<16x16x8xf32>
    %6 = vector.shape_cast %5 : vector<16x16x8xf32> to vector<256x8xf32>
    %c0_11 = arith.constant 0 : index
    %c0_12 = arith.constant 0 : index
    %7 = vector.load %arg9[%c0_11, %c0_12] : memref<256x72xf32, #tpu.memory_space<vmem>>, vector<256x8xf32>
    tpu.vector_store %arg9[%c0_11, %c0_12], %6 {strides = array<i32>} : memref<256x72xf32, #tpu.memory_space<vmem>>, vector<256x8xf32>,
    %c0_13 = arith.constant 0 : index
    %c1_14 = arith.constant 1 : index
    %c0_15 = arith.constant 0 : index
    %8 = vector.load %arg7[%c0_13, %c1_14, %c0_15] : memref<18x18x8xf32, #tpu.memory_space<vmem>>, vector<16x16x8xf32>
    %9 = vector.shape_cast %8 : vector<16x16x8xf32> to vector<256x8xf32>
    %c0_16 = arith.constant 0 : index
    %c8 = arith.constant 8 : index
    %10 = vector.load %arg9[%c0_16, %c8] : memref<256x72xf32, #tpu.memory_space<vmem>>, vector<256x8xf32>
    tpu.vector_store %arg9[%c0_16, %c8], %9 {strides = array<i32>} : memref<256x72xf32, #tpu.memory_space<vmem>>, vector<256x8xf32>,
    %c0_17 = arith.constant 0 : index
    %c2 = arith.constant 2 : index
    %c0_18 = arith.constant 0 : index
    %11 = vector.load %arg7[%c0_17, %c2, %c0_18] : memref<18x18x8xf32, #tpu.memory_space<vmem>>, vector<16x16x8xf32>
    %12 = vector.shape_cast %11 : vector<16x16x8xf32> to vector<256x8xf32>
    %c0_19 = arith.constant 0 : index
    %c16 = arith.constant 16 : index
    %13 = vector.load %arg9[%c0_19, %c16] : memref<256x72xf32, #tpu.memory_space<vmem>>, vector<256x8xf32>
    tpu.vector_store %arg9[%c0_19, %c16], %12 {strides = array<i32>} : memref<256x72xf32, #tpu.memory_space<vmem>>, vector<256x8xf32>,
    %c1_20 = arith.constant 1 : index
    %c0_21 = arith.constant 0 : index
    %c0_22 = arith.constant 0 : index
    %14 = vector.load %arg7[%c1_20, %c0_21, %c0_22] : memref<18x18x8xf32, #tpu.memory_space<vmem>>, vector<16x16x8xf32>
    %15 = vector.shape_cast %14 : vector<16x16x8xf32> to vector<256x8xf32>
    %c0_23 = arith.constant 0 : index
    %c24 = arith.constant 24 : index
    %16 = vector.load %arg9[%c0_23, %c24] : memref<256x72xf32, #tpu.memory_space<vmem>>, vector<256x8xf32>
    tpu.vector_store %arg9[%c0_23, %c24], %15 {strides = array<i32>} : memref<256x72xf32, #tpu.memory_space<vmem>>, vector<256x8xf32>,
    %c1_24 = arith.constant 1 : index
    %c1_25 = arith.constant 1 : index
    %c0_26 = arith.constant 0 : index
    %17 = vector.load %arg7[%c1_24, %c1_25, %c0_26] : memref<18x18x8xf32, #tpu.memory_space<vmem>>, vector<16x16x8xf32>
    %18 = vector.shape_cast %17 : vector<16x16x8xf32> to vector<256x8xf32>
    %c0_27 = arith.constant 0 : index
    %c32 = arith.constant 32 : index
    %19 = vector.load %arg9[%c0_27, %c32] : memref<256x72xf32, #tpu.memory_space<vmem>>, vector<256x8xf32>
    tpu.vector_store %arg9[%c0_27, %c32], %18 {strides = array<i32>} : memref<256x72xf32, #tpu.memory_space<vmem>>, vector<256x8xf32>,
    %c1_28 = arith.constant 1 : index
    %c2_29 = arith.constant 2 : index
    %c0_30 = arith.constant 0 : index
    %20 = vector.load %arg7[%c1_28, %c2_29, %c0_30] : memref<18x18x8xf32, #tpu.memory_space<vmem>>, vector<16x16x8xf32>
    %21 = vector.shape_cast %20 : vector<16x16x8xf32> to vector<256x8xf32>
    %c0_31 = arith.constant 0 : index
    %c40 = arith.constant 40 : index
    %22 = vector.load %arg9[%c0_31, %c40] : memref<256x72xf32, #tpu.memory_space<vmem>>, vector<256x8xf32>
    tpu.vector_store %arg9[%c0_31, %c40], %21 {strides = array<i32>} : memref<256x72xf32, #tpu.memory_space<vmem>>, vector<256x8xf32>,
    %c2_32 = arith.constant 2 : index
    %c0_33 = arith.constant 0 : index
    %c0_34 = arith.constant 0 : index
    %23 = vector.load %arg7[%c2_32, %c0_33, %c0_34] : memref<18x18x8xf32, #tpu.memory_space<vmem>>, vector<16x16x8xf32>
    %24 = vector.shape_cast %23 : vector<16x16x8xf32> to vector<256x8xf32>
    %c0_35 = arith.constant 0 : index
    %c48 = arith.constant 48 : index
    %25 = vector.load %arg9[%c0_35, %c48] : memref<256x72xf32, #tpu.memory_space<vmem>>, vector<256x8xf32>
    tpu.vector_store %arg9[%c0_35, %c48], %24 {strides = array<i32>} : memref<256x72xf32, #tpu.memory_space<vmem>>, vector<256x8xf32>,
    %c2_36 = arith.constant 2 : index
    %c1_37 = arith.constant 1 : index
    %c0_38 = arith.constant 0 : index
    %26 = vector.load %arg7[%c2_36, %c1_37, %c0_38] : memref<18x18x8xf32, #tpu.memory_space<vmem>>, vector<16x16x8xf32>
    %27 = vector.shape_cast %26 : vector<16x16x8xf32> to vector<256x8xf32>
    %c0_39 = arith.constant 0 : index
    %c56 = arith.constant 56 : index
    %28 = vector.load %arg9[%c0_39, %c56] : memref<256x72xf32, #tpu.memory_space<vmem>>, vector<256x8xf32>
    tpu.vector_store %arg9[%c0_39, %c56], %27 {strides = array<i32>} : memref<256x72xf32, #tpu.memory_space<vmem>>, vector<256x8xf32>,
    %c2_40 = arith.constant 2 : index
    %c2_41 = arith.constant 2 : index
    %c0_42 = arith.constant 0 : index
    %29 = vector.load %arg7[%c2_40, %c2_41, %c0_42] : memref<18x18x8xf32, #tpu.memory_space<vmem>>, vector<16x16x8xf32>
    %30 = vector.shape_cast %29 : vector<16x16x8xf32> to vector<256x8xf32>
    %c0_43 = arith.constant 0 : index
    %c64 = arith.constant 64 : index
    %31 = vector.load %arg9[%c0_43, %c64] : memref<256x72xf32, #tpu.memory_space<vmem>>, vector<256x8xf32>
    tpu.vector_store %arg9[%c0_43, %c64], %30 {strides = array<i32>} : memref<256x72xf32, #tpu.memory_space<vmem>>, vector<256x8xf32>,
    %c0_44 = arith.constant 0 : index
    %c0_45 = arith.constant 0 : index
    %32 = vector.load %arg9[%c0_44, %c0_45] : memref<256x72xf32, #tpu.memory_space<vmem>>, vector<256x72xf32>
    %c0_46 = arith.constant 0 : index
    %c0_47 = arith.constant 0 : index
    %33 = vector.load %arg2[%c0_46, %c0_47] : memref<72x8xf32, #tpu.memory_space<vmem>>, vector<72x8xf32>
    %cst_48 = arith.constant dense<0.000000e+00> : vector<256x8xf32>
    %34 = tpu.matmul %32, %33, %cst_48 {dimension_numbers = #tpu.dot_dimension_numbers<[1], [0], [0], [1], [0, 0, 1, 1], [], []>} : vector<256x72xf32>, vector<72x8xf32>, vector<256x8xf32> -> vector<256x8xf32>
    %c0_49 = arith.constant 0 : index
    %c0_50 = arith.constant 0 : index
    %35 = vector.load %arg3[%c0_49, %c0_50] : memref<1x8xf32, #tpu.memory_space<vmem>>, vector<1x8xf32>
    %36 = vector.broadcast %35 : vector<1x8xf32> to vector<256x8xf32>
    %37 = arith.addf %34, %36 : vector<256x8xf32>
    %cst_51 = arith.constant 0.000000e+00 : f32
    %38 = vector.broadcast %cst_51 : f32 to vector<256x8xf32>
    %39 = arith.maximumf %37, %38 : vector<256x8xf32>
    %cst_52 = arith.constant 0.000000e+00 : f32
    %40 = vector.broadcast %cst_52 : f32 to vector<18x18x8xf32>
    %c0_53 = arith.constant 0 : index
    %c0_54 = arith.constant 0 : index
    %c0_55 = arith.constant 0 : index
    %41 = vector.load %arg8[%c0_53, %c0_54, %c0_55] : memref<18x18x8xf32, #tpu.memory_space<vmem>>, vector<18x18x8xf32>
    tpu.vector_store %arg8[%c0_53, %c0_54, %c0_55], %40 {strides = array<i32>} : memref<18x18x8xf32, #tpu.memory_space<vmem>>, vector<18x18x8xf32>,
    %42 = vector.shape_cast %39 : vector<256x8xf32> to vector<16x16x8xf32>
    %c1_56 = arith.constant 1 : index
    %c1_57 = arith.constant 1 : index
    %c0_58 = arith.constant 0 : index
    %43 = vector.load %arg8[%c1_56, %c1_57, %c0_58] : memref<18x18x8xf32, #tpu.memory_space<vmem>>, vector<16x16x8xf32>
    tpu.vector_store %arg8[%c1_56, %c1_57, %c0_58], %42 {strides = array<i32>} : memref<18x18x8xf32, #tpu.memory_space<vmem>>, vector<16x16x8xf32>,
    %c0_59 = arith.constant 0 : index
    %c0_60 = arith.constant 0 : index
    %c0_61 = arith.constant 0 : index
    %44 = vector.load %arg8[%c0_59, %c0_60, %c0_61] : memref<18x18x8xf32, #tpu.memory_space<vmem>>, vector<16x16x8xf32>
    %45 = vector.shape_cast %44 : vector<16x16x8xf32> to vector<256x8xf32>
    %c0_62 = arith.constant 0 : index
    %c0_63 = arith.constant 0 : index
    %46 = vector.load %arg9[%c0_62, %c0_63] : memref<256x72xf32, #tpu.memory_space<vmem>>, vector<256x8xf32>
    tpu.vector_store %arg9[%c0_62, %c0_63], %45 {strides = array<i32>} : memref<256x72xf32, #tpu.memory_space<vmem>>, vector<256x8xf32>,
    %c0_64 = arith.constant 0 : index
    %c1_65 = arith.constant 1 : index
    %c0_66 = arith.constant 0 : index
    %47 = vector.load %arg8[%c0_64, %c1_65, %c0_66] : memref<18x18x8xf32, #tpu.memory_space<vmem>>, vector<16x16x8xf32>
    %48 = vector.shape_cast %47 : vector<16x16x8xf32> to vector<256x8xf32>
    %c0_67 = arith.constant 0 : index
    %c8_68 = arith.constant 8 : index
    %49 = vector.load %arg9[%c0_67, %c8_68] : memref<256x72xf32, #tpu.memory_space<vmem>>, vector<256x8xf32>
    tpu.vector_store %arg9[%c0_67, %c8_68], %48 {strides = array<i32>} : memref<256x72xf32, #tpu.memory_space<vmem>>, vector<256x8xf32>,
    %c0_69 = arith.constant 0 : index
    %c2_70 = arith.constant 2 : index
    %c0_71 = arith.constant 0 : index
    %50 = vector.load %arg8[%c0_69, %c2_70, %c0_71] : memref<18x18x8xf32, #tpu.memory_space<vmem>>, vector<16x16x8xf32>
    %51 = vector.shape_cast %50 : vector<16x16x8xf32> to vector<256x8xf32>
    %c0_72 = arith.constant 0 : index
    %c16_73 = arith.constant 16 : index
    %52 = vector.load %arg9[%c0_72, %c16_73] : memref<256x72xf32, #tpu.memory_space<vmem>>, vector<256x8xf32>
    tpu.vector_store %arg9[%c0_72, %c16_73], %51 {strides = array<i32>} : memref<256x72xf32, #tpu.memory_space<vmem>>, vector<256x8xf32>,
    %c1_74 = arith.constant 1 : index
    %c0_75 = arith.constant 0 : index
    %c0_76 = arith.constant 0 : index
    %53 = vector.load %arg8[%c1_74, %c0_75, %c0_76] : memref<18x18x8xf32, #tpu.memory_space<vmem>>, vector<16x16x8xf32>
    %54 = vector.shape_cast %53 : vector<16x16x8xf32> to vector<256x8xf32>
    %c0_77 = arith.constant 0 : index
    %c24_78 = arith.constant 24 : index
    %55 = vector.load %arg9[%c0_77, %c24_78] : memref<256x72xf32, #tpu.memory_space<vmem>>, vector<256x8xf32>
    tpu.vector_store %arg9[%c0_77, %c24_78], %54 {strides = array<i32>} : memref<256x72xf32, #tpu.memory_space<vmem>>, vector<256x8xf32>,
    %c1_79 = arith.constant 1 : index
    %c1_80 = arith.constant 1 : index
    %c0_81 = arith.constant 0 : index
    %56 = vector.load %arg8[%c1_79, %c1_80, %c0_81] : memref<18x18x8xf32, #tpu.memory_space<vmem>>, vector<16x16x8xf32>
    %57 = vector.shape_cast %56 : vector<16x16x8xf32> to vector<256x8xf32>
    %c0_82 = arith.constant 0 : index
    %c32_83 = arith.constant 32 : index
    %58 = vector.load %arg9[%c0_82, %c32_83] : memref<256x72xf32, #tpu.memory_space<vmem>>, vector<256x8xf32>
    tpu.vector_store %arg9[%c0_82, %c32_83], %57 {strides = array<i32>} : memref<256x72xf32, #tpu.memory_space<vmem>>, vector<256x8xf32>,
    %c1_84 = arith.constant 1 : index
    %c2_85 = arith.constant 2 : index
    %c0_86 = arith.constant 0 : index
    %59 = vector.load %arg8[%c1_84, %c2_85, %c0_86] : memref<18x18x8xf32, #tpu.memory_space<vmem>>, vector<16x16x8xf32>
    %60 = vector.shape_cast %59 : vector<16x16x8xf32> to vector<256x8xf32>
    %c0_87 = arith.constant 0 : index
    %c40_88 = arith.constant 40 : index
    %61 = vector.load %arg9[%c0_87, %c40_88] : memref<256x72xf32, #tpu.memory_space<vmem>>, vector<256x8xf32>
    tpu.vector_store %arg9[%c0_87, %c40_88], %60 {strides = array<i32>} : memref<256x72xf32, #tpu.memory_space<vmem>>, vector<256x8xf32>,
    %c2_89 = arith.constant 2 : index
    %c0_90 = arith.constant 0 : index
    %c0_91 = arith.constant 0 : index
    %62 = vector.load %arg8[%c2_89, %c0_90, %c0_91] : memref<18x18x8xf32, #tpu.memory_space<vmem>>, vector<16x16x8xf32>
    %63 = vector.shape_cast %62 : vector<16x16x8xf32> to vector<256x8xf32>
    %c0_92 = arith.constant 0 : index
    %c48_93 = arith.constant 48 : index
    %64 = vector.load %arg9[%c0_92, %c48_93] : memref<256x72xf32, #tpu.memory_space<vmem>>, vector<256x8xf32>
    tpu.vector_store %arg9[%c0_92, %c48_93], %63 {strides = array<i32>} : memref<256x72xf32, #tpu.memory_space<vmem>>, vector<256x8xf32>,
    %c2_94 = arith.constant 2 : index
    %c1_95 = arith.constant 1 : index
    %c0_96 = arith.constant 0 : index
    %65 = vector.load %arg8[%c2_94, %c1_95, %c0_96] : memref<18x18x8xf32, #tpu.memory_space<vmem>>, vector<16x16x8xf32>
    %66 = vector.shape_cast %65 : vector<16x16x8xf32> to vector<256x8xf32>
    %c0_97 = arith.constant 0 : index
    %c56_98 = arith.constant 56 : index
    %67 = vector.load %arg9[%c0_97, %c56_98] : memref<256x72xf32, #tpu.memory_space<vmem>>, vector<256x8xf32>
    tpu.vector_store %arg9[%c0_97, %c56_98], %66 {strides = array<i32>} : memref<256x72xf32, #tpu.memory_space<vmem>>, vector<256x8xf32>,
    %c2_99 = arith.constant 2 : index
    %c2_100 = arith.constant 2 : index
    %c0_101 = arith.constant 0 : index
    %68 = vector.load %arg8[%c2_99, %c2_100, %c0_101] : memref<18x18x8xf32, #tpu.memory_space<vmem>>, vector<16x16x8xf32>
    %69 = vector.shape_cast %68 : vector<16x16x8xf32> to vector<256x8xf32>
    %c0_102 = arith.constant 0 : index
    %c64_103 = arith.constant 64 : index
    %70 = vector.load %arg9[%c0_102, %c64_103] : memref<256x72xf32, #tpu.memory_space<vmem>>, vector<256x8xf32>
    tpu.vector_store %arg9[%c0_102, %c64_103], %69 {strides = array<i32>} : memref<256x72xf32, #tpu.memory_space<vmem>>, vector<256x8xf32>,
    %c0_104 = arith.constant 0 : index
    %c0_105 = arith.constant 0 : index
    %71 = vector.load %arg9[%c0_104, %c0_105] : memref<256x72xf32, #tpu.memory_space<vmem>>, vector<256x72xf32>
    %c0_106 = arith.constant 0 : index
    %c0_107 = arith.constant 0 : index
    %72 = vector.load %arg4[%c0_106, %c0_107] : memref<72x8xf32, #tpu.memory_space<vmem>>, vector<72x8xf32>
    %cst_108 = arith.constant dense<0.000000e+00> : vector<256x8xf32>
    %73 = tpu.matmul %71, %72, %cst_108 {dimension_numbers = #tpu.dot_dimension_numbers<[1], [0], [0], [1], [0, 0, 1, 1], [], []>} : vector<256x72xf32>, vector<72x8xf32>, vector<256x8xf32> -> vector<256x8xf32>
    %c0_109 = arith.constant 0 : index
    %c0_110 = arith.constant 0 : index
    %74 = vector.load %arg5[%c0_109, %c0_110] : memref<1x8xf32, #tpu.memory_space<vmem>>, vector<1x8xf32>
    %75 = vector.broadcast %74 : vector<1x8xf32> to vector<256x8xf32>
    %76 = arith.addf %73, %75 : vector<256x8xf32>
    %c0_111 = arith.constant 0 : index
    %c0_112 = arith.constant 0 : index
    %c0_113 = arith.constant 0 : index
    %c0_114 = arith.constant 0 : index
    %77 = vector.load %arg1[%c0_111, %c0_112, %c0_113, %c0_114] : memref<1x16x16x8xf32, #tpu.memory_space<vmem>>, vector<1x16x16x8xf32>
    %78 = vector.shape_cast %77 : vector<1x16x16x8xf32> to vector<16x16x8xf32>
    %79 = vector.shape_cast %78 : vector<16x16x8xf32> to vector<256x8xf32>
    %80 = arith.addf %76, %79 : vector<256x8xf32>
    %cst_115 = arith.constant 0.000000e+00 : f32
    %81 = vector.broadcast %cst_115 : f32 to vector<256x8xf32>
    %82 = arith.maximumf %80, %81 : vector<256x8xf32>
    %83 = vector.shape_cast %82 : vector<256x8xf32> to vector<16x16x8xf32>
    %c0_116 = arith.constant 0 : index
    %c0_117 = arith.constant 0 : index
    %c0_118 = arith.constant 0 : index
    %c0_119 = arith.constant 0 : index
    %84 = vector.load %arg6[%c0_116, %c0_117, %c0_118, %c0_119] : memref<1x16x16x8xf32, #tpu.memory_space<vmem>>, vector<1x16x16x8xf32>
    %85 = vector.shape_cast %84 : vector<1x16x16x8xf32> to vector<16x16x8xf32>
    %86 = vector.shape_cast %83 : vector<16x16x8xf32> to vector<1x16x16x8xf32>
    tpu.vector_store %arg6[%c0_116, %c0_117, %c0_118, %c0_119], %86 {strides = array<i32>} : memref<1x16x16x8xf32, #tpu.memory_space<vmem>>, vector<1x16x16x8xf32>,
    return
  }
  func.func @transform_0(%arg0: i32) -> (i32, i32, i32, i32) {
    %c0_i32 = arith.constant 0 : i32
    %c0_i32_0 = arith.constant 0 : i32
    %c0_i32_1 = arith.constant 0 : i32
    %c0_i32_2 = arith.constant 0 : i32
    return %arg0, %c0_i32, %c0_i32_0, %c0_i32_1 : i32, i32, i32, i32
  }
  func.func @transform_1(%arg0: i32) -> (i32, i32) {
    %c0_i32 = arith.constant 0 : i32
    %c0_i32_0 = arith.constant 0 : i32
    %c0_i32_1 = arith.constant 0 : i32
    return %c0_i32, %c0_i32_0 : i32, i32
  }
  func.func @transform_2(%arg0: i32) -> (i32, i32) {
    %c0_i32 = arith.constant 0 : i32
    %c0_i32_0 = arith.constant 0 : i32
    %c0_i32_1 = arith.constant 0 : i32
    return %c0_i32, %c0_i32_0 : i32, i32
  }
  func.func @transform_3(%arg0: i32) -> (i32, i32) {
    %c0_i32 = arith.constant 0 : i32
    %c0_i32_0 = arith.constant 0 : i32
    %c0_i32_1 = arith.constant 0 : i32
    return %c0_i32, %c0_i32_0 : i32, i32
  }
  func.func @transform_4(%arg0: i32) -> (i32, i32) {
    %c0_i32 = arith.constant 0 : i32
    %c0_i32_0 = arith.constant 0 : i32
    %c0_i32_1 = arith.constant 0 : i32
    return %c0_i32, %c0_i32_0 : i32, i32
  }
  func.func @transform_5(%arg0: i32) -> (i32, i32, i32, i32) {
    %c0_i32 = arith.constant 0 : i32
    %c0_i32_0 = arith.constant 0 : i32
    %c0_i32_1 = arith.constant 0 : i32
    %c0_i32_2 = arith.constant 0 : i32
    return %arg0, %c0_i32, %c0_i32_0, %c0_i32_1 : i32, i32, i32, i32
  }
}

</mosaic_0001>

<bundles_post_ra>
// kernel: sparse_latent_adapter_block.1
= control target key start
LH: loop header
LB: loop body
LE: loop exit
PB: predicated region body
PF: predicated region fallthrough
CT: control target
= control target key end

     0   :  { %s4986_s18 = smov 0   ;;  %s7377_s0 = inlined_call_operand.vmem [shape: f32[2,16,16,8], index: 0, kind: input, shape index: {}]   ;;  %s7378_s1 = inlined_call_operand.vmem [shape: f32[72,8], index: 1, kind: input, shape index: {}]   ;;  %s7379_s2 = inlined_call_operand.vmem [shape: f32[1,8], index: 2, kind: input, shape index: {}]   ;;  %s7380_s3 = inlined_call_operand.vmem [shape: f32[72,8], index: 3, kind: input, shape index: {}]   ;;  %s7381_s4 = inlined_call_operand.vmem [shape: f32[1,8], index: 4, kind: input, shape index: {}]   ;;  %s7382_s5 = inlined_call_operand.vmem [shape: f32[2,16,16,8], index: 5, kind: output, shape index: {}]  }
   0x1 LB: > { %s4597_s19 = sadd.s32 4294967295, %s4945_s18   ;;  %p4601_p0 = scmp.ge.s32.totalorder %s4945_s18, 1  ;;  %s4945_s18 = sphi %s4986_s18, %s15_s18  }
   0x2   : > { %p187_p1 = scmp.lt.s32.totalorder %s4945_s18, 3 }
   0x4   : > { %p188_p2 = pnand %p4601_p0, %p187_p1 }
   0x6   : > { %191 = sbr.rel (%p188_p2) target bundleno = 1712 (0x6b0), region = 40 }
   0xd   : > { %vm225_vm0 = vcmask 64512   ;;  %p4996_p3 = scmp.lt.s32.totalorder %s4597_s19, 1  ;;  %vm228_vm1 = vcmask 58368   ;;  %v4947_v0 = vmov 0.0   ;;  %s4948_s25 = smov 8   ;;  %vm570_vm2 = vcmask 130112  }
   0xe   : > { %226 = vst.msk [vmem:[#allocation2] sm:$0xff] %vm225_vm0, %v4947_v0  ;;  %227 = vst.msk [vmem:[#allocation2 + $0x8] sm:$0xff] %vm225_vm0, %v4947_v0  ;;  %s4949_s26 = smov 16   ;;  %s4950_s27 = smov 24   ;;  %vm763_vm3 = vcmask 195712   ;;  %vm956_vm4 = vcmask 261312  }
   0xf   : > { %230 = vst.msk [vmem:[#allocation2 + $0x18] sm:$0xff] %vm225_vm0, %v4947_v0  ;;  %231 = vst.msk [vmem:[#allocation2 + $0x20] sm:$0xff] %vm225_vm0, %v4947_v0  ;;  %s7475_s19 = smov (!%p4996_p3, %s4597_s19), 1  ;;  %s4951_s28 = smov 32   ;;  %vm1149_vm5 = vcmask 326912   ;;  %vm1342_vm6 = vcmask 392512  }
  0x10   : > { %233 = vst.msk [vmem:[#allocation2 + $0x30] sm:$0xff] %vm225_vm0, %v4947_v0  ;;  %234 = vst.msk [vmem:[#allocation2 + $0x38] sm:$0xff] %vm225_vm0, %v4947_v0  ;;  %s4674_s21 = sshll.u32 %s7475_s19, 8  ;;  %s4952_s29 = smov 40   ;;  %vm1536_vm7 = vcmask 458112   ;;  %vm1729_vm8 = vcmask 523712  }
  0x11   : > { %236 = vst.msk [vmem:[#allocation2 + $0x48] sm:$0xff] %vm225_vm0, %v4947_v0  ;;  %237 = vst.msk [vmem:[#allocation2 + $0x50] sm:$0xff] %vm225_vm0, %v4947_v0  ;;  %s5228_s24 = scalar_lea.vmem %s7377_s0, %s4674_s21  ;;  %s4953_s30 = smov 48   ;;  %vm1922_vm9 = vcmask 589312   ;;  %vm2003_vm10 = vcmask 588800  }
  0x12   : > { %239 = vst.msk [vmem:[#allocation2 + $0x60] sm:$0xff] %vm225_vm0, %v4947_v0  ;;  %240 = vst.msk [vmem:[#allocation2 + $0x68] sm:$0xff] %vm225_vm0, %v4947_v0  ;;  %v281_v1 = vld [vmem:[%s5228_s24] sm:$0xff]  ;;  %v282_v2 = vld [vmem:[%s5228_s24 + $0x8] sm:$0xff]  ;;  %s4954_s7 = smov 56   ;;  %s4955_s10 = smov 64  }
  0x13   : > { %242 = vst.msk [vmem:[#allocation2 + $0x78] sm:$0xff] %vm225_vm0, %v4947_v0  ;;  %243 = vst.msk [vmem:[#allocation2 + $0x80] sm:$0xff] %vm225_vm0, %v4947_v0  ;;  %v283_v3 = vld [vmem:[%s5228_s24 + $0x10] sm:$0xff]  ;;  %v284_v4 = vld [vmem:[%s5228_s24 + $0x18] sm:$0xff] }
  0x14   : > { %245 = vst.msk [vmem:[#allocation2 + $0x90] sm:$0xff] %vm225_vm0, %v4947_v0  ;;  %246 = vst.msk [vmem:[#allocation2 + $0x98] sm:$0xff] %vm225_vm0, %v4947_v0  ;;  %v285_v5 = vld [vmem:[%s5228_s24 + $0x20] sm:$0xff]  ;;  %v286_v6 = vld [vmem:[%s5228_s24 + $0x28] sm:$0xff] }
  0x15   : > { %248 = vst.msk [vmem:[#allocation2 + $0xa8] sm:$0xff] %vm225_vm0, %v4947_v0  ;;  %249 = vst.msk [vmem:[#allocation2 + $0xb0] sm:$0xff] %vm225_vm0, %v4947_v0  ;;  %v410_v7 = vld [vmem:[#allocation2 + $0x1] sm:$0xff]  ;;  %v289_v11 = vld [vmem:[%s5228_s24 + $0x40] sm:$0xff] }
  0x16   : > { %251 = vst.msk [vmem:[#allocation2 + $0xc0] sm:$0xff] %vm225_vm0, %v4947_v0  ;;  %252 = vst.msk [vmem:[#allocation2 + $0xc8] sm:$0xff] %vm225_vm0, %v4947_v0  ;;  %v287_v9 = vld [vmem:[%s5228_s24 + $0x30] sm:$0xff]  ;;  %474 = vrot.lane.b32.xlu0 %v410_v7, %s4948_s25  ;;  %v288_v10 = vld [vmem:[%s5228_s24 + $0x38] sm:$0xff] }
  0x17   : > { %254 = vst.msk [vmem:[#allocation2 + $0xd8] sm:$0xff] %vm225_vm0, %v4947_v0  ;;  %255 = vst.msk [vmem:[#allocation2 + $0xe0] sm:$0xff] %vm225_vm0, %v4947_v0  ;;  %v290_v12 = vld [vmem:[%s5228_s24 + $0x48] sm:$0xff]  ;;  %v291_v13 = vld [vmem:[%s5228_s24 + $0x50] sm:$0xff] }
  0x18   : > { %257 = vst.msk [vmem:[#allocation2 + $0xf0] sm:$0xff] %vm225_vm0, %v4947_v0  ;;  %258 = vst.msk [vmem:[#allocation2 + $0xf8] sm:$0xff] %vm225_vm0, %v4947_v0  ;;  %v292_v14 = vld [vmem:[%s5228_s24 + $0x58] sm:$0xff]  ;;  %v293_v15 = vld [vmem:[%s5228_s24 + $0x60] sm:$0xff] }
  0x19   : > { %260 = vst.msk [vmem:[#allocation2 + $0x108] sm:$0xff] %vm225_vm0, %v4947_v0  ;;  %261 = vst.msk [vmem:[#allocation2 + $0x110] sm:$0xff] %vm225_vm0, %v4947_v0  ;;  %v294_v16 = vld [vmem:[%s5228_s24 + $0x68] sm:$0xff]  ;;  %v295_v17 = vld [vmem:[%s5228_s24 + $0x70] sm:$0xff] }
  0x1a   : > { %263 = vst.msk [vmem:[#allocation2 + $0x120] sm:$0xff] %vm225_vm0, %v4947_v0  ;;  %264 = vst.msk [vmem:[#allocation2 + $0x128] sm:$0xff] %vm225_vm0, %v4947_v0  ;;  %v296_v18 = vld [vmem:[%s5228_s24 + $0x78] sm:$0xff]  ;;  %v297_v19 = vld [vmem:[%s5228_s24 + $0x80] sm:$0xff] }
  0x1b   : > { %266 = vst.msk [vmem:[#allocation2 + $0x138] sm:$0xff] %vm225_vm0, %v4947_v0  ;;  %267 = vst.msk [vmem:[#allocation2 + $0x140] sm:$0xff] %vm225_vm0, %v4947_v0  ;;  %v298_v20 = vld [vmem:[%s5228_s24 + $0x88] sm:$0xff]  ;;  %v299_v21 = vld [vmem:[%s5228_s24 + $0x90] sm:$0xff] }
  0x1c   : > { %269 = vst.msk [vmem:[#allocation2 + $0x150] sm:$0xff] %vm225_vm0, %v4947_v0  ;;  %270 = vst.msk [vmem:[#allocation2 + $0x158] sm:$0xff] %vm225_vm0, %v4947_v0  ;;  %v300_v22 = vld [vmem:[%s5228_s24 + $0x98] sm:$0xff]  ;;  %v301_v23 = vld [vmem:[%s5228_s24 + $0xa0] sm:$0xff] }
  0x1d   : > { %272 = vst.msk [vmem:[#allocation2 + $0x168] sm:$0xff] %vm225_vm0, %v4947_v0  ;;  %273 = vst.msk [vmem:[#allocation2 + $0x170] sm:$0xff] %vm225_vm0, %v4947_v0  ;;  %v302_v24 = vld [vmem:[%s5228_s24 + $0xa8] sm:$0xff]  ;;  %v303_v28 = vld [vmem:[%s5228_s24 + $0xb0] sm:$0xff] }
  0x1e   : > { %275 = vst.msk [vmem:[#allocation2 + $0x180] sm:$0xff] %vm225_vm0, %v4947_v0  ;;  %276 = vst.msk [vmem:[#allocation2 + $0x188] sm:$0xff] %vm225_vm0, %v4947_v0  ;;  %v304_v29 = vld [vmem:[%s5228_s24 + $0xb8] sm:$0xff]  ;;  %v305_v33 = vld [vmem:[%s5228_s24 + $0xc0] sm:$0xff] }
  0x1f   : > { %278 = vst.msk [vmem:[#allocation2 + $0x198] sm:$0xff] %vm225_vm0, %v4947_v0  ;;  %279 = vst.msk [vmem:[#allocation2 + $0x1a0] sm:$0xff] %vm225_vm0, %v4947_v0  ;;  %v306_v34 = vld [vmem:[%s5228_s24 + $0xc8] sm:$0xff]  ;;  %v307_v35 = vld [vmem:[%s5228_s24 + $0xd0] sm:$0xff] }
  0x20   : > { %2357 = vst.msk [vmem:[#allocation3] sm:$0xff] %vm225_vm0, %v4947_v0  ;;  %2358 = vst.msk [vmem:[#allocation3 + $0x8] sm:$0xff] %vm225_vm0, %v4947_v0  ;;  %v308_v36 = vld [vmem:[%s5228_s24 + $0xd8] sm:$0xff]  ;;  %v309_v37 = vld [vmem:[%s5228_s24 + $0xe0] sm:$0xff] }
  0x21   : > { %2360 = vst.msk [vmem:[#allocation3 + $0x18] sm:$0xff] %vm225_vm0, %v4947_v0  ;;  %2361 = vst.msk [vmem:[#allocation3 + $0x20] sm:$0xff] %vm225_vm0, %v4947_v0  ;;  %v310_v38 = vld [vmem:[%s5228_s24 + $0xe8] sm:$0xff]  ;;  %v346_v45 = vld [vmem:[#allocation2] sm:$0xff] }
  0x22   : > { %2363 = vst.msk [vmem:[#allocation3 + $0x30] sm:$0xff] %vm225_vm0, %v4947_v0  ;;  %2364 = vst.msk [vmem:[#allocation3 + $0x38] sm:$0xff] %vm225_vm0, %v4947_v0  ;;  %v347_v48 = vld [vmem:[#allocation2 + $0x8] sm:$0xff] }
  0x23   : > { %2366 = vst.msk [vmem:[#allocation3 + $0x48] sm:$0xff] %vm225_vm0, %v4947_v0  ;;  %2367 = vst.msk [vmem:[#allocation3 + $0x50] sm:$0xff] %vm225_vm0, %v4947_v0 }
  0x24   : > { %2369 = vst.msk [vmem:[#allocation3 + $0x60] sm:$0xff] %vm225_vm0, %v4947_v0  ;;  %2370 = vst.msk [vmem:[#allocation3 + $0x68] sm:$0xff] %vm225_vm0, %v4947_v0 }
  0x25   : > { %2372 = vst.msk [vmem:[#allocation3 + $0x78] sm:$0xff] %vm225_vm0, %v4947_v0  ;;  %2373 = vst.msk [vmem:[#allocation3 + $0x80] sm:$0xff] %vm225_vm0, %v4947_v0 }
  0x26   : > { %2375 = vst.msk [vmem:[#allocation3 + $0x90] sm:$0xff] %vm225_vm0, %v4947_v0  ;;  %2376 = vst.msk [vmem:[#allocation3 + $0x98] sm:$0xff] %vm225_vm0, %v4947_v0 }
  0x27   : > { %2378 = vst.msk [vmem:[#allocation3 + $0xa8] sm:$0xff] %vm225_vm0, %v4947_v0  ;;  %2379 = vst.msk [vmem:[#allocation3 + $0xb0] sm:$0xff] %vm225_vm0, %v4947_v0 }
  0x28   : > { %2381 = vst.msk [vmem:[#allocation3 + $0xc0] sm:$0xff] %vm225_vm0, %v4947_v0  ;;  %2382 = vst.msk [vmem:[#allocation3 + $0xc8] sm:$0xff] %vm225_vm0, %v4947_v0 }
  0x29   : > { %2384 = vst.msk [vmem:[#allocation3 + $0xd8] sm:$0xff] %vm225_vm0, %v4947_v0  ;;  %2385 = vst.msk [vmem:[#allocation3 + $0xe0] sm:$0xff] %vm225_vm0, %v4947_v0 }
  0x2a   : > { %2387 = vst.msk [vmem:[#allocation3 + $0xf0] sm:$0xff] %vm225_vm0, %v4947_v0  ;;  %2388 = vst.msk [vmem:[#allocation3 + $0xf8] sm:$0xff] %vm225_vm0, %v4947_v0 }
  0x2b   : > { %2390 = vst.msk [vmem:[#allocation3 + $0x108] sm:$0xff] %vm225_vm0, %v4947_v0  ;;  %2391 = vst.msk [vmem:[#allocation3 + $0x110] sm:$0xff] %vm225_vm0, %v4947_v0 }
  0x2c   : > { %2393 = vst.msk [vmem:[#allocation3 + $0x120] sm:$0xff] %vm225_vm0, %v4947_v0  ;;  %2394 = vst.msk [vmem:[#allocation3 + $0x128] sm:$0xff] %vm225_vm0, %v4947_v0 }
  0x2d   : > { %2396 = vst.msk [vmem:[#allocation3 + $0x138] sm:$0xff] %vm225_vm0, %v4947_v0  ;;  %2397 = vst.msk [vmem:[#allocation3 + $0x140] sm:$0xff] %vm225_vm0, %v4947_v0 }
  0x2e   : > { %2399 = vst.msk [vmem:[#allocation3 + $0x150] sm:$0xff] %vm225_vm0, %v4947_v0  ;;  %2400 = vst.msk [vmem:[#allocation3 + $0x158] sm:$0xff] %vm225_vm0, %v4947_v0 }
  0x2f   : > { %2402 = vst.msk [vmem:[#allocation3 + $0x168] sm:$0xff] %vm225_vm0, %v4947_v0  ;;  %2403 = vst.msk [vmem:[#allocation3 + $0x170] sm:$0xff] %vm225_vm0, %v4947_v0 }
  0x30   : > { %2405 = vst.msk [vmem:[#allocation3 + $0x180] sm:$0xff] %vm225_vm0, %v4947_v0  ;;  %2406 = vst.msk [vmem:[#allocation3 + $0x188] sm:$0xff] %vm225_vm0, %v4947_v0 }
  0x31   : > { %2408 = vst.msk [vmem:[#allocation3 + $0x198] sm:$0xff] %vm225_vm0, %v4947_v0  ;;  %2409 = vst.msk [vmem:[#allocation3 + $0x1a0] sm:$0xff] %vm225_vm0, %v4947_v0 }
  0x32   : > { %229 = vst.msk [vmem:[#allocation2 + $0x10] sm:$0x3] %vm228_vm1, %v4947_v0  ;;  %232 = vst.msk [vmem:[#allocation2 + $0x28] sm:$0x3] %vm228_vm1, %v4947_v0 }
  0x33   : > { %235 = vst.msk [vmem:[#allocation2 + $0x40] sm:$0x3] %vm228_vm1, %v4947_v0  ;;  %238 = vst.msk [vmem:[#allocation2 + $0x58] sm:$0x3] %vm228_vm1, %v4947_v0 }
  0x34   : > { %241 = vst.msk [vmem:[#allocation2 + $0x70] sm:$0x3] %vm228_vm1, %v4947_v0  ;;  %244 = vst.msk [vmem:[#allocation2 + $0x88] sm:$0x3] %vm228_vm1, %v4947_v0 }
  0x35   : > { %247 = vst.msk [vmem:[#allocation2 + $0xa0] sm:$0x3] %vm228_vm1, %v4947_v0  ;;  %250 = vst.msk [vmem:[#allocation2 + $0xb8] sm:$0x3] %vm228_vm1, %v4947_v0 }
  0x36   : > { %253 = vst.msk [vmem:[#allocation2 + $0xd0] sm:$0x3] %vm228_vm1, %v4947_v0  ;;  %256 = vst.msk [vmem:[#allocation2 + $0xe8] sm:$0x3] %vm228_vm1, %v4947_v0 }
  0x37   : > { %259 = vst.msk [vmem:[#allocation2 + $0x100] sm:$0x3] %vm228_vm1, %v4947_v0  ;;  %262 = vst.msk [vmem:[#allocation2 + $0x118] sm:$0x3] %vm228_vm1, %v4947_v0 }
  0x38   : > { %265 = vst.msk [vmem:[#allocation2 + $0x130] sm:$0x3] %vm228_vm1, %v4947_v0  ;;  %268 = vst.msk [vmem:[#allocation2 + $0x148] sm:$0x3] %vm228_vm1, %v4947_v0 }
  0x39   : > { %271 = vst.msk [vmem:[#allocation2 + $0x160] sm:$0x3] %vm228_vm1, %v4947_v0  ;;  %274 = vst.msk [vmem:[#allocation2 + $0x178] sm:$0x3] %vm228_vm1, %v4947_v0  ;;  %v411_v8 = vld [vmem:[#allocation2 + $0x9] sm:$0xff] }
  0x3a   : > { %277 = vst.msk [vmem:[#allocation2 + $0x190] sm:$0x3] %vm228_vm1, %v4947_v0  ;;  %280 = vst.msk [vmem:[#allocation2 + $0x1a8] sm:$0x3] %vm228_vm1, %v4947_v0  ;;  %476 = vrot.lane.b32.xlu0 %v411_v8, %s4948_s25 }
  0x3b   : > { %2359 = vst.msk [vmem:[#allocation3 + $0x10] sm:$0x3] %vm228_vm1, %v4947_v0  ;;  %2362 = vst.msk [vmem:[#allocation3 + $0x28] sm:$0x3] %vm228_vm1, %v4947_v0 }
  0x3c   : > { %2365 = vst.msk [vmem:[#allocation3 + $0x40] sm:$0x3] %vm228_vm1, %v4947_v0  ;;  %2368 = vst.msk [vmem:[#allocation3 + $0x58] sm:$0x3] %vm228_vm1, %v4947_v0 }
  0x3d   : > { %2371 = vst.msk [vmem:[#allocation3 + $0x70] sm:$0x3] %vm228_vm1, %v4947_v0  ;;  %2374 = vst.msk [vmem:[#allocation3 + $0x88] sm:$0x3] %vm228_vm1, %v4947_v0 }
  0x3e   : > { %2377 = vst.msk [vmem:[#allocation3 + $0xa0] sm:$0x3] %vm228_vm1, %v4947_v0  ;;  %2380 = vst.msk [vmem:[#allocation3 + $0xb8] sm:$0x3] %vm228_vm1, %v4947_v0 }
  0x3f   : > { %2383 = vst.msk [vmem:[#allocation3 + $0xd0] sm:$0x3] %vm228_vm1, %v4947_v0  ;;  %2386 = vst.msk [vmem:[#allocation3 + $0xe8] sm:$0x3] %vm228_vm1, %v4947_v0 }
  0x40   : > { %2389 = vst.msk [vmem:[#allocation3 + $0x100] sm:$0x3] %vm228_vm1, %v4947_v0  ;;  %2392 = vst.msk [vmem:[#allocation3 + $0x118] sm:$0x3] %vm228_vm1, %v4947_v0 }
  0x41   : > { %2395 = vst.msk [vmem:[#allocation3 + $0x130] sm:$0x3] %vm228_vm1, %v4947_v0  ;;  %2398 = vst.msk [vmem:[#allocation3 + $0x148] sm:$0x3] %vm228_vm1, %v4947_v0 }
  0x42   : > { %2401 = vst.msk [vmem:[#allocation3 + $0x160] sm:$0x3] %vm228_vm1, %v4947_v0  ;;  %2404 = vst.msk [vmem:[#allocation3 + $0x178] sm:$0x3] %vm228_vm1, %v4947_v0 }
  0x43   : > { %2407 = vst.msk [vmem:[#allocation3 + $0x190] sm:$0x3] %vm228_vm1, %v4947_v0  ;;  %2410 = vst.msk [vmem:[#allocation3 + $0x1a8] sm:$0x3] %vm228_vm1, %v4947_v0 }
  0x44   : > { %314 = vst.msk [vmem:[#allocation2 + $0x19] sm:$0xff] %vm225_vm0, %v281_v1  ;;  %315 = vst.msk [vmem:[#allocation2 + $0x21] sm:$0xff] %vm225_vm0, %v282_v2 }
  0x45   : > { %316 = vst.msk [vmem:[#allocation2 + $0x31] sm:$0xff] %vm225_vm0, %v283_v3  ;;  %317 = vst.msk [vmem:[#allocation2 + $0x39] sm:$0xff] %vm225_vm0, %v284_v4 }
  0x46   : > { %318 = vst.msk [vmem:[#allocation2 + $0x49] sm:$0xff] %vm225_vm0, %v285_v5  ;;  %319 = vst.msk [vmem:[#allocation2 + $0x51] sm:$0xff] %vm225_vm0, %v286_v6 }
  0x47   : > { %320 = vst.msk [vmem:[#allocation2 + $0x61] sm:$0xff] %vm225_vm0, %v287_v9  ;;  %321 = vst.msk [vmem:[#allocation2 + $0x69] sm:$0xff] %vm225_vm0, %v288_v10 }
  0x48   : > { %322 = vst.msk [vmem:[#allocation2 + $0x79] sm:$0xff] %vm225_vm0, %v289_v11  ;;  %323 = vst.msk [vmem:[#allocation2 + $0x81] sm:$0xff] %vm225_vm0, %v290_v12 }
  0x49   : > { %324 = vst.msk [vmem:[#allocation2 + $0x91] sm:$0xff] %vm225_vm0, %v291_v13  ;;  %325 = vst.msk [vmem:[#allocation2 + $0x99] sm:$0xff] %vm225_vm0, %v292_v14 }
  0x4a   : > { %326 = vst.msk [vmem:[#allocation2 + $0xa9] sm:$0xff] %vm225_vm0, %v293_v15  ;;  %327 = vst.msk [vmem:[#allocation2 + $0xb1] sm:$0xff] %vm225_vm0, %v294_v16 }
  0x4b   : > { %328 = vst.msk [vmem:[#allocation2 + $0xc1] sm:$0xff] %vm225_vm0, %v295_v17  ;;  %329 = vst.msk [vmem:[#allocation2 + $0xc9] sm:$0xff] %vm225_vm0, %v296_v18  ;;  %v5273_v25 = vld [vmem:[#allocation2 + $0x19] sm:$0xff]  ;;  %v5282_v27 = vld [vmem:[#allocation2 + $0x21] sm:$0xff] }
  0x4c   : > { %330 = vst.msk [vmem:[#allocation2 + $0xd9] sm:$0xff] %vm225_vm0, %v297_v19  ;;  %331 = vst.msk [vmem:[#allocation2 + $0xe1] sm:$0xff] %vm225_vm0, %v298_v20  ;;  %v5275_v26 = vld [vmem:[#allocation2 + $0x31] sm:$0xff]  ;;  %478 = vrot.lane.b32.xlu1 %v5273_v25, %s4948_s25  ;;  %v5294_v31 = vld [vmem:[#allocation2 + $0x39] sm:$0xff] }
  0x4d   : > { %332 = vst.msk [vmem:[#allocation2 + $0xf1] sm:$0xff] %vm225_vm0, %v299_v21  ;;  %333 = vst.msk [vmem:[#allocation2 + $0xf9] sm:$0xff] %vm225_vm0, %v300_v22  ;;  %482 = vrot.lane.b32.xlu0 %v5275_v26, %s4948_s25  ;;  %v5290_v30 = vld [vmem:[#allocation2 + $0x49] sm:$0xff]  ;;  %v5311_v39 = vld [vmem:[#allocation2 + $0x51] sm:$0xff] }
  0x4e   : > { %334 = vst.msk [vmem:[#allocation2 + $0x109] sm:$0xff] %vm225_vm0, %v301_v23  ;;  %335 = vst.msk [vmem:[#allocation2 + $0x111] sm:$0xff] %vm225_vm0, %v302_v24  ;;  %v5298_v32 = vld [vmem:[#allocation2 + $0x61] sm:$0xff]  ;;  %v5322_v41 = vld [vmem:[#allocation2 + $0x69] sm:$0xff] }
  0x4f   : > { %336 = vst.msk [vmem:[#allocation2 + $0x121] sm:$0xff] %vm225_vm0, %v303_v28  ;;  %337 = vst.msk [vmem:[#allocation2 + $0x129] sm:$0xff] %vm225_vm0, %v304_v29  ;;  %v5318_v40 = vld [vmem:[#allocation2 + $0x79] sm:$0xff]  ;;  %v5330_v43 = vld [vmem:[#allocation2 + $0x81] sm:$0xff] }
  0x50   : > { %480 = vrot.lane.b32.xlu1 %v5282_v27, %s4948_s25  ;;  %338 = vst.msk [vmem:[#allocation2 + $0x139] sm:$0xff] %vm225_vm0, %v305_v33  ;;  %339 = vst.msk [vmem:[#allocation2 + $0x141] sm:$0xff] %vm225_vm0, %v306_v34  ;;  %v5326_v42 = vld [vmem:[#allocation2 + $0x91] sm:$0xff]  ;;  %v5340_v47 = vld [vmem:[#allocation2 + $0x99] sm:$0xff] }
  0x51   : > { %486 = vrot.lane.b32.xlu0 %v5290_v30, %s4948_s25  ;;  %340 = vst.msk [vmem:[#allocation2 + $0x151] sm:$0xff] %vm225_vm0, %v307_v35  ;;  %341 = vst.msk [vmem:[#allocation2 + $0x159] sm:$0xff] %vm225_vm0, %v308_v36  ;;  %v5334_v44 = vld [vmem:[#allocation2 + $0xa9] sm:$0xff]  ;;  %v5338_v46 = vld [vmem:[#allocation2 + $0x18] sm:$0xff] }
  0x52   : > { %342 = vst.msk [vmem:[#allocation2 + $0x169] sm:$0xff] %vm225_vm0, %v309_v37  ;;  %343 = vst.msk [vmem:[#allocation2 + $0x171] sm:$0xff] %vm225_vm0, %v310_v38  ;;  %v5348_v49 = vld [vmem:[#allocation2 + $0x20] sm:$0xff]  ;;  %v5354_v51 = vld [vmem:[#allocation2 + $0x30] sm:$0xff] }
  0x53   : > { %378 = vst.msk [vmem:[#allocation4] sm:$0xff] %vm225_vm0, %v346_v45  ;;  %380 = vst.msk [vmem:[#allocation4 + $0x10] sm:$0xff] %vm225_vm0, %v5338_v46  ;;  %v5350_v50 = vld [vmem:[#allocation2 + $0xc1] sm:$0xff]  ;;  %v5356_v52 = vld [vmem:[#allocation2 + $0x38] sm:$0xff] }
  0x54   : > { %484 = vrot.lane.b32.xlu1 %v5294_v31, %s4948_s25  ;;  %379 = vst.msk [vmem:[#allocation4 + $0x8] sm:$0xff] %vm225_vm0, %v347_v48  ;;  %381 = vst.msk [vmem:[#allocation4 + $0x18] sm:$0xff] %vm225_vm0, %v5348_v49  ;;  %v5360_v53 = vld [vmem:[#allocation2 + $0xb1] sm:$0xff]  ;;  %v5366_v54 = vld [vmem:[#allocation2 + $0x48] sm:$0xff] }
  0x55   : > { %490 = vrot.lane.b32.xlu0 %v5298_v32, %s4948_s25  ;;  %382 = vst.msk [vmem:[#allocation4 + $0x20] sm:$0xff] %vm225_vm0, %v5354_v51  ;;  %383 = vst.msk [vmem:[#allocation4 + $0x28] sm:$0xff] %vm225_vm0, %v5356_v52  ;;  %v5368_v55 = vld [vmem:[#allocation2 + $0x50] sm:$0xff]  ;;  %v5370_v56 = vld [vmem:[#allocation2 + $0xd9] sm:$0xff] }
  0x56   : > { %384 = vst.msk [vmem:[#allocation4 + $0x30] sm:$0xff] %vm225_vm0, %v5366_v54  ;;  %385 = vst.msk [vmem:[#allocation4 + $0x38] sm:$0xff] %vm225_vm0, %v5368_v55  ;;  %v5376_v57 = vld [vmem:[#allocation2 + $0x60] sm:$0xff]  ;;  %v5378_v58 = vld [vmem:[#allocation2 + $0x68] sm:$0xff] }
  0x57   : > { %v5380_v59 = vld [vmem:[#allocation2 + $0x78] sm:$0xff]  ;;  %386 = vst.msk [vmem:[#allocation4 + $0x40] sm:$0xff] %vm225_vm0, %v5376_v57  ;;  %387 = vst.msk [vmem:[#allocation4 + $0x48] sm:$0xff] %vm225_vm0, %v5378_v58  ;;  %v5390_v60 = vld [vmem:[#allocation2 + $0x80] sm:$0xff] }
  0x58   : > { %488 = vrot.lane.b32.xlu1 %v5311_v39, %s4948_s25  ;;  %388 = vst.msk [vmem:[#allocation4 + $0x50] sm:$0xff] %vm225_vm0, %v5380_v59  ;;  %v5392_v61 = vld [vmem:[#allocation2 + $0x90] sm:$0xff]  ;;  %v5394_v62 = vld [vmem:[#allocation2 + $0x98] sm:$0xff]  ;;  %389 = vst.msk [vmem:[#allocation4 + $0x58] sm:$0xff] %vm225_vm0, %v5390_v60 }
  0x59   : > { %494 = vrot.lane.b32.xlu0 %v5318_v40, %s4948_s25  ;;  %v5396_v63 = vld [vmem:[#allocation2 + $0xc9] sm:$0xff]  ;;  %390 = vst.msk [vmem:[#allocation4 + $0x60] sm:$0xff] %vm225_vm0, %v5392_v61  ;;  %391 = vst.msk [vmem:[#allocation4 + $0x68] sm:$0xff] %vm225_vm0, %v5394_v62  ;;  %v5408_v2 = vld [vmem:[#allocation2 + $0xc0] sm:$0xff] }
  0x5a   : > { %v5404_v0 = vld [vmem:[#allocation2 + $0xa8] sm:$0xff]  ;;  %v5406_v1 = vld [vmem:[#allocation2 + $0xb0] sm:$0xff]  ;;  %394 = vst.msk [vmem:[#allocation4 + $0x80] sm:$0xff] %vm225_vm0, %v5408_v2  ;;  %v5420_v4 = vld [vmem:[#allocation2 + $0xd8] sm:$0xff] }
  0x5b   : > { %392 = vst.msk [vmem:[#allocation4 + $0x70] sm:$0xff] %vm225_vm0, %v5404_v0  ;;  %393 = vst.msk [vmem:[#allocation4 + $0x78] sm:$0xff] %vm225_vm0, %v5406_v1  ;;  %v5418_v3 = vld [vmem:[#allocation2 + $0xc8] sm:$0xff]  ;;  %v5422_v5 = vld [vmem:[#allocation2 + $0xe0] sm:$0xff] }
  0x5c   : > { %492 = vrot.lane.b32.xlu1 %v5322_v41, %s4948_s25  ;;  %395 = vst.msk [vmem:[#allocation4 + $0x88] sm:$0xff] %vm225_vm0, %v5418_v3  ;;  %396 = vst.msk [vmem:[#allocation4 + $0x90] sm:$0xff] %vm225_vm0, %v5420_v4  ;;  %v5430_v6 = vld [vmem:[#allocation2 + $0xf0] sm:$0xff]  ;;  %v5432_v7 = vld [vmem:[#allocation2 + $0xf8] sm:$0xff] }
  0x5d   : > { %498 = vrot.lane.b32.xlu0 %v5326_v42, %s4948_s25  ;;  %397 = vst.msk [vmem:[#allocation4 + $0x98] sm:$0xff] %vm225_vm0, %v5422_v5  ;;  %v5434_v8 = vld [vmem:[#allocation2 + $0x108] sm:$0xff]  ;;  %398 = vst.msk [vmem:[#allocation4 + $0xa0] sm:$0xff] %vm225_vm0, %v5430_v6  ;;  %v5444_v9 = vld [vmem:[#allocation2 + $0x110] sm:$0xff] }
  0x5e   : > { %399 = vst.msk [vmem:[#allocation4 + $0xa8] sm:$0xff] %vm225_vm0, %v5432_v7  ;;  %400 = vst.msk [vmem:[#allocation4 + $0xb0] sm:$0xff] %vm225_vm0, %v5434_v8  ;;  %v5446_v10 = vld [vmem:[#allocation2 + $0xf1] sm:$0xff]  ;;  %v5452_v11 = vld [vmem:[#allocation2 + $0x120] sm:$0xff] }
  0x5f   : > { %401 = vst.msk [vmem:[#allocation4 + $0xb8] sm:$0xff] %vm225_vm0, %v5444_v9  ;;  %v5454_v12 = vld [vmem:[#allocation2 + $0x128] sm:$0xff]  ;;  %402 = vst.msk [vmem:[#allocation4 + $0xc0] sm:$0xff] %vm225_vm0, %v5452_v11  ;;  %v5468_v15 = vld [vmem:[#allocation2 + $0x138] sm:$0xff] }
  0x60   : > { %496 = vrot.lane.b32.xlu1 %v5330_v43, %s4948_s25  ;;  %v5456_v13 = vld [vmem:[#allocation2 + $0xe1] sm:$0xff]  ;;  %403 = vst.msk [vmem:[#allocation4 + $0xc8] sm:$0xff] %vm225_vm0, %v5454_v12  ;;  %v5464_v14 = vld [vmem:[#allocation2 + $0x109] sm:$0xff]  ;;  %v5472_v17 = vld [vmem:[#allocation2 + $0xf9] sm:$0xff] }
  0x61   : > { %502 = vrot.lane.b32.xlu0 %v5334_v44, %s4948_s25  ;;  %v5470_v16 = vld [vmem:[#allocation2 + $0x140] sm:$0xff]  ;;  %404 = vst.msk [vmem:[#allocation4 + $0xd0] sm:$0xff] %vm225_vm0, %v5468_v15  ;;  %v5484_v19 = vld [vmem:[#allocation2 + $0x150] sm:$0xff]  ;;  %v5486_v20 = vld [vmem:[#allocation2 + $0x158] sm:$0xff] }
  0x62   : > { %405 = vst.msk [vmem:[#allocation4 + $0xd8] sm:$0xff] %vm225_vm0, %v5470_v16  ;;  %v5480_v18 = vld [vmem:[#allocation2 + $0x121] sm:$0xff]  ;;  %v5488_v21 = vld [vmem:[#allocation2 + $0x111] sm:$0xff]  ;;  %406 = vst.msk [vmem:[#allocation4 + $0xe0] sm:$0xff] %vm225_vm0, %v5484_v19 }
  0x63   : > { %407 = vst.msk [vmem:[#allocation4 + $0xe8] sm:$0xff] %vm225_vm0, %v5486_v20  ;;  %v5496_v22 = vld [vmem:[#allocation2 + $0x139] sm:$0xff]  ;;  %v5500_v23 = vld [vmem:[#allocation2 + $0x168] sm:$0xff]  ;;  %v5502_v24 = vld [vmem:[#allocation2 + $0x170] sm:$0xff] }
  0x64   : > { %500 = vrot.lane.b32.xlu1 %v5340_v47, %s4948_s25  ;;  %v5504_v28 = vld [vmem:[#allocation2 + $0x129] sm:$0xff]  ;;  %408 = vst.msk [vmem:[#allocation4 + $0xf0] sm:$0xff] %vm225_vm0, %v5500_v23  ;;  %409 = vst.msk [vmem:[#allocation4 + $0xf8] sm:$0xff] %vm225_vm0, %v5502_v24  ;;  %v5512_v29 = vld [vmem:[#allocation2 + $0x151] sm:$0xff] }
  0x65   : > { %506 = vrot.lane.b32.xlu0 %v5350_v50, %s4948_s25  ;;  %v5516_v33 = vld [vmem:[#allocation2 + $0x141] sm:$0xff]  ;;  %v5521_v35 = vld [vmem:[#allocation2 + $0x169] sm:$0xff]  ;;  %v5528_v37 = vld [vmem:[#allocation2 + $0x159] sm:$0xff] }
  0x66   : > { %7414 = vst [vmem:[#allocation5_spill] sm:$0xff] %v5516_v33  ;;  %v311_v34 = vld [vmem:[%s5228_s24 + $0xf0] sm:$0xff]  ;;  %7415 = vst [vmem:[#allocation6_spill] sm:$0xff] %v5521_v35  ;;  %v312_v36 = vld [vmem:[%s5228_s24 + $0xf8] sm:$0xff] }
  0x67   : > { %344 = vst.msk [vmem:[#allocation2 + $0x181] sm:$0xff] %vm225_vm0, %v311_v34  ;;  %345 = vst.msk [vmem:[#allocation2 + $0x189] sm:$0xff] %vm225_vm0, %v312_v36  ;;  %v603_v38 = vld [vmem:[#allocation2 + $0x2] sm:$0xff]  ;;  %v5534_v45 = vld [vmem:[#allocation2 + $0x171] sm:$0xff] }
  0x68   : > { %504 = vrot.lane.b32.xlu1 %v5360_v53, %s4948_s25  ;;  %7416 = vst [vmem:[#allocation7_spill] sm:$0xff] %v5528_v37  ;;  %7417 = vst [vmem:[#allocation8_spill] sm:$0xff] %v5534_v45  ;;  %v5537_v48 = vld [vmem:[#allocation2 + $0x1a] sm:$0xff]  ;;  %v604_v34 = vld [vmem:[#allocation2 + $0xa] sm:$0xff] }
  0x69   : > { %510 = vrot.lane.b32.xlu0 %v5370_v56, %s4948_s25  ;;  %7418 = vst [vmem:[#allocation9_spill] sm:$0xff] %v5537_v48  ;;  %v5543_v36 = vld [vmem:[#allocation2 + $0x32] sm:$0xff] }
  0x6a   : > { %7419 = vst [vmem:[#allocation10_spill] sm:$0xff] %v5543_v36 }
  0x6c   : > { %508 = vrot.lane.b32.xlu1 %v5396_v63, %s4948_s25 }
  0x6d   : > { %514 = vrot.lane.b32.xlu0 %v5446_v10, %s4948_s25 }
  0x70   : > { %512 = vrot.lane.b32.xlu1 %v5456_v13, %s4948_s25 }
  0x71   : > { %518 = vrot.lane.b32.xlu0 %v5464_v14, %s4948_s25 }
  0x74   : > { %516 = vrot.lane.b32.xlu1 %v5472_v17, %s4948_s25 }
  0x75   : > { %522 = vrot.lane.b32.xlu0 %v5480_v18, %s4948_s25 }
  0x78   : > { %520 = vrot.lane.b32.xlu1 %v5488_v21, %s4948_s25 }
  0x79   : > { %526 = vrot.lane.b32.xlu0 %v5496_v22, %s4948_s25 }
  0x7c   : > { %524 = vrot.lane.b32.xlu1 %v5504_v28, %s4948_s25 }
  0x7d   : > { %530 = vrot.lane.b32.xlu0 %v5512_v29, %s4948_s25 }
  0x80   : > { %528 = vrot.lane.b32.xlu1 %v5516_v33, %s4948_s25 }
  0x81   : > { %534 = vrot.lane.b32.xlu0 %v5521_v35, %s4948_s25  ;;  %v5546_v35 = vld [vmem:[#allocation2 + $0x22] sm:$0xff] }
  0x82   : > { %7420 = vst [vmem:[#allocation11_spill] sm:$0xff] %v5546_v35 }
  0x84   : > { %532 = vrot.lane.b32.xlu1 %v5528_v37, %s4948_s25  ;;  %v5550_v37 = vld [vmem:[#allocation2 + $0x4a] sm:$0xff] }
  0x85   : > { %667 = vrot.lane.b32.xlu0 %v603_v38, %s4949_s26  ;;  %7421 = vst [vmem:[#allocation12_spill] sm:$0xff] %v5550_v37  ;;  %v5554_v38 = vld [vmem:[#allocation2 + $0x3a] sm:$0xff] }
  0x86   : > { %7422 = vst [vmem:[#allocation13_spill] sm:$0xff] %v5554_v38 }
  0x88   : > { %536 = vrot.lane.b32.xlu1 %v5534_v45, %s4948_s25  ;;  %v5634_v45 = vld [vmem:[#allocation2 + $0x12a] sm:$0xff] }
  0x89   : > { %671 = vrot.lane.b32.xlu0 %v5537_v48, %s4949_s26  ;;  %v5558_v48 = vld [vmem:[#allocation2 + $0x62] sm:$0xff]  ;;  %7442 = vst [vmem:[#allocation33_spill] sm:$0xff] %v5634_v45 }
  0x8a   : > { %7423 = vst [vmem:[#allocation14_spill] sm:$0xff] %v5558_v48 }
  0x8c   : > { %669 = vrot.lane.b32.xlu1 %v604_v34, %s4949_s26  ;;  %v5562_v34 = vld [vmem:[#allocation2 + $0x52] sm:$0xff] }
  0x8d   : > { %675 = vrot.lane.b32.xlu0 %v5543_v36, %s4949_s26  ;;  %7424 = vst [vmem:[#allocation15_spill] sm:$0xff] %v5562_v34  ;;  %v5566_v36 = vld [vmem:[#allocation2 + $0x7a] sm:$0xff] }
  0x8e   : > { %7425 = vst [vmem:[#allocation16_spill] sm:$0xff] %v5566_v36 }
  0x90   : > { %673 = vrot.lane.b32.xlu1 %v5546_v35, %s4949_s26  ;;  %v5570_v35 = vld [vmem:[#allocation2 + $0x6a] sm:$0xff] }
  0x91   : > { %679 = vrot.lane.b32.xlu0 %v5550_v37, %s4949_s26  ;;  %7426 = vst [vmem:[#allocation17_spill] sm:$0xff] %v5570_v35  ;;  %v5574_v37 = vld [vmem:[#allocation2 + $0x92] sm:$0xff] }
  0x92   : > { %7427 = vst [vmem:[#allocation18_spill] sm:$0xff] %v5574_v37 }
  0x94   : > { %677 = vrot.lane.b32.xlu1 %v5554_v38, %s4949_s26  ;;  %v5578_v38 = vld [vmem:[#allocation2 + $0x82] sm:$0xff] }
  0x95   : > { %683 = vrot.lane.b32.xlu0 %v5558_v48, %s4949_s26  ;;  %7428 = vst [vmem:[#allocation19_spill] sm:$0xff] %v5578_v38  ;;  %v5582_v48 = vld [vmem:[#allocation2 + $0xaa] sm:$0xff] }
  0x96   : > { %7429 = vst [vmem:[#allocation20_spill] sm:$0xff] %v5582_v48 }
  0x98   : > { %681 = vrot.lane.b32.xlu1 %v5562_v34, %s4949_s26  ;;  %v5586_v34 = vld [vmem:[#allocation2 + $0x9a] sm:$0xff] }
  0x99   : > { %687 = vrot.lane.b32.xlu0 %v5566_v36, %s4949_s26  ;;  %7430 = vst [vmem:[#allocation21_spill] sm:$0xff] %v5586_v34  ;;  %v5590_v36 = vld [vmem:[#allocation2 + $0xc2] sm:$0xff] }
  0x9a   : > { %7431 = vst [vmem:[#allocation22_spill] sm:$0xff] %v5590_v36 }
  0x9c   : > { %685 = vrot.lane.b32.xlu1 %v5570_v35, %s4949_s26  ;;  %v5594_v35 = vld [vmem:[#allocation2 + $0xb2] sm:$0xff] }
  0x9d   : > { %691 = vrot.lane.b32.xlu0 %v5574_v37, %s4949_s26  ;;  %7432 = vst [vmem:[#allocation23_spill] sm:$0xff] %v5594_v35  ;;  %v5598_v37 = vld [vmem:[#allocation2 + $0xda] sm:$0xff] }
  0x9e   : > { %7433 = vst [vmem:[#allocation24_spill] sm:$0xff] %v5598_v37 }
  0xa0   : > { %689 = vrot.lane.b32.xlu1 %v5578_v38, %s4949_s26  ;;  %v5602_v38 = vld [vmem:[#allocation2 + $0xca] sm:$0xff] }
  0xa1   : > { %695 = vrot.lane.b32.xlu0 %v5582_v48, %s4949_s26  ;;  %7434 = vst [vmem:[#allocation25_spill] sm:$0xff] %v5602_v38  ;;  %v5606_v48 = vld [vmem:[#allocation2 + $0xf2] sm:$0xff] }
  0xa2   : > { %7435 = vst [vmem:[#allocation26_spill] sm:$0xff] %v5606_v48 }
  0xa4   : > { %693 = vrot.lane.b32.xlu1 %v5586_v34, %s4949_s26  ;;  %v5610_v34 = vld [vmem:[#allocation2 + $0xe2] sm:$0xff] }
  0xa5   : > { %699 = vrot.lane.b32.xlu0 %v5590_v36, %s4949_s26  ;;  %7436 = vst [vmem:[#allocation27_spill] sm:$0xff] %v5610_v34  ;;  %v5614_v36 = vld [vmem:[#allocation2 + $0x10a] sm:$0xff] }
  0xa6   : > { %7437 = vst [vmem:[#allocation28_spill] sm:$0xff] %v5614_v36 }
  0xa8   : > { %697 = vrot.lane.b32.xlu1 %v5594_v35, %s4949_s26  ;;  %v5618_v35 = vld [vmem:[#allocation2 + $0xfa] sm:$0xff] }
  0xa9   : > { %703 = vrot.lane.b32.xlu0 %v5598_v37, %s4949_s26  ;;  %7438 = vst [vmem:[#allocation29_spill] sm:$0xff] %v5618_v35  ;;  %v5622_v37 = vld [vmem:[#allocation2 + $0x122] sm:$0xff] }
  0xaa   : > { %7439 = vst [vmem:[#allocation30_spill] sm:$0xff] %v5622_v37 }
  0xac   : > { %701 = vrot.lane.b32.xlu1 %v5602_v38, %s4949_s26  ;;  %v5626_v38 = vld [vmem:[#allocation2 + $0x112] sm:$0xff] }
  0xad   : > { %707 = vrot.lane.b32.xlu0 %v5606_v48, %s4949_s26  ;;  %7440 = vst [vmem:[#allocation31_spill] sm:$0xff] %v5626_v38  ;;  %v5630_v48 = vld [vmem:[#allocation2 + $0x13a] sm:$0xff] }
  0xae   : > { %7441 = vst [vmem:[#allocation32_spill] sm:$0xff] %v5630_v48 }
  0xb0   : > { %705 = vrot.lane.b32.xlu1 %v5610_v34, %s4949_s26  ;;  %v475_v34 = vpop.permute.xlu0 %474 }
  0xb1   : > { %711 = vrot.lane.b32.xlu0 %v5614_v36, %s4949_s26  ;;  %571 = vst.msk [vmem:[#allocation4] sm:$0xff] %vm570_vm2, %v475_v34  ;;  %v5643_v36 = vld [vmem:[#allocation2 + $0x142] sm:$0xff]  ;;  %v5649_v34 = vld [vmem:[#allocation2 + $0x16a] sm:$0xff] }
  0xb2   : > { %7443 = vst [vmem:[#allocation34_spill] sm:$0xff] %v5643_v36 }
  0xb4   : > { %709 = vrot.lane.b32.xlu1 %v5618_v35, %s4949_s26  ;;  %v5639_v35 = vld [vmem:[#allocation2 + $0x152] sm:$0xff] }
  0xb5   : > { %715 = vrot.lane.b32.xlu0 %v5622_v37, %s4949_s26  ;;  %v477_v37 = vpop.permute.xlu0 %476 }
  0xb6   : > { %572 = vst.msk [vmem:[#allocation4 + $0x8] sm:$0xff] %vm570_vm2, %v477_v37  ;;  %v5661_v37 = vld [vmem:[#allocation2 + $0x172] sm:$0xff] }
  0xb8   : > { %713 = vrot.lane.b32.xlu1 %v5626_v38, %s4949_s26  ;;  %v5653_v38 = vld [vmem:[#allocation2 + $0x15a] sm:$0xff] }
  0xb9   : > { %719 = vrot.lane.b32.xlu0 %v5630_v48, %s4949_s26 }
  0xbc   : > { %717 = vrot.lane.b32.xlu1 %v5634_v45, %s4949_s26 }
  0xbd   : > { %723 = vrot.lane.b32.xlu0 %v5639_v35, %s4949_s26 }
  0xbe   : > { %v479_v33 = vpop.permute.xlu1 %478 }
  0xbf   : > { %573 = vst.msk [vmem:[#allocation4 + $0x10] sm:$0xff] %vm570_vm2, %v479_v33  ;;  %v483_v48 = vpop.permute.xlu0 %482 }
  0xc0   : > { %721 = vrot.lane.b32.xlu1 %v5643_v36, %s4949_s26  ;;  %575 = vst.msk [vmem:[#allocation4 + $0x20] sm:$0xff] %vm570_vm2, %v483_v48 }
  0xc1   : > { %727 = vrot.lane.b32.xlu0 %v5649_v34, %s4949_s26 }
  0xc2   : > { %v481_v45 = vpop.permute.xlu1 %480 }
  0xc3   : > { %574 = vst.msk [vmem:[#allocation4 + $0x18] sm:$0xff] %vm570_vm2, %v481_v45  ;;  %v487_v33 = vpop.permute.xlu0 %486 }
  0xc4   : > { %725 = vrot.lane.b32.xlu1 %v5653_v38, %s4949_s26  ;;  %577 = vst.msk [vmem:[#allocation4 + $0x30] sm:$0xff] %vm570_vm2, %v487_v33 }
  0xc5   : > { %860 = vrot.lane.b32.xlu0 %v5338_v46, %s4950_s27 }
  0xc6   : > { %v485_v36 = vpop.permute.xlu1 %484 }
  0xc7   : > { %576 = vst.msk [vmem:[#allocation4 + $0x28] sm:$0xff] %vm570_vm2, %v485_v36  ;;  %v491_v48 = vpop.permute.xlu0 %490 }
  0xc8   : > { %729 = vrot.lane.b32.xlu1 %v5661_v37, %s4949_s26  ;;  %579 = vst.msk [vmem:[#allocation4 + $0x40] sm:$0xff] %vm570_vm2, %v491_v48 }
  0xc9   : > { %864 = vrot.lane.b32.xlu0 %v5354_v51, %s4950_s27 }
  0xca   : > { %v489_v45 = vpop.permute.xlu1 %488 }
  0xcb   : > { %578 = vst.msk [vmem:[#allocation4 + $0x38] sm:$0xff] %vm570_vm2, %v489_v45  ;;  %v495_v33 = vpop.permute.xlu0 %494 }
  0xcc   : > { %862 = vrot.lane.b32.xlu1 %v5348_v49, %s4950_s27  ;;  %581 = vst.msk [vmem:[#allocation4 + $0x50] sm:$0xff] %vm570_vm2, %v495_v33 }
  0xcd   : > { %868 = vrot.lane.b32.xlu0 %v5366_v54, %s4950_s27 }
  0xce   : > { %v493_v46 = vpop.permute.xlu1 %492 }
  0xcf   : > { %580 = vst.msk [vmem:[#allocation4 + $0x48] sm:$0xff] %vm570_vm2, %v493_v46  ;;  %v499_v36 = vpop.permute.xlu0 %498 }
  0xd0   : > { %866 = vrot.lane.b32.xlu1 %v5356_v52, %s4950_s27  ;;  %583 = vst.msk [vmem:[#allocation4 + $0x60] sm:$0xff] %vm570_vm2, %v499_v36 }
  0xd1   : > { %872 = vrot.lane.b32.xlu0 %v5376_v57, %s4950_s27 }
  0xd2   : > { %v497_v48 = vpop.permute.xlu1 %496 }
  0xd3   : > { %582 = vst.msk [vmem:[#allocation4 + $0x58] sm:$0xff] %vm570_vm2, %v497_v48  ;;  %v503_v49 = vpop.permute.xlu0 %502 }
  0xd4   : > { %870 = vrot.lane.b32.xlu1 %v5368_v55, %s4950_s27  ;;  %585 = vst.msk [vmem:[#allocation4 + $0x70] sm:$0xff] %vm570_vm2, %v503_v49 }
  0xd5   : > { %876 = vrot.lane.b32.xlu0 %v5380_v59, %s4950_s27 }
  0xd6   : > { %v501_v45 = vpop.permute.xlu1 %500 }
  0xd7   : > { %584 = vst.msk [vmem:[#allocation4 + $0x68] sm:$0xff] %vm570_vm2, %v501_v45  ;;  %v507_v33 = vpop.permute.xlu0 %506 }
  0xd8   : > { %874 = vrot.lane.b32.xlu1 %v5378_v58, %s4950_s27  ;;  %587 = vst.msk [vmem:[#allocation4 + $0x80] sm:$0xff] %vm570_vm2, %v507_v33 }
  0xd9   : > { %880 = vrot.lane.b32.xlu0 %v5392_v61, %s4950_s27 }
  0xda   : > { %v505_v46 = vpop.permute.xlu1 %504 }
  0xdb   : > { %586 = vst.msk [vmem:[#allocation4 + $0x78] sm:$0xff] %vm570_vm2, %v505_v46  ;;  %v511_v36 = vpop.permute.xlu0 %510 }
  0xdc   : > { %878 = vrot.lane.b32.xlu1 %v5390_v60, %s4950_s27  ;;  %589 = vst.msk [vmem:[#allocation4 + $0x90] sm:$0xff] %vm570_vm2, %v511_v36 }
  0xdd   : > { %884 = vrot.lane.b32.xlu0 %v5404_v0, %s4950_s27 }
  0xde   : > { %v509_v48 = vpop.permute.xlu1 %508 }
  0xdf   : > { %588 = vst.msk [vmem:[#allocation4 + $0x88] sm:$0xff] %vm570_vm2, %v509_v48  ;;  %v515_v49 = vpop.permute.xlu0 %514 }
  0xe0   : > { %882 = vrot.lane.b32.xlu1 %v5394_v62, %s4950_s27  ;;  %591 = vst.msk [vmem:[#allocation4 + $0xa0] sm:$0xff] %vm570_vm2, %v515_v49 }
  0xe1   : > { %888 = vrot.lane.b32.xlu0 %v5408_v2, %s4950_s27 }
  0xe2   : > { %v513_v45 = vpop.permute.xlu1 %512 }
  0xe3   : > { %590 = vst.msk [vmem:[#allocation4 + $0x98] sm:$0xff] %vm570_vm2, %v513_v45  ;;  %v519_v33 = vpop.permute.xlu0 %518 }
  0xe4   : > { %886 = vrot.lane.b32.xlu1 %v5406_v1, %s4950_s27  ;;  %593 = vst.msk [vmem:[#allocation4 + $0xb0] sm:$0xff] %vm570_vm2, %v519_v33 }
  0xe5   : > { %892 = vrot.lane.b32.xlu0 %v5420_v4, %s4950_s27 }
  0xe6   : > { %v517_v46 = vpop.permute.xlu1 %516 }
  0xe7   : > { %592 = vst.msk [vmem:[#allocation4 + $0xa8] sm:$0xff] %vm570_vm2, %v517_v46  ;;  %v523_v36 = vpop.permute.xlu0 %522 }
  0xe8   : > { %890 = vrot.lane.b32.xlu1 %v5418_v3, %s4950_s27  ;;  %595 = vst.msk [vmem:[#allocation4 + $0xc0] sm:$0xff] %vm570_vm2, %v523_v36 }
  0xe9   : > { %896 = vrot.lane.b32.xlu0 %v5430_v6, %s4950_s27 }
  0xea   : > { %v521_v48 = vpop.permute.xlu1 %520 }
  0xeb   : > { %594 = vst.msk [vmem:[#allocation4 + $0xb8] sm:$0xff] %vm570_vm2, %v521_v48  ;;  %v527_v49 = vpop.permute.xlu0 %526 }
  0xec   : > { %894 = vrot.lane.b32.xlu1 %v5422_v5, %s4950_s27  ;;  %597 = vst.msk [vmem:[#allocation4 + $0xd0] sm:$0xff] %vm570_vm2, %v527_v49 }
  0xed   : > { %900 = vrot.lane.b32.xlu0 %v5434_v8, %s4950_s27 }
  0xee   : > { %v525_v45 = vpop.permute.xlu1 %524 }
  0xef   : > { %596 = vst.msk [vmem:[#allocation4 + $0xc8] sm:$0xff] %vm570_vm2, %v525_v45  ;;  %v531_v33 = vpop.permute.xlu0 %530 }
  0xf0   : > { %898 = vrot.lane.b32.xlu1 %v5432_v7, %s4950_s27  ;;  %599 = vst.msk [vmem:[#allocation4 + $0xe0] sm:$0xff] %vm570_vm2, %v531_v33 }
  0xf1   : > { %904 = vrot.lane.b32.xlu0 %v5452_v11, %s4950_s27 }
  0xf2   : > { %v529_v46 = vpop.permute.xlu1 %528 }
  0xf3   : > { %598 = vst.msk [vmem:[#allocation4 + $0xd8] sm:$0xff] %vm570_vm2, %v529_v46  ;;  %v535_v36 = vpop.permute.xlu0 %534 }
  0xf4   : > { %902 = vrot.lane.b32.xlu1 %v5444_v9, %s4950_s27  ;;  %601 = vst.msk [vmem:[#allocation4 + $0xf0] sm:$0xff] %vm570_vm2, %v535_v36  ;;  %v5751_v36 = vld [vmem:[#allocation2 + $0x180] sm:$0xff] }
  0xf5   : > { %908 = vrot.lane.b32.xlu0 %v5468_v15, %s4950_s27 }
  0xf6   : > { %v533_v48 = vpop.permute.xlu1 %532 }
  0xf7   : > { %600 = vst.msk [vmem:[#allocation4 + $0xe8] sm:$0xff] %vm570_vm2, %v533_v48  ;;  %v668_v49 = vpop.permute.xlu0 %667 }
  0xf8   : > { %906 = vrot.lane.b32.xlu1 %v5454_v12, %s4950_s27  ;;  %764 = vst.msk [vmem:[#allocation4] sm:$0xff] %vm763_vm3, %v668_v49 }
  0xf9   : > { %912 = vrot.lane.b32.xlu0 %v5484_v19, %s4950_s27 }
  0xfa   : > { %v537_v45 = vpop.permute.xlu1 %536 }
  0xfb   : > { %602 = vst.msk [vmem:[#allocation4 + $0xf8] sm:$0xff] %vm570_vm2, %v537_v45  ;;  %v672_v33 = vpop.permute.xlu0 %671 }
  0xfc   : > { %910 = vrot.lane.b32.xlu1 %v5470_v16, %s4950_s27  ;;  %766 = vst.msk [vmem:[#allocation4 + $0x10] sm:$0xff] %vm763_vm3, %v672_v33  ;;  %v5761_v33 = vld [vmem:[#allocation2 + $0x188] sm:$0xff] }
  0xfd   : > { %916 = vrot.lane.b32.xlu0 %v5500_v23, %s4950_s27 }
  0xfe   : > { %v670_v46 = vpop.permute.xlu1 %669 }
  0xff   : > { %765 = vst.msk [vmem:[#allocation4 + $0x8] sm:$0xff] %vm763_vm3, %v670_v46  ;;  %v676_v48 = vpop.permute.xlu0 %675 }
 0x100   : > { %914 = vrot.lane.b32.xlu1 %v5486_v20, %s4950_s27  ;;  %768 = vst.msk [vmem:[#allocation4 + $0x20] sm:$0xff] %vm763_vm3, %v676_v48 }
 0x101   : > { %920 = vrot.lane.b32.xlu0 %v5751_v36, %s4950_s27 }
 0x102   : > { %v674_v49 = vpop.permute.xlu1 %673 }
 0x103   : > { %767 = vst.msk [vmem:[#allocation4 + $0x18] sm:$0xff] %vm763_vm3, %v674_v49  ;;  %v680_v45 = vpop.permute.xlu0 %679 }
 0x104   : > { %918 = vrot.lane.b32.xlu1 %v5502_v24, %s4950_s27  ;;  %770 = vst.msk [vmem:[#allocation4 + $0x30] sm:$0xff] %vm763_vm3, %v680_v45 }
 0x105   : > { %1053 = vrot.lane.b32.xlu0 %v5273_v25, %s4951_s28 }
 0x106   : > { %v678_v46 = vpop.permute.xlu1 %677 }
 0x107   : > { %769 = vst.msk [vmem:[#allocation4 + $0x28] sm:$0xff] %vm763_vm3, %v678_v46  ;;  %v684_v48 = vpop.permute.xlu0 %683 }
 0x108   : > { %922 = vrot.lane.b32.xlu1 %v5761_v33, %s4950_s27  ;;  %772 = vst.msk [vmem:[#allocation4 + $0x40] sm:$0xff] %vm763_vm3, %v684_v48 }
 0x109   : > { %1057 = vrot.lane.b32.xlu0 %v5275_v26, %s4951_s28 }
 0x10a   : > { %v682_v49 = vpop.permute.xlu1 %681 }
 0x10b   : > { %771 = vst.msk [vmem:[#allocation4 + $0x38] sm:$0xff] %vm763_vm3, %v682_v49  ;;  %v688_v45 = vpop.permute.xlu0 %687  ;;  %v7445_v49 = vld [vmem:[#allocation6_spill] sm:$0xff] }
 0x10c   : > { %1055 = vrot.lane.b32.xlu1 %v5282_v27, %s4951_s28  ;;  %774 = vst.msk [vmem:[#allocation4 + $0x50] sm:$0xff] %vm763_vm3, %v688_v45  ;;  %v7446_v45 = vld [vmem:[#allocation7_spill] sm:$0xff] }
 0x10d   : > { %1061 = vrot.lane.b32.xlu0 %v5290_v30, %s4951_s28 }
 0x10e   : > { %v686_v25 = vpop.permute.xlu1 %685 }
 0x10f   : > { %773 = vst.msk [vmem:[#allocation4 + $0x48] sm:$0xff] %vm763_vm3, %v686_v25  ;;  %v692_v46 = vpop.permute.xlu0 %691 }
 0x110   : > { %1059 = vrot.lane.b32.xlu1 %v5294_v31, %s4951_s28  ;;  %776 = vst.msk [vmem:[#allocation4 + $0x60] sm:$0xff] %vm763_vm3, %v692_v46  ;;  %v7447_v46 = vld [vmem:[#allocation8_spill] sm:$0xff] }
 0x111   : > { %1065 = vrot.lane.b32.xlu0 %v5298_v32, %s4951_s28 }
 0x112   : > { %v690_v26 = vpop.permute.xlu1 %689 }
 0x113   : > { %775 = vst.msk [vmem:[#allocation4 + $0x58] sm:$0xff] %vm763_vm3, %v690_v26  ;;  %v696_v27 = vpop.permute.xlu0 %695 }
 0x114   : > { %1063 = vrot.lane.b32.xlu1 %v5311_v39, %s4951_s28  ;;  %778 = vst.msk [vmem:[#allocation4 + $0x70] sm:$0xff] %vm763_vm3, %v696_v27  ;;  %v5861_v27 = vld [vmem:[#allocation2 + $0x189] sm:$0xff] }
 0x115   : > { %1069 = vrot.lane.b32.xlu0 %v5318_v40, %s4951_s28 }
 0x116   : > { %v694_v30 = vpop.permute.xlu1 %693 }
 0x117   : > { %777 = vst.msk [vmem:[#allocation4 + $0x68] sm:$0xff] %vm763_vm3, %v694_v30  ;;  %v700_v31 = vpop.permute.xlu0 %699 }
 0x118   : > { %1067 = vrot.lane.b32.xlu1 %v5322_v41, %s4951_s28  ;;  %780 = vst.msk [vmem:[#allocation4 + $0x80] sm:$0xff] %vm763_vm3, %v700_v31  ;;  %v7448_v31 = vld [vmem:[#allocation9_spill] sm:$0xff] }
 0x119   : > { %1073 = vrot.lane.b32.xlu0 %v5326_v42, %s4951_s28 }
 0x11a   : > { %v698_v32 = vpop.permute.xlu1 %697 }
 0x11b   : > { %779 = vst.msk [vmem:[#allocation4 + $0x78] sm:$0xff] %vm763_vm3, %v698_v32  ;;  %v704_v39 = vpop.permute.xlu0 %703 }
 0x11c   : > { %1071 = vrot.lane.b32.xlu1 %v5330_v43, %s4951_s28  ;;  %782 = vst.msk [vmem:[#allocation4 + $0x90] sm:$0xff] %vm763_vm3, %v704_v39 }
 0x11d   : > { %1077 = vrot.lane.b32.xlu0 %v5334_v44, %s4951_s28 }
 0x11e   : > { %v702_v40 = vpop.permute.xlu1 %701 }
 0x11f   : > { %781 = vst.msk [vmem:[#allocation4 + $0x88] sm:$0xff] %vm763_vm3, %v702_v40  ;;  %v708_v41 = vpop.permute.xlu0 %707  ;;  %v7449_v40 = vld [vmem:[#allocation10_spill] sm:$0xff] }
 0x120   : > { %1075 = vrot.lane.b32.xlu1 %v5340_v47, %s4951_s28  ;;  %784 = vst.msk [vmem:[#allocation4 + $0xa0] sm:$0xff] %vm763_vm3, %v708_v41  ;;  %v7450_v41 = vld [vmem:[#allocation11_spill] sm:$0xff] }
 0x121   : > { %1081 = vrot.lane.b32.xlu0 %v5350_v50, %s4951_s28 }
 0x122   : > { %v706_v42 = vpop.permute.xlu1 %705 }
 0x123   : > { %783 = vst.msk [vmem:[#allocation4 + $0x98] sm:$0xff] %vm763_vm3, %v706_v42  ;;  %v712_v43 = vpop.permute.xlu0 %711 }
 0x124   : > { %1079 = vrot.lane.b32.xlu1 %v5360_v53, %s4951_s28  ;;  %786 = vst.msk [vmem:[#allocation4 + $0xb0] sm:$0xff] %vm763_vm3, %v712_v43 }
 0x125   : > { %1085 = vrot.lane.b32.xlu0 %v5370_v56, %s4951_s28 }
 0x126   : > { %v710_v44 = vpop.permute.xlu1 %709 }
 0x127   : > { %785 = vst.msk [vmem:[#allocation4 + $0xa8] sm:$0xff] %vm763_vm3, %v710_v44  ;;  %v716_v47 = vpop.permute.xlu0 %715  ;;  %v7451_v44 = vld [vmem:[#allocation12_spill] sm:$0xff] }
 0x128   : > { %1083 = vrot.lane.b32.xlu1 %v5396_v63, %s4951_s28  ;;  %788 = vst.msk [vmem:[#allocation4 + $0xc0] sm:$0xff] %vm763_vm3, %v716_v47  ;;  %v7452_v47 = vld [vmem:[#allocation13_spill] sm:$0xff] }
 0x129   : > { %1089 = vrot.lane.b32.xlu0 %v5446_v10, %s4951_s28 }
 0x12a   : > { %v714_v50 = vpop.permute.xlu1 %713 }
 0x12b   : > { %787 = vst.msk [vmem:[#allocation4 + $0xb8] sm:$0xff] %vm763_vm3, %v714_v50  ;;  %v720_v53 = vpop.permute.xlu0 %719 }
 0x12c   : > { %1087 = vrot.lane.b32.xlu1 %v5456_v13, %s4951_s28  ;;  %790 = vst.msk [vmem:[#allocation4 + $0xd0] sm:$0xff] %vm763_vm3, %v720_v53 }
 0x12d   : > { %1093 = vrot.lane.b32.xlu0 %v5464_v14, %s4951_s28 }
 0x12e   : > { %v718_v56 = vpop.permute.xlu1 %717 }
 0x12f   : > { %789 = vst.msk [vmem:[#allocation4 + $0xc8] sm:$0xff] %vm763_vm3, %v718_v56  ;;  %v724_v63 = vpop.permute.xlu0 %723  ;;  %v7453_v56 = vld [vmem:[#allocation14_spill] sm:$0xff] }
 0x130   : > { %1091 = vrot.lane.b32.xlu1 %v5472_v17, %s4951_s28  ;;  %792 = vst.msk [vmem:[#allocation4 + $0xe0] sm:$0xff] %vm763_vm3, %v724_v63  ;;  %v7454_v63 = vld [vmem:[#allocation15_spill] sm:$0xff] }
 0x131   : > { %1097 = vrot.lane.b32.xlu0 %v5480_v18, %s4951_s28 }
 0x132   : > { %v722_v10 = vpop.permute.xlu1 %721 }
 0x133   : > { %791 = vst.msk [vmem:[#allocation4 + $0xd8] sm:$0xff] %vm763_vm3, %v722_v10  ;;  %v728_v13 = vpop.permute.xlu0 %727 }
 0x134   : > { %1095 = vrot.lane.b32.xlu1 %v5488_v21, %s4951_s28  ;;  %794 = vst.msk [vmem:[#allocation4 + $0xf0] sm:$0xff] %vm763_vm3, %v728_v13  ;;  %v7444_v21 = vld [vmem:[#allocation5_spill] sm:$0xff] }
 0x135   : > { %1101 = vrot.lane.b32.xlu0 %v5496_v22, %s4951_s28 }
 0x136   : > { %v726_v14 = vpop.permute.xlu1 %725 }
 0x137   : > { %793 = vst.msk [vmem:[#allocation4 + $0xe8] sm:$0xff] %vm763_vm3, %v726_v14  ;;  %v861_v17 = vpop.permute.xlu0 %860  ;;  %v7455_v14 = vld [vmem:[#allocation16_spill] sm:$0xff] }
 0x138   : > { %1099 = vrot.lane.b32.xlu1 %v5504_v28, %s4951_s28  ;;  %957 = vst.msk [vmem:[#allocation4] sm:$0xff] %vm956_vm4, %v861_v17  ;;  %v5851_v28 = vld [vmem:[#allocation2 + $0x181] sm:$0xff] }
 0x139   : > { %1105 = vrot.lane.b32.xlu0 %v5512_v29, %s4951_s28  ;;  %v7456_v17 = vld [vmem:[#allocation17_spill] sm:$0xff] }
 0x13a   : > { %v730_v18 = vpop.permute.xlu1 %729 }
 0x13b   : > { %795 = vst.msk [vmem:[#allocation4 + $0xf8] sm:$0xff] %vm763_vm3, %v730_v18  ;;  %v865_v48 = vpop.permute.xlu0 %864 }
 0x13c   : > { %1103 = vrot.lane.b32.xlu1 %v7444_v21, %s4951_s28  ;;  %959 = vst.msk [vmem:[#allocation4 + $0x10] sm:$0xff] %vm956_vm4, %v865_v48  ;;  %v7457_v48 = vld [vmem:[#allocation18_spill] sm:$0xff] }
 0x13d   : > { %1109 = vrot.lane.b32.xlu0 %v7445_v49, %s4951_s28 }
 0x13e   : > { %v863_v22 = vpop.permute.xlu1 %862 }
 0x13f   : > { %958 = vst.msk [vmem:[#allocation4 + $0x8] sm:$0xff] %vm956_vm4, %v863_v22  ;;  %v869_v29 = vpop.permute.xlu0 %868  ;;  %v7458_v22 = vld [vmem:[#allocation19_spill] sm:$0xff] }
 0x140   : > { %1107 = vrot.lane.b32.xlu1 %v7446_v45, %s4951_s28  ;;  %961 = vst.msk [vmem:[#allocation4 + $0x20] sm:$0xff] %vm956_vm4, %v869_v29  ;;  %v7459_v29 = vld [vmem:[#allocation20_spill] sm:$0xff] }
 0x141   : > { %1113 = vrot.lane.b32.xlu0 %v5851_v28, %s4951_s28 }
 0x142   : > { %v867_v25 = vpop.permute.xlu1 %866 }
 0x143   : > { %960 = vst.msk [vmem:[#allocation4 + $0x18] sm:$0xff] %vm956_vm4, %v867_v25  ;;  %v873_v26 = vpop.permute.xlu0 %872  ;;  %v7460_v25 = vld [vmem:[#allocation21_spill] sm:$0xff] }
 0x144   : > { %1111 = vrot.lane.b32.xlu1 %v7447_v46, %s4951_s28  ;;  %963 = vst.msk [vmem:[#allocation4 + $0x30] sm:$0xff] %vm956_vm4, %v873_v26 }
 0x145   : > { %1246 = vrot.lane.b32.xlu0 %v7448_v31, %s4952_s29  ;;  %v7462_v31 = vld [vmem:[#allocation23_spill] sm:$0xff] }
 0x146   : > { %v871_v30 = vpop.permute.xlu1 %870 }
 0x147   : > { %962 = vst.msk [vmem:[#allocation4 + $0x28] sm:$0xff] %vm956_vm4, %v871_v30  ;;  %v877_v32 = vpop.permute.xlu0 %876  ;;  %v7461_v30 = vld [vmem:[#allocation22_spill] sm:$0xff] }
 0x148   : > { %1115 = vrot.lane.b32.xlu1 %v5861_v27, %s4951_s28  ;;  %965 = vst.msk [vmem:[#allocation4 + $0x40] sm:$0xff] %vm956_vm4, %v877_v32 }
 0x149   : > { %1250 = vrot.lane.b32.xlu0 %v7449_v40, %s4952_s29  ;;  %v7463_v40 = vld [vmem:[#allocation24_spill] sm:$0xff] }
 0x14a   : > { %v875_v39 = vpop.permute.xlu1 %874 }
 0x14b   : > { %964 = vst.msk [vmem:[#allocation4 + $0x38] sm:$0xff] %vm956_vm4, %v875_v39  ;;  %v881_v42 = vpop.permute.xlu0 %880 }
 0x14c   : > { %1248 = vrot.lane.b32.xlu1 %v7450_v41, %s4952_s29  ;;  %967 = vst.msk [vmem:[#allocation4 + $0x50] sm:$0xff] %vm956_vm4, %v881_v42  ;;  %v7464_v41 = vld [vmem:[#allocation25_spill] sm:$0xff] }
 0x14d   : > { %1254 = vrot.lane.b32.xlu0 %v7451_v44, %s4952_s29  ;;  %v7465_v44 = vld [vmem:[#allocation26_spill] sm:$0xff] }
 0x14e   : > { %v879_v43 = vpop.permute.xlu1 %878 }
 0x14f   : > { %966 = vst.msk [vmem:[#allocation4 + $0x48] sm:$0xff] %vm956_vm4, %v879_v43  ;;  %v885_v50 = vpop.permute.xlu0 %884 }
 0x150   : > { %1252 = vrot.lane.b32.xlu1 %v7452_v47, %s4952_s29  ;;  %969 = vst.msk [vmem:[#allocation4 + $0x60] sm:$0xff] %vm956_vm4, %v885_v50  ;;  %v7466_v47 = vld [vmem:[#allocation27_spill] sm:$0xff] }
 0x151   : > { %1258 = vrot.lane.b32.xlu0 %v7453_v56, %s4952_s29  ;;  %v7467_v56 = vld [vmem:[#allocation28_spill] sm:$0xff] }
 0x152   : > { %v883_v53 = vpop.permute.xlu1 %882 }
 0x153   : > { %968 = vst.msk [vmem:[#allocation4 + $0x58] sm:$0xff] %vm956_vm4, %v883_v53  ;;  %v889_v10 = vpop.permute.xlu0 %888 }
 0x154   : > { %1256 = vrot.lane.b32.xlu1 %v7454_v63, %s4952_s29  ;;  %971 = vst.msk [vmem:[#allocation4 + $0x70] sm:$0xff] %vm956_vm4, %v889_v10  ;;  %v7468_v63 = vld [vmem:[#allocation29_spill] sm:$0xff] }
 0x155   : > { %1262 = vrot.lane.b32.xlu0 %v7455_v14, %s4952_s29  ;;  %v7469_v14 = vld [vmem:[#allocation30_spill] sm:$0xff] }
 0x156   : > { %v887_v13 = vpop.permute.xlu1 %886 }
 0x157   : > { %970 = vst.msk [vmem:[#allocation4 + $0x68] sm:$0xff] %vm956_vm4, %v887_v13  ;;  %v893_v18 = vpop.permute.xlu0 %892 }
 0x158   : > { %1260 = vrot.lane.b32.xlu1 %v7456_v17, %s4952_s29  ;;  %973 = vst.msk [vmem:[#allocation4 + $0x80] sm:$0xff] %vm956_vm4, %v893_v18  ;;  %v7470_v17 = vld [vmem:[#allocation31_spill] sm:$0xff] }
 0x159   : > { %1266 = vrot.lane.b32.xlu0 %v7457_v48, %s4952_s29  ;;  %v7471_v48 = vld [vmem:[#allocation32_spill] sm:$0xff] }
 0x15a   : > { %v891_v21 = vpop.permute.xlu1 %890 }
 0x15b   : > { %972 = vst.msk [vmem:[#allocation4 + $0x78] sm:$0xff] %vm956_vm4, %v891_v21  ;;  %v897_v49 = vpop.permute.xlu0 %896 }
 0x15c   : > { %1264 = vrot.lane.b32.xlu1 %v7458_v22, %s4952_s29  ;;  %975 = vst.msk [vmem:[#allocation4 + $0x90] sm:$0xff] %vm956_vm4, %v897_v49  ;;  %v7472_v22 = vld [vmem:[#allocation33_spill] sm:$0xff] }
 0x15d   : > { %1270 = vrot.lane.b32.xlu0 %v7459_v29, %s4952_s29  ;;  %v7473_v29 = vld [vmem:[#allocation34_spill] sm:$0xff] }
 0x15e   : > { %v895_v45 = vpop.permute.xlu1 %894 }
 0x15f   : > { %974 = vst.msk [vmem:[#allocation4 + $0x88] sm:$0xff] %vm956_vm4, %v895_v45  ;;  %v901_v46 = vpop.permute.xlu0 %900 }
 0x160   : > { %1268 = vrot.lane.b32.xlu1 %v7460_v25, %s4952_s29  ;;  %977 = vst.msk [vmem:[#allocation4 + $0xa0] sm:$0xff] %vm956_vm4, %v901_v46 }
 0x161   : > { %1274 = vrot.lane.b32.xlu0 %v7461_v30, %s4952_s29 }
 0x162   : > { %v899_v26 = vpop.permute.xlu1 %898 }
 0x163   : > { %976 = vst.msk [vmem:[#allocation4 + $0x98] sm:$0xff] %vm956_vm4, %v899_v26  ;;  %v905_v32 = vpop.permute.xlu0 %904  ;;  %v5951_v26 = vld [vmem:[#allocation2 + $0x182] sm:$0xff] }
 0x164   : > { %1272 = vrot.lane.b32.xlu1 %v7462_v31, %s4952_s29  ;;  %979 = vst.msk [vmem:[#allocation4 + $0xb0] sm:$0xff] %vm956_vm4, %v905_v32  ;;  %v5961_v31 = vld [vmem:[#allocation2 + $0x18a] sm:$0xff] }
 0x165   : > { %1278 = vrot.lane.b32.xlu0 %v7463_v40, %s4952_s29 }
 0x166   : > { %v903_v39 = vpop.permute.xlu1 %902 }
 0x167   : > { %978 = vst.msk [vmem:[#allocation4 + $0xa8] sm:$0xff] %vm956_vm4, %v903_v39  ;;  %v909_v42 = vpop.permute.xlu0 %908 }
 0x168   : > { %1276 = vrot.lane.b32.xlu1 %v7464_v41, %s4952_s29  ;;  %981 = vst.msk [vmem:[#allocation4 + $0xc0] sm:$0xff] %vm956_vm4, %v909_v42 }
 0x169   : > { %1282 = vrot.lane.b32.xlu0 %v7465_v44, %s4952_s29 }
 0x16a   : > { %v907_v43 = vpop.permute.xlu1 %906 }
 0x16b   : > { %980 = vst.msk [vmem:[#allocation4 + $0xb8] sm:$0xff] %vm956_vm4, %v907_v43  ;;  %v913_v50 = vpop.permute.xlu0 %912  ;;  %v1990_v43 = vld [vmem:[%s7378_s1 + $0x18] sm:$0xff] }
 0x16c   : > { %1280 = vrot.lane.b32.xlu1 %v7466_v47, %s4952_s29  ;;  %983 = vst.msk [vmem:[#allocation4 + $0xd0] sm:$0xff] %vm956_vm4, %v913_v50  ;;  %v1991_v47 = vld [vmem:[%s7378_s1 + $0x20] sm:$0xff]  ;;  %v1992_v50 = vld [vmem:[%s7378_s1 + $0x28] sm:$0xff] }
 0x16d   : > { %1286 = vrot.lane.b32.xlu0 %v7467_v56, %s4952_s29  ;;  %v1993_v56 = vld [vmem:[%s7378_s1 + $0x30] sm:$0xff] }
 0x16e   : > { %v911_v53 = vpop.permute.xlu1 %910 }
 0x16f   : > { %982 = vst.msk [vmem:[#allocation4 + $0xc8] sm:$0xff] %vm956_vm4, %v911_v53  ;;  %v917_v10 = vpop.permute.xlu0 %916 }
 0x170   : > { %1284 = vrot.lane.b32.xlu1 %v7468_v63, %s4952_s29  ;;  %985 = vst.msk [vmem:[#allocation4 + $0xe0] sm:$0xff] %vm956_vm4, %v917_v10  ;;  %v1994_v63 = vld [vmem:[%s7378_s1 + $0x38] sm:$0xff] }
 0x171   : > { %1290 = vrot.lane.b32.xlu0 %v7469_v14, %s4952_s29  ;;  %v4902_v10 = vpack.c.bf16 %v1994_v63, %v1993_v56  ;;  %v1762_v14 = vld [vmem:[#allocation2 + $0x32] sm:$0xff]  ;;  %v1775_v63 = vld [vmem:[#allocation2 + $0xca] sm:$0xff] }
 0x172   : > { %v915_v13 = vpop.permute.xlu1 %914 }
 0x173   : > { %984 = vst.msk [vmem:[#allocation4 + $0xd8] sm:$0xff] %vm956_vm4, %v915_v13  ;;  %v921_v18 = vpop.permute.xlu0 %920 }
 0x174   : > { %1288 = vrot.lane.b32.xlu1 %v7470_v17, %s4952_s29  ;;  %987 = vst.msk [vmem:[#allocation4 + $0xf0] sm:$0xff] %vm956_vm4, %v921_v18  ;;  %v1995_v17 = vld [vmem:[%s7378_s1 + $0x40] sm:$0xff]  ;;  %v1570_v18 = vld [vmem:[#allocation2 + $0x39] sm:$0xff] }
 0x175   : > { %1294 = vrot.lane.b32.xlu0 %v7471_v48, %s4952_s29  ;;  %v1571_v48 = vld [vmem:[#allocation2 + $0x49] sm:$0xff] }
 0x176   : > { %v919_v21 = vpop.permute.xlu1 %918 }
 0x177   : > { %986 = vst.msk [vmem:[#allocation4 + $0xe8] sm:$0xff] %vm956_vm4, %v919_v21  ;;  %v1054_v49 = vpop.permute.xlu0 %1053 }
 0x178   : > { %1292 = vrot.lane.b32.xlu1 %v7472_v22, %s4952_s29  ;;  %1150 = vst.msk [vmem:[#allocation4] sm:$0xff] %vm1149_vm5, %v1054_v49  ;;  %v1763_v49 = vld [vmem:[#allocation2 + $0x3a] sm:$0xff] }
 0x179   : > { %1298 = vrot.lane.b32.xlu0 %v5639_v35, %s4952_s29 }
 0x17a   : > { %v923_v45 = vpop.permute.xlu1 %922 }
 0x17b   : > { %988 = vst.msk [vmem:[#allocation4 + $0xf8] sm:$0xff] %vm956_vm4, %v923_v45  ;;  %v1058_v25 = vpop.permute.xlu0 %1057  ;;  %v1764_v45 = vld [vmem:[#allocation2 + $0x4a] sm:$0xff] }
 0x17c   : > { %1296 = vrot.lane.b32.xlu1 %v7473_v29, %s4952_s29  ;;  %1152 = vst.msk [vmem:[#allocation4 + $0x10] sm:$0xff] %vm1149_vm5, %v1058_v25  ;;  %v1572_v25 = vld [vmem:[#allocation2 + $0x51] sm:$0xff] }
 0x17d   : > { %1302 = vrot.lane.b32.xlu0 %v5649_v34, %s4952_s29 }
 0x17e   : > { %v1056_v46 = vpop.permute.xlu1 %1055 }
 0x17f   : > { %1151 = vst.msk [vmem:[#allocation4 + $0x8] sm:$0xff] %vm1149_vm5, %v1056_v46  ;;  %v1062_v35 = vpop.permute.xlu0 %1061 }
 0x180   : > { %1300 = vrot.lane.b32.xlu1 %v5653_v38, %s4952_s29  ;;  %1154 = vst.msk [vmem:[#allocation4 + $0x20] sm:$0xff] %vm1149_vm5, %v1062_v35  ;;  %v1573_v35 = vld [vmem:[#allocation2 + $0x61] sm:$0xff] }
 0x181   : > { %1306 = vrot.lane.b32.xlu0 %v5951_v26, %s4952_s29 }
 0x182   : > { %v1060_v30 = vpop.permute.xlu1 %1059 }
 0x183   : > { %1153 = vst.msk [vmem:[#allocation4 + $0x18] sm:$0xff] %vm1149_vm5, %v1060_v30  ;;  %v1066_v34 = vpop.permute.xlu0 %1065 }
 0x184   : > { %1304 = vrot.lane.b32.xlu1 %v5661_v37, %s4952_s29  ;;  %1156 = vst.msk [vmem:[#allocation4 + $0x30] sm:$0xff] %vm1149_vm5, %v1066_v34  ;;  %v1765_v34 = vld [vmem:[#allocation2 + $0x52] sm:$0xff] }
 0x185   : > { %1440 = vrot.lane.b32.xlu0 %v5354_v51, %s4953_s30 }
 0x186   : > { %v1064_v32 = vpop.permute.xlu1 %1063 }
 0x187   : > { %1155 = vst.msk [vmem:[#allocation4 + $0x28] sm:$0xff] %vm1149_vm5, %v1064_v32  ;;  %v1070_v38 = vpop.permute.xlu0 %1069 }
 0x188   : > { %1308 = vrot.lane.b32.xlu1 %v5961_v31, %s4952_s29  ;;  %1158 = vst.msk [vmem:[#allocation4 + $0x40] sm:$0xff] %vm1149_vm5, %v1070_v38  ;;  %v1766_v38 = vld [vmem:[#allocation2 + $0x62] sm:$0xff] }
 0x189   : > { %1444 = vrot.lane.b32.xlu0 %v5366_v54, %s4953_s30 }
 0x18a   : > { %v1068_v39 = vpop.permute.xlu1 %1067 }
 0x18b   : > { %1157 = vst.msk [vmem:[#allocation4 + $0x38] sm:$0xff] %vm1149_vm5, %v1068_v39  ;;  %v1074_v37 = vpop.permute.xlu0 %1073 }
 0x18c   : > { %1442 = vrot.lane.b32.xlu1 %v5356_v52, %s4953_s30  ;;  %1160 = vst.msk [vmem:[#allocation4 + $0x50] sm:$0xff] %vm1149_vm5, %v1074_v37  ;;  %v1574_v37 = vld [vmem:[#allocation2 + $0x69] sm:$0xff] }
 0x18d   : > { %1448 = vrot.lane.b32.xlu0 %v5376_v57, %s4953_s30 }
 0x18e   : > { %v1072_v51 = vpop.permute.xlu1 %1071 }
 0x18f   : > { %1159 = vst.msk [vmem:[#allocation4 + $0x48] sm:$0xff] %vm1149_vm5, %v1072_v51  ;;  %v1078_v40 = vpop.permute.xlu0 %1077 }
 0x190   : > { %1446 = vrot.lane.b32.xlu1 %v5368_v55, %s4953_s30  ;;  %1162 = vst.msk [vmem:[#allocation4 + $0x60] sm:$0xff] %vm1149_vm5, %v1078_v40  ;;  %v1575_v40 = vld [vmem:[#allocation2 + $0x79] sm:$0xff] }
 0x191   : > { %1452 = vrot.lane.b32.xlu0 %v5380_v59, %s4953_s30 }
 0x192   : > { %v1076_v54 = vpop.permute.xlu1 %1075 }
 0x193   : > { %1161 = vst.msk [vmem:[#allocation4 + $0x58] sm:$0xff] %vm1149_vm5, %v1076_v54  ;;  %v1082_v52 = vpop.permute.xlu0 %1081 }
 0x194   : > { %1450 = vrot.lane.b32.xlu1 %v5378_v58, %s4953_s30  ;;  %1164 = vst.msk [vmem:[#allocation4 + $0x70] sm:$0xff] %vm1149_vm5, %v1082_v52  ;;  %v1767_v52 = vld [vmem:[#allocation2 + $0x6a] sm:$0xff] }
 0x195   : > { %1456 = vrot.lane.b32.xlu0 %v5392_v61, %s4953_s30 }
 0x196   : > { %v1080_v57 = vpop.permute.xlu1 %1079 }
 0x197   : > { %1163 = vst.msk [vmem:[#allocation4 + $0x68] sm:$0xff] %vm1149_vm5, %v1080_v57  ;;  %v1086_v55 = vpop.permute.xlu0 %1085 }
 0x198   : > { %1454 = vrot.lane.b32.xlu1 %v5390_v60, %s4953_s30  ;;  %1166 = vst.msk [vmem:[#allocation4 + $0x80] sm:$0xff] %vm1149_vm5, %v1086_v55  ;;  %v1768_v55 = vld [vmem:[#allocation2 + $0x7a] sm:$0xff] }
 0x199   : > { %1460 = vrot.lane.b32.xlu0 %v5404_v0, %s4953_s30 }
 0x19a   : > { %v1084_v59 = vpop.permute.xlu1 %1083 }
 0x19b   : > { %1165 = vst.msk [vmem:[#allocation4 + $0x78] sm:$0xff] %vm1149_vm5, %v1084_v59  ;;  %v1090_v58 = vpop.permute.xlu0 %1089 }
 0x19c   : > { %1458 = vrot.lane.b32.xlu1 %v5394_v62, %s4953_s30  ;;  %1168 = vst.msk [vmem:[#allocation4 + $0x90] sm:$0xff] %vm1149_vm5, %v1090_v58  ;;  %v1576_v58 = vld [vmem:[#allocation2 + $0x81] sm:$0xff] }
 0x19d   : > { %1464 = vrot.lane.b32.xlu0 %v5408_v2, %s4953_s30 }
 0x19e   : > { %v1088_v61 = vpop.permute.xlu1 %1087 }
 0x19f   : > { %1167 = vst.msk [vmem:[#allocation4 + $0x88] sm:$0xff] %vm1149_vm5, %v1088_v61  ;;  %v1094_v60 = vpop.permute.xlu0 %1093 }
 0x1a0   : > { %1462 = vrot.lane.b32.xlu1 %v5406_v1, %s4953_s30  ;;  %1170 = vst.msk [vmem:[#allocation4 + $0xa0] sm:$0xff] %vm1149_vm5, %v1094_v60  ;;  %v1577_v60 = vld [vmem:[#allocation2 + $0x91] sm:$0xff] }
 0x1a1   : > { %1468 = vrot.lane.b32.xlu0 %v5420_v4, %s4953_s30 }
 0x1a2   : > { %v1092_v0 = vpop.permute.xlu1 %1091 }
 0x1a3   : > { %1169 = vst.msk [vmem:[#allocation4 + $0x98] sm:$0xff] %vm1149_vm5, %v1092_v0  ;;  %v1098_v62 = vpop.permute.xlu0 %1097 }
 0x1a4   : > { %1466 = vrot.lane.b32.xlu1 %v5418_v3, %s4953_s30  ;;  %1172 = vst.msk [vmem:[#allocation4 + $0xb0] sm:$0xff] %vm1149_vm5, %v1098_v62  ;;  %v1769_v62 = vld [vmem:[#allocation2 + $0x82] sm:$0xff] }
 0x1a5   : > { %1472 = vrot.lane.b32.xlu0 %v5430_v6, %s4953_s30 }
 0x1a6   : > { %v1096_v2 = vpop.permute.xlu1 %1095 }
 0x1a7   : > { %1171 = vst.msk [vmem:[#allocation4 + $0xa8] sm:$0xff] %vm1149_vm5, %v1096_v2  ;;  %v1102_v1 = vpop.permute.xlu0 %1101 }
 0x1a8   : > { %1470 = vrot.lane.b32.xlu1 %v5422_v5, %s4953_s30  ;;  %1174 = vst.msk [vmem:[#allocation4 + $0xc0] sm:$0xff] %vm1149_vm5, %v1102_v1  ;;  %v1770_v1 = vld [vmem:[#allocation2 + $0x92] sm:$0xff] }
 0x1a9   : > { %1476 = vrot.lane.b32.xlu0 %v5434_v8, %s4953_s30 }
 0x1aa   : > { %v1100_v4 = vpop.permute.xlu1 %1099 }
 0x1ab   : > { %1173 = vst.msk [vmem:[#allocation4 + $0xb8] sm:$0xff] %vm1149_vm5, %v1100_v4  ;;  %v1106_v3 = vpop.permute.xlu0 %1105 }
 0x1ac   : > { %1474 = vrot.lane.b32.xlu1 %v5432_v7, %s4953_s30  ;;  %1176 = vst.msk [vmem:[#allocation4 + $0xd0] sm:$0xff] %vm1149_vm5, %v1106_v3  ;;  %v1987_v7 = vld [vmem:[%s7378_s1] sm:$0xff]  ;;  %v1578_v3 = vld [vmem:[#allocation2 + $0x99] sm:$0xff] }
 0x1ad   : > { %1480 = vrot.lane.b32.xlu0 %v5452_v11, %s4953_s30  ;;  %v1988_v11 = vld [vmem:[%s7378_s1 + $0x8] sm:$0xff] }
 0x1ae   : > { %v1104_v6 = vpop.permute.xlu1 %1103  ;;  %v4890_v41 = vpack.c.bf16 %v1988_v11, %v1987_v7  ;;  %v1771_v7 = vld [vmem:[#allocation2 + $0x9a] sm:$0xff] }
 0x1af   : > { %1175 = vst.msk [vmem:[#allocation4 + $0xc8] sm:$0xff] %vm1149_vm5, %v1104_v6  ;;  %v1110_v5 = vpop.permute.xlu0 %1109 }
 0x1b0   : > { %1478 = vrot.lane.b32.xlu1 %v5444_v9, %s4953_s30  ;;  %1178 = vst.msk [vmem:[#allocation4 + $0xe0] sm:$0xff] %vm1149_vm5, %v1110_v5  ;;  %4891 = vmatprep.subr.bf16.mxu0 %v4890_v41  ;;  %v1579_v5 = vld [vmem:[#allocation2 + $0xa9] sm:$0xff] }
 0x1b1   : > { %1484 = vrot.lane.b32.xlu0 %v5468_v15, %s4953_s30  ;;  %4893 = vmatpush3.bf16.msra.mxu0 %v4890_v41  ;;  %v1989_v15 = vld [vmem:[%s7378_s1 + $0x10] sm:$0xff]  ;;  %v1772_v41 = vld [vmem:[#allocation2 + $0xaa] sm:$0xff] }
 0x1b2   : > { %v1108_v8 = vpop.permute.xlu1 %1107 }
 0x1b3   : > { %1177 = vst.msk [vmem:[#allocation4 + $0xd8] sm:$0xff] %vm1149_vm5, %v1108_v8  ;;  %v1114_v9 = vpop.permute.xlu0 %1113 }
 0x1b4   : > { %1482 = vrot.lane.b32.xlu1 %v5454_v12, %s4953_s30  ;;  %1180 = vst.msk [vmem:[#allocation4 + $0xf0] sm:$0xff] %vm1149_vm5, %v1114_v9  ;;  %v4894_v12 = vpack.c.bf16 %v1990_v43, %v1989_v15  ;;  %v1581_v43 = vld [vmem:[#allocation2 + $0xc1] sm:$0xff] }
 0x1b5   : > { %1488 = vrot.lane.b32.xlu0 %v5484_v19, %s4953_s30 }
 0x1b6   : > { %v1112_v42 = vpop.permute.xlu1 %1111  ;;  %4895 = vmatprep.subr.bf16.mxu0 %v4894_v12 }
 0x1b7   : > { %1179 = vst.msk [vmem:[#allocation4 + $0xe8] sm:$0xff] %vm1149_vm5, %v1112_v42  ;;  %v1247_v44 = vpop.permute.xlu0 %1246  ;;  %4897 = vmatpush3.bf16.msra.mxu0 %v4894_v12  ;;  %v1580_v42 = vld [vmem:[#allocation2 + $0xb1] sm:$0xff] }
 0x1b8   : > { %1486 = vrot.lane.b32.xlu1 %v5470_v16, %s4953_s30  ;;  %1343 = vst.msk [vmem:[#allocation4] sm:$0xff] %vm1342_vm6, %v1247_v44  ;;  %v4898_v16 = vpack.c.bf16 %v1992_v50, %v1991_v47  ;;  %v1773_v44 = vld [vmem:[#allocation2 + $0xb2] sm:$0xff]  ;;  %v1774_v47 = vld [vmem:[#allocation2 + $0xc2] sm:$0xff] }
 0x1b9   : > { %1492 = vrot.lane.b32.xlu0 %v5500_v23, %s4953_s30 }
 0x1ba   : > { %v1116_v19 = vpop.permute.xlu1 %1115  ;;  %4899 = vmatprep.subr.bf16.mxu0 %v4898_v16 }
 0x1bb   : > { %1181 = vst.msk [vmem:[#allocation4 + $0xf8] sm:$0xff] %vm1149_vm5, %v1116_v19  ;;  %v1251_v53 = vpop.permute.xlu0 %1250  ;;  %4901 = vmatpush3.bf16.msra.mxu0 %v4898_v16  ;;  %v1582_v16 = vld [vmem:[#allocation2 + $0xc9] sm:$0xff] }
 0x1bc   : > { %1490 = vrot.lane.b32.xlu1 %v5486_v20, %s4953_s30  ;;  %1345 = vst.msk [vmem:[#allocation4 + $0x10] sm:$0xff] %vm1342_vm6, %v1251_v53  ;;  %v1569_v20 = vld [vmem:[#allocation2 + $0x31] sm:$0xff]  ;;  %4903 = vmatprep.subr.bf16.mxu0 %v4902_v10 }
 0x1bd   : > { %1496 = vrot.lane.b32.xlu0 %v5751_v36, %s4953_s30 }
 0x1be   : > { %v1249_v23 = vpop.permute.xlu1 %1248 }
 0x1bf   : > { %1344 = vst.msk [vmem:[#allocation4 + $0x8] sm:$0xff] %vm1342_vm6, %v1249_v23  ;;  %v1255_v13 = vpop.permute.xlu0 %1254  ;;  %4905 = vmatpush3.bf16.msra.mxu0 %v4902_v10  ;;  %v1583_v23 = vld [vmem:[#allocation2 + $0xd9] sm:$0xff] }
 0x1c0   : > { %1494 = vrot.lane.b32.xlu1 %v5502_v24, %s4953_s30  ;;  %1347 = vst.msk [vmem:[#allocation4 + $0x20] sm:$0xff] %vm1342_vm6, %v1255_v13  ;;  %4774 = vmatprep.subr.mxu0 %v1995_v17  ;;  %v1776_v10 = vld [vmem:[#allocation2 + $0xda] sm:$0xff] }
 0x1c1   : > { %1633 = vrot.lane.b32.xlu0 %v1569_v20, %s4954_s7 }
 0x1c2   : > { %v1253_v36 = vpop.permute.xlu1 %1252 }
 0x1c3   : > { %1346 = vst.msk [vmem:[#allocation4 + $0x18] sm:$0xff] %vm1342_vm6, %v1253_v36  ;;  %v1259_v24 = vpop.permute.xlu0 %1258  ;;  %4775 = vmatpush3.msra.mxu0 %v1995_v17  ;;  %v1584_v36 = vld [vmem:[#allocation2 + $0xe1] sm:$0xff]  ;;  %v1585_v17 = vld [vmem:[#allocation2 + $0xf1] sm:$0xff] }
 0x1c4   : > { %1498 = vrot.lane.b32.xlu1 %v5761_v33, %s4953_s30  ;;  %1349 = vst.msk [vmem:[#allocation4 + $0x30] sm:$0xff] %vm1342_vm6, %v1259_v24 }
 0x1c5   : > { %1826 = vrot.lane.b32.xlu0 %v1762_v14, %s4955_s10 }
 0x1c6   : > { %v1257_v21 = vpop.permute.xlu1 %1256 }
 0x1c7   : > { %1348 = vst.msk [vmem:[#allocation4 + $0x28] sm:$0xff] %vm1342_vm6, %v1257_v21  ;;  %v1263_v22 = vpop.permute.xlu0 %1262 }
 0x1c8   : > { %1635 = vrot.lane.b32.xlu1 %v1570_v18, %s4954_s7  ;;  %1351 = vst.msk [vmem:[#allocation4 + $0x40] sm:$0xff] %vm1342_vm6, %v1263_v22  ;;  %v1777_v18 = vld [vmem:[#allocation2 + $0xe2] sm:$0xff] }
 0x1c9   : > { %1637 = vrot.lane.b32.xlu0 %v1571_v48, %s4954_s7  ;;  %v1778_v48 = vld [vmem:[#allocation2 + $0xf2] sm:$0xff] }
 0x1ca   : > { %v1261_v33 = vpop.permute.xlu1 %1260 }
 0x1cb   : > { %1350 = vst.msk [vmem:[#allocation4 + $0x38] sm:$0xff] %vm1342_vm6, %v1261_v33  ;;  %v1267_v29 = vpop.permute.xlu0 %1266 }
 0x1cc   : > { %1828 = vrot.lane.b32.xlu1 %v1763_v49, %s4955_s10  ;;  %1353 = vst.msk [vmem:[#allocation4 + $0x50] sm:$0xff] %vm1342_vm6, %v1267_v29  ;;  %v1586_v49 = vld [vmem:[#allocation2 + $0xf9] sm:$0xff] }
 0x1cd   : > { %1830 = vrot.lane.b32.xlu0 %v1764_v45, %s4955_s10  ;;  %v1587_v45 = vld [vmem:[#allocation2 + $0x109] sm:$0xff] }
 0x1ce   : > { %v1265_v46 = vpop.permute.xlu1 %1264 }
 0x1cf   : > { %1352 = vst.msk [vmem:[#allocation4 + $0x48] sm:$0xff] %vm1342_vm6, %v1265_v46  ;;  %v1271_v30 = vpop.permute.xlu0 %1270 }
 0x1d0   : > { %1639 = vrot.lane.b32.xlu1 %v1572_v25, %s4954_s7  ;;  %1355 = vst.msk [vmem:[#allocation4 + $0x60] sm:$0xff] %vm1342_vm6, %v1271_v30  ;;  %v1779_v25 = vld [vmem:[#allocation2 + $0xfa] sm:$0xff] }
 0x1d1   : > { %1641 = vrot.lane.b32.xlu0 %v1573_v35, %s4954_s7  ;;  %v1780_v35 = vld [vmem:[#allocation2 + $0x10a] sm:$0xff] }
 0x1d2   : > { %v1269_v32 = vpop.permute.xlu1 %1268 }
 0x1d3   : > { %1354 = vst.msk [vmem:[#allocation4 + $0x58] sm:$0xff] %vm1342_vm6, %v1269_v32  ;;  %v1275_v39 = vpop.permute.xlu0 %1274 }
 0x1d4   : > { %1832 = vrot.lane.b32.xlu1 %v1765_v34, %s4955_s10  ;;  %1357 = vst.msk [vmem:[#allocation4 + $0x70] sm:$0xff] %vm1342_vm6, %v1275_v39  ;;  %v1588_v34 = vld [vmem:[#allocation2 + $0x111] sm:$0xff] }
 0x1d5   : > { %1834 = vrot.lane.b32.xlu0 %v1766_v38, %s4955_s10  ;;  %v1589_v38 = vld [vmem:[#allocation2 + $0x121] sm:$0xff] }
 0x1d6   : > { %v1273_v51 = vpop.permute.xlu1 %1272 }
 0x1d7   : > { %1356 = vst.msk [vmem:[#allocation4 + $0x68] sm:$0xff] %vm1342_vm6, %v1273_v51  ;;  %v1279_v54 = vpop.permute.xlu0 %1278 }
 0x1d8   : > { %1643 = vrot.lane.b32.xlu1 %v1574_v37, %s4954_s7  ;;  %1359 = vst.msk [vmem:[#allocation4 + $0x80] sm:$0xff] %vm1342_vm6, %v1279_v54  ;;  %v1781_v37 = vld [vmem:[#allocation2 + $0x112] sm:$0xff] }
 0x1d9   : > { %1645 = vrot.lane.b32.xlu0 %v1575_v40, %s4954_s7  ;;  %v1782_v40 = vld [vmem:[#allocation2 + $0x122] sm:$0xff] }
 0x1da   : > { %v1277_v57 = vpop.permute.xlu1 %1276 }
 0x1db   : > { %1358 = vst.msk [vmem:[#allocation4 + $0x78] sm:$0xff] %vm1342_vm6, %v1277_v57  ;;  %v1283_v59 = vpop.permute.xlu0 %1282 }
 0x1dc   : > { %1836 = vrot.lane.b32.xlu1 %v1767_v52, %s4955_s10  ;;  %1361 = vst.msk [vmem:[#allocation4 + $0x90] sm:$0xff] %vm1342_vm6, %v1283_v59  ;;  %v1590_v52 = vld [vmem:[#allocation2 + $0x129] sm:$0xff] }
 0x1dd   : > { %1838 = vrot.lane.b32.xlu0 %v1768_v55, %s4955_s10  ;;  %v1591_v55 = vld [vmem:[#allocation2 + $0x139] sm:$0xff] }
 0x1de   : > { %v1281_v61 = vpop.permute.xlu1 %1280 }
 0x1df   : > { %1360 = vst.msk [vmem:[#allocation4 + $0x88] sm:$0xff] %vm1342_vm6, %v1281_v61  ;;  %v1287_v0 = vpop.permute.xlu0 %1286 }
 0x1e0   : > { %1647 = vrot.lane.b32.xlu1 %v1576_v58, %s4954_s7  ;;  %1363 = vst.msk [vmem:[#allocation4 + $0xa0] sm:$0xff] %vm1342_vm6, %v1287_v0  ;;  %v1783_v58 = vld [vmem:[#allocation2 + $0x12a] sm:$0xff] }
 0x1e1   : > { %1649 = vrot.lane.b32.xlu0 %v1577_v60, %s4954_s7  ;;  %v1784_v60 = vld [vmem:[#allocation2 + $0x13a] sm:$0xff] }
 0x1e2   : > { %v1285_v2 = vpop.permute.xlu1 %1284 }
 0x1e3   : > { %1362 = vst.msk [vmem:[#allocation4 + $0x98] sm:$0xff] %vm1342_vm6, %v1285_v2  ;;  %v1291_v4 = vpop.permute.xlu0 %1290 }
 0x1e4   : > { %1840 = vrot.lane.b32.xlu1 %v1769_v62, %s4955_s10  ;;  %1365 = vst.msk [vmem:[#allocation4 + $0xb0] sm:$0xff] %vm1342_vm6, %v1291_v4  ;;  %v1592_v62 = vld [vmem:[#allocation2 + $0x141] sm:$0xff] }
 0x1e5   : > { %1842 = vrot.lane.b32.xlu0 %v1770_v1, %s4955_s10  ;;  %v1593_v1 = vld [vmem:[#allocation2 + $0x151] sm:$0xff] }
 0x1e6   : > { %v1289_v6 = vpop.permute.xlu1 %1288 }
 0x1e7   : > { %1364 = vst.msk [vmem:[#allocation4 + $0xa8] sm:$0xff] %vm1342_vm6, %v1289_v6  ;;  %v1295_v8 = vpop.permute.xlu0 %1294 }
 0x1e8   : > { %1651 = vrot.lane.b32.xlu1 %v1578_v3, %s4954_s7  ;;  %1367 = vst.msk [vmem:[#allocation4 + $0xc0] sm:$0xff] %vm1342_vm6, %v1295_v8  ;;  %v1785_v3 = vld [vmem:[#allocation2 + $0x142] sm:$0xff] }
 0x1e9   : > { %1653 = vrot.lane.b32.xlu0 %v1579_v5, %s4954_s7  ;;  %v1786_v5 = vld [vmem:[#allocation2 + $0x152] sm:$0xff] }
 0x1ea   : > { %v1293_v11 = vpop.permute.xlu1 %1292 }
 0x1eb   : > { %1366 = vst.msk [vmem:[#allocation4 + $0xb8] sm:$0xff] %vm1342_vm6, %v1293_v11  ;;  %v1299_v9 = vpop.permute.xlu0 %1298 }
 0x1ec   : > { %1844 = vrot.lane.b32.xlu1 %v1771_v7, %s4955_s10  ;;  %1369 = vst.msk [vmem:[#allocation4 + $0xd0] sm:$0xff] %vm1342_vm6, %v1299_v9  ;;  %v1594_v7 = vld [vmem:[#allocation2 + $0x159] sm:$0xff] }
 0x1ed   : > { %1846 = vrot.lane.b32.xlu0 %v1772_v41, %s4955_s10  ;;  %v1595_v41 = vld [vmem:[#allocation2 + $0x169] sm:$0xff] }
 0x1ee   : > { %v1297_v15 = vpop.permute.xlu1 %1296 }
 0x1ef   : > { %1368 = vst.msk [vmem:[#allocation4 + $0xc8] sm:$0xff] %vm1342_vm6, %v1297_v15  ;;  %v1303_v12 = vpop.permute.xlu0 %1302 }
 0x1f0   : > { %1655 = vrot.lane.b32.xlu1 %v1580_v42, %s4954_s7  ;;  %1371 = vst.msk [vmem:[#allocation4 + $0xe0] sm:$0xff] %vm1342_vm6, %v1303_v12  ;;  %v1787_v42 = vld [vmem:[#allocation2 + $0x15a] sm:$0xff] }
 0x1f1   : > { %1657 = vrot.lane.b32.xlu0 %v1581_v43, %s4954_s7  ;;  %v1788_v43 = vld [vmem:[#allocation2 + $0x16a] sm:$0xff] }
 0x1f2   : > { %v1301_v19 = vpop.permute.xlu1 %1300 }
 0x1f3   : > { %1370 = vst.msk [vmem:[#allocation4 + $0xd8] sm:$0xff] %vm1342_vm6, %v1301_v19  ;;  %v1307_v50 = vpop.permute.xlu0 %1306 }
 0x1f4   : > { %1848 = vrot.lane.b32.xlu1 %v1773_v44, %s4955_s10  ;;  %1373 = vst.msk [vmem:[#allocation4 + $0xf0] sm:$0xff] %vm1342_vm6, %v1307_v50  ;;  %v1596_v44 = vld [vmem:[#allocation2 + $0x171] sm:$0xff] }
 0x1f5   : > { %1850 = vrot.lane.b32.xlu0 %v1774_v47, %s4955_s10  ;;  %v1789_v50 = vld [vmem:[#allocation2 + $0x172] sm:$0xff] }
 0x1f6   : > { %v1305_v53 = vpop.permute.xlu1 %1304 }
 0x1f7   : > { %1372 = vst.msk [vmem:[#allocation4 + $0xe8] sm:$0xff] %vm1342_vm6, %v1305_v53  ;;  %v1441_v56 = vpop.permute.xlu0 %1440 }
 0x1f8   : > { %1659 = vrot.lane.b32.xlu1 %v1582_v16, %s4954_s7  ;;  %1537 = vst.msk [vmem:[#allocation4] sm:$0xff] %vm1536_vm7, %v1441_v56  ;;  %v1406_v56 = vld [vmem:[#allocation2 + $0x198] sm:$0xff] }
 0x1f9   : > { %1661 = vrot.lane.b32.xlu0 %v1583_v23, %s4954_s7 }
 0x1fa   : > { %v1309_v20 = vpop.permute.xlu1 %1308 }
 0x1fb   : > { %1374 = vst.msk [vmem:[#allocation4 + $0xf8] sm:$0xff] %vm1342_vm6, %v1309_v20  ;;  %v1445_v13 = vpop.permute.xlu0 %1444  ;;  %v1599_v20 = vld [vmem:[#allocation2 + $0x199] sm:$0xff] }
 0x1fc   : > { %1852 = vrot.lane.b32.xlu1 %v1775_v63, %s4955_s10  ;;  %1539 = vst.msk [vmem:[#allocation4 + $0x10] sm:$0xff] %vm1536_vm7, %v1445_v13 }
 0x1fd   : > { %1854 = vrot.lane.b32.xlu0 %v1776_v10, %s4955_s10  ;;  %v1407_v10 = vld [vmem:[#allocation2 + $0x1a0] sm:$0xff] }
 0x1fe   : > { %v1443_v14 = vpop.permute.xlu1 %1442 }
 0x1ff   : > { %1538 = vst.msk [vmem:[#allocation4 + $0x8] sm:$0xff] %vm1536_vm7, %v1443_v14  ;;  %v1449_v24 = vpop.permute.xlu0 %1448  ;;  %v1600_v14 = vld [vmem:[#allocation2 + $0x1a1] sm:$0xff] }
 0x200   : > { %1663 = vrot.lane.b32.xlu1 %v1584_v36, %s4954_s7  ;;  %1541 = vst.msk [vmem:[#allocation4 + $0x20] sm:$0xff] %vm1536_vm7, %v1449_v24 }
 0x201   : > { %1665 = vrot.lane.b32.xlu0 %v1585_v17, %s4954_s7 }
 0x202   : > { %v1447_v21 = vpop.permute.xlu1 %1446 }
 0x203   : > { %1540 = vst.msk [vmem:[#allocation4 + $0x18] sm:$0xff] %vm1536_vm7, %v1447_v21  ;;  %v1453_v22 = vpop.permute.xlu0 %1452 }
 0x204   : > { %1856 = vrot.lane.b32.xlu1 %v1777_v18, %s4955_s10  ;;  %1543 = vst.msk [vmem:[#allocation4 + $0x30] sm:$0xff] %vm1536_vm7, %v1453_v22 }
 0x205   : > { %1858 = vrot.lane.b32.xlu0 %v1778_v48, %s4955_s10 }
 0x206   : > { %v1451_v33 = vpop.permute.xlu1 %1450 }
 0x207   : > { %1542 = vst.msk [vmem:[#allocation4 + $0x28] sm:$0xff] %vm1536_vm7, %v1451_v33  ;;  %v1457_v29 = vpop.permute.xlu0 %1456 }
 0x208   : > { %1667 = vrot.lane.b32.xlu1 %v1586_v49, %s4954_s7  ;;  %1545 = vst.msk [vmem:[#allocation4 + $0x40] sm:$0xff] %vm1536_vm7, %v1457_v29 }
 0x209   : > { %1669 = vrot.lane.b32.xlu0 %v1587_v45, %s4954_s7 }
 0x20a   : > { %v1455_v46 = vpop.permute.xlu1 %1454 }
 0x20b   : > { %1544 = vst.msk [vmem:[#allocation4 + $0x38] sm:$0xff] %vm1536_vm7, %v1455_v46  ;;  %v1461_v30 = vpop.permute.xlu0 %1460 }
 0x20c   : > { %1860 = vrot.lane.b32.xlu1 %v1779_v25, %s4955_s10  ;;  %1547 = vst.msk [vmem:[#allocation4 + $0x50] sm:$0xff] %vm1536_vm7, %v1461_v30 }
 0x20d   : > { %1862 = vrot.lane.b32.xlu0 %v1780_v35, %s4955_s10 }
 0x20e   : > { %v1459_v32 = vpop.permute.xlu1 %1458 }
 0x20f   : > { %1546 = vst.msk [vmem:[#allocation4 + $0x48] sm:$0xff] %vm1536_vm7, %v1459_v32  ;;  %v1465_v39 = vpop.permute.xlu0 %1464 }
 0x210   : > { %1671 = vrot.lane.b32.xlu1 %v1588_v34, %s4954_s7  ;;  %1549 = vst.msk [vmem:[#allocation4 + $0x60] sm:$0xff] %vm1536_vm7, %v1465_v39 }
 0x211   : > { %1673 = vrot.lane.b32.xlu0 %v1589_v38, %s4954_s7 }
 0x212   : > { %v1463_v51 = vpop.permute.xlu1 %1462 }
 0x213   : > { %1548 = vst.msk [vmem:[#allocation4 + $0x58] sm:$0xff] %vm1536_vm7, %v1463_v51  ;;  %v1469_v54 = vpop.permute.xlu0 %1468 }
 0x214   : > { %1864 = vrot.lane.b32.xlu1 %v1781_v37, %s4955_s10  ;;  %1551 = vst.msk [vmem:[#allocation4 + $0x70] sm:$0xff] %vm1536_vm7, %v1469_v54 }
 0x215   : > { %1866 = vrot.lane.b32.xlu0 %v1782_v40, %s4955_s10 }
 0x216   : > { %v1467_v57 = vpop.permute.xlu1 %1466 }
 0x217   : > { %1550 = vst.msk [vmem:[#allocation4 + $0x68] sm:$0xff] %vm1536_vm7, %v1467_v57  ;;  %v1473_v59 = vpop.permute.xlu0 %1472 }
 0x218   : > { %1675 = vrot.lane.b32.xlu1 %v1590_v52, %s4954_s7  ;;  %1553 = vst.msk [vmem:[#allocation4 + $0x80] sm:$0xff] %vm1536_vm7, %v1473_v59 }
 0x219   : > { %1677 = vrot.lane.b32.xlu0 %v1591_v55, %s4954_s7 }
 0x21a   : > { %v1471_v61 = vpop.permute.xlu1 %1470 }
 0x21b   : > { %1552 = vst.msk [vmem:[#allocation4 + $0x78] sm:$0xff] %vm1536_vm7, %v1471_v61  ;;  %v1477_v0 = vpop.permute.xlu0 %1476 }
 0x21c   : > { %1868 = vrot.lane.b32.xlu1 %v1783_v58, %s4955_s10  ;;  %1555 = vst.msk [vmem:[#allocation4 + $0x90] sm:$0xff] %vm1536_vm7, %v1477_v0 }
 0x21d   : > { %1870 = vrot.lane.b32.xlu0 %v1784_v60, %s4955_s10 }
 0x21e   : > { %v1475_v2 = vpop.permute.xlu1 %1474 }
 0x21f   : > { %1554 = vst.msk [vmem:[#allocation4 + $0x88] sm:$0xff] %vm1536_vm7, %v1475_v2  ;;  %v1481_v4 = vpop.permute.xlu0 %1480 }
 0x220   : > { %1679 = vrot.lane.b32.xlu1 %v1592_v62, %s4954_s7  ;;  %1557 = vst.msk [vmem:[#allocation4 + $0xa0] sm:$0xff] %vm1536_vm7, %v1481_v4 }
 0x221   : > { %1681 = vrot.lane.b32.xlu0 %v1593_v1, %s4954_s7 }
 0x222   : > { %v1479_v6 = vpop.permute.xlu1 %1478 }
 0x223   : > { %1556 = vst.msk [vmem:[#allocation4 + $0x98] sm:$0xff] %vm1536_vm7, %v1479_v6  ;;  %v1485_v8 = vpop.permute.xlu0 %1484 }
 0x224   : > { %1872 = vrot.lane.b32.xlu1 %v1785_v3, %s4955_s10  ;;  %1559 = vst.msk [vmem:[#allocation4 + $0xb0] sm:$0xff] %vm1536_vm7, %v1485_v8 }
 0x225   : > { %1874 = vrot.lane.b32.xlu0 %v1786_v5, %s4955_s10 }
 0x226   : > { %v1483_v11 = vpop.permute.xlu1 %1482 }
 0x227   : > { %1558 = vst.msk [vmem:[#allocation4 + $0xa8] sm:$0xff] %vm1536_vm7, %v1483_v11  ;;  %v1489_v9 = vpop.permute.xlu0 %1488 }
 0x228   : > { %1683 = vrot.lane.b32.xlu1 %v1594_v7, %s4954_s7  ;;  %1561 = vst.msk [vmem:[#allocation4 + $0xc0] sm:$0xff] %vm1536_vm7, %v1489_v9 }
 0x229   : > { %1685 = vrot.lane.b32.xlu0 %v1595_v41, %s4954_s7 }
 0x22a   : > { %v1487_v15 = vpop.permute.xlu1 %1486 }
 0x22b   : > { %1560 = vst.msk [vmem:[#allocation4 + $0xb8] sm:$0xff] %vm1536_vm7, %v1487_v15  ;;  %v1493_v12 = vpop.permute.xlu0 %1492 }
 0x22c   : > { %1876 = vrot.lane.b32.xlu1 %v1787_v42, %s4955_s10  ;;  %1563 = vst.msk [vmem:[#allocation4 + $0xd0] sm:$0xff] %vm1536_vm7, %v1493_v12 }
 0x22d   : > { %1878 = vrot.lane.b32.xlu0 %v1788_v43, %s4955_s10 }
 0x22e   : > { %v1491_v19 = vpop.permute.xlu1 %1490 }
 0x22f   : > { %1562 = vst.msk [vmem:[#allocation4 + $0xc8] sm:$0xff] %vm1536_vm7, %v1491_v19  ;;  %v1497_v47 = vpop.permute.xlu0 %1496 }
 0x230   : > { %1687 = vrot.lane.b32.xlu1 %v1596_v44, %s4954_s7  ;;  %1565 = vst.msk [vmem:[#allocation4 + $0xe0] sm:$0xff] %vm1536_vm7, %v1497_v47 }
 0x231   : > { %1689 = vrot.lane.b32.xlu0 %v5851_v28, %s4954_s7 }
 0x232   : > { %v1495_v16 = vpop.permute.xlu1 %1494 }
 0x233   : > { %1564 = vst.msk [vmem:[#allocation4 + $0xd8] sm:$0xff] %vm1536_vm7, %v1495_v16  ;;  %v1634_v53 = vpop.permute.xlu0 %1633 }
 0x234   : > { %1880 = vrot.lane.b32.xlu1 %v1789_v50, %s4955_s10  ;;  %1730 = vst.msk [vmem:[#allocation4] sm:$0xff] %vm1729_vm8, %v1634_v53 }
 0x235   : > { %1882 = vrot.lane.b32.xlu0 %v5951_v26, %s4955_s10 }
 0x236   : > { %v1499_v23 = vpop.permute.xlu1 %1498 }
 0x237   : > { %1566 = vst.msk [vmem:[#allocation4 + $0xe8] sm:$0xff] %vm1536_vm7, %v1499_v23  ;;  %v1827_v28 = vpop.permute.xlu0 %1826 }
 0x238   : > { %1691 = vrot.lane.b32.xlu1 %v5861_v27, %s4954_s7  ;;  %1923 = vst.msk [vmem:[#allocation4] sm:$0xff] %vm1922_vm9, %v1827_v28 }
 0x239   : > { %1500 = vrot.lane.b32.xlu0 %v1406_v56, %s4953_s30 }
 0x23a   : > { %v1636_v63 = vpop.permute.xlu1 %1635 }
 0x23b   : > { %1731 = vst.msk [vmem:[#allocation4 + $0x8] sm:$0xff] %vm1729_vm8, %v1636_v63  ;;  %v1638_v26 = vpop.permute.xlu0 %1637 }
 0x23c   : > { %1884 = vrot.lane.b32.xlu1 %v5961_v31, %s4955_s10  ;;  %1732 = vst.msk [vmem:[#allocation4 + $0x10] sm:$0xff] %vm1729_vm8, %v1638_v26 }
 0x23d   : > { %1693 = vrot.lane.b32.xlu0 %v1599_v20, %s4954_s7 }
 0x23e   : > { %v1829_v13 = vpop.permute.xlu1 %1828 }
 0x23f   : > { %1924 = vst.msk [vmem:[#allocation4 + $0x8] sm:$0xff] %vm1922_vm9, %v1829_v13  ;;  %v1831_v27 = vpop.permute.xlu0 %1830  ;;  %v1955_v36 = vld [vmem:[#allocation4] sm:$0xff] }
 0x240   : > { %1502 = vrot.lane.b32.xlu1 %v1407_v10, %s4953_s30  ;;  %1925 = vst.msk [vmem:[#allocation4 + $0x10] sm:$0xff] %vm1922_vm9, %v1831_v27  ;;  %4776 = vmatprep.mubr.msk.f32.mxu0 %vm2003_vm10, %v1955_v36 }
 0x242   : > { %v1640_v31 = vpop.permute.xlu1 %1639 }
 0x243   : > { %1733 = vst.msk [vmem:[#allocation4 + $0x18] sm:$0xff] %vm1729_vm8, %v1640_v31  ;;  %v1642_v17 = vpop.permute.xlu0 %1641 }
 0x244   : > { %1695 = vrot.lane.b32.xlu1 %v1600_v14, %s4954_s7  ;;  %1734 = vst.msk [vmem:[#allocation4 + $0x20] sm:$0xff] %vm1729_vm8, %v1642_v17 }
 0x246   : > { %v1833_v24 = vpop.permute.xlu1 %1832  ;;  %v1956_v18 = vld [vmem:[#allocation4 + $0x8] sm:$0xff] }
 0x247   : > { %1926 = vst.msk [vmem:[#allocation4 + $0x18] sm:$0xff] %vm1922_vm9, %v1833_v24  ;;  %4777 = vmatmul.mubr.msk.f32.vlgmr.msra.gmra.mrb[0].mxu0 %vm2003_vm10, %v1956_v18  ;;  %v1835_v21 = vpop.permute.xlu0 %1834  ;;  %v1957_v48 = vld [vmem:[#allocation4 + $0x10] sm:$0xff] }
 0x248   : > { %1927 = vst.msk [vmem:[#allocation4 + $0x20] sm:$0xff] %vm1922_vm9, %v1835_v21  ;;  %4779 = vmatprep.mubr.msk.f32.mxu0 %vm2003_vm10, %v1957_v48  ;;  %v1792_v21 = vld [vmem:[#allocation2 + $0x19a] sm:$0xff]  ;;  %v1793_v48 = vld [vmem:[#allocation2 + $0x1a2] sm:$0xff] }
 0x249   : > { %1886 = vrot.lane.b32.xlu0 %v1792_v21, %s4955_s10  ;;  %1888 = vrot.lane.b32.xlu1 %v1793_v48, %s4955_s10 }
 0x24a   : > { %v1644_v22 = vpop.permute.xlu1 %1643 }
 0x24b   : > { %1735 = vst.msk [vmem:[#allocation4 + $0x28] sm:$0xff] %vm1729_vm8, %v1644_v22  ;;  %v1646_v49 = vpop.permute.xlu0 %1645 }
 0x24c   : > { %1736 = vst.msk [vmem:[#allocation4 + $0x30] sm:$0xff] %vm1729_vm8, %v1646_v49 }
 0x24e   : > { %v1837_v33 = vpop.permute.xlu1 %1836  ;;  %v1958_v45 = vld [vmem:[#allocation4 + $0x18] sm:$0xff] }
 0x24f   : > { %1928 = vst.msk [vmem:[#allocation4 + $0x28] sm:$0xff] %vm1922_vm9, %v1837_v33  ;;  %4780 = vmatmul.mubr.msk.f32.gmra.mrb[2].mxu0 %vm2003_vm10, %v1958_v45  ;;  %v1839_v29 = vpop.permute.xlu0 %1838  ;;  %v1959_v25 = vld [vmem:[#allocation4 + $0x20] sm:$0xff] }
 0x250   : > { %1929 = vst.msk [vmem:[#allocation4 + $0x30] sm:$0xff] %vm1922_vm9, %v1839_v29  ;;  %4782 = vmatprep.mubr.msk.f32.mxu0 %vm2003_vm10, %v1959_v25  ;;  %v2509_v25 = vld [vmem:[#allocation3 + $0x9] sm:$0xff] }
 0x251   : > { %2574 = vrot.lane.b32.xlu1 %v2509_v25, %s4948_s25 }
 0x252   : > { %v1648_v46 = vpop.permute.xlu1 %1647 }
 0x253   : > { %1737 = vst.msk [vmem:[#allocation4 + $0x38] sm:$0xff] %vm1729_vm8, %v1648_v46  ;;  %v1650_v35 = vpop.permute.xlu0 %1649  ;;  %v2508_v46 = vld [vmem:[#allocation3 + $0x1] sm:$0xff] }
 0x254   : > { %1738 = vst.msk [vmem:[#allocation4 + $0x40] sm:$0xff] %vm1729_vm8, %v1650_v35  ;;  %2572 = vrot.lane.b32.xlu0 %v2508_v46, %s4948_s25 }
 0x256   : > { %v1841_v30 = vpop.permute.xlu1 %1840  ;;  %v1960_v34 = vld [vmem:[#allocation4 + $0x28] sm:$0xff] }
 0x257   : > { %1930 = vst.msk [vmem:[#allocation4 + $0x38] sm:$0xff] %vm1922_vm9, %v1841_v30  ;;  %4783 = vmatmul.mubr.msk.f32.gmra.mrb[4].mxu0 %vm2003_vm10, %v1960_v34  ;;  %v1843_v32 = vpop.permute.xlu0 %1842  ;;  %v1961_v38 = vld [vmem:[#allocation4 + $0x30] sm:$0xff] }
 0x258   : > { %1931 = vst.msk [vmem:[#allocation4 + $0x40] sm:$0xff] %vm1922_vm9, %v1843_v32  ;;  %4785 = vmatprep.mubr.msk.f32.mxu0 %vm2003_vm10, %v1961_v38 }
 0x25a   : > { %v1652_v39 = vpop.permute.xlu1 %1651 }
 0x25b   : > { %1739 = vst.msk [vmem:[#allocation4 + $0x48] sm:$0xff] %vm1729_vm8, %v1652_v39  ;;  %v1654_v37 = vpop.permute.xlu0 %1653 }
 0x25c   : > { %1740 = vst.msk [vmem:[#allocation4 + $0x50] sm:$0xff] %vm1729_vm8, %v1654_v37 }
 0x25e   : > { %v1845_v51 = vpop.permute.xlu1 %1844  ;;  %v1962_v40 = vld [vmem:[#allocation4 + $0x38] sm:$0xff] }
 0x25f   : > { %1932 = vst.msk [vmem:[#allocation4 + $0x48] sm:$0xff] %vm1922_vm9, %v1845_v51  ;;  %4786 = vmatmul.mubr.msk.f32.gmra.mrb[6].mxu0 %vm2003_vm10, %v1962_v40  ;;  %v1847_v54 = vpop.permute.xlu0 %1846  ;;  %v1963_v52 = vld [vmem:[#allocation4 + $0x40] sm:$0xff] }
 0x260   : > { %1933 = vst.msk [vmem:[#allocation4 + $0x50] sm:$0xff] %vm1922_vm9, %v1847_v54  ;;  %4788 = vmatprep.mubr.msk.f32.mxu0 %vm2003_vm10, %v1963_v52 }
 0x262   : > { %v1656_v57 = vpop.permute.xlu1 %1655 }
 0x263   : > { %1741 = vst.msk [vmem:[#allocation4 + $0x58] sm:$0xff] %vm1729_vm8, %v1656_v57  ;;  %v1658_v55 = vpop.permute.xlu0 %1657 }
 0x264   : > { %1742 = vst.msk [vmem:[#allocation4 + $0x60] sm:$0xff] %vm1729_vm8, %v1658_v55 }
 0x266   : > { %v1849_v59 = vpop.permute.xlu1 %1848  ;;  %v1964_v58 = vld [vmem:[#allocation4 + $0x48] sm:$0xff] }
 0x267   : > { %1934 = vst.msk [vmem:[#allocation4 + $0x58] sm:$0xff] %vm1922_vm9, %v1849_v59  ;;  %4789 = vmatmul.mubr.msk.f32.gmra.mrb[8].mxu0 %vm2003_vm10, %v1964_v58  ;;  %v1851_v61 = vpop.permute.xlu0 %1850  ;;  %v1965_v60 = vld [vmem:[#allocation4 + $0x50] sm:$0xff] }
 0x268   : > { %1935 = vst.msk [vmem:[#allocation4 + $0x60] sm:$0xff] %vm1922_vm9, %v1851_v61  ;;  %4791 = vmatprep.mubr.msk.f32.mxu0 %vm2003_vm10, %v1965_v60  ;;  %v2445_v60 = vld [vmem:[#allocation3 + $0x8] sm:$0xff] }
 0x269   : > { %2477 = vst.msk [vmem:[#allocation4 + $0x8] sm:$0xff] %vm225_vm0, %v2445_v60 }
 0x26a   : > { %v1660_v0 = vpop.permute.xlu1 %1659 }
 0x26b   : > { %1743 = vst.msk [vmem:[#allocation4 + $0x68] sm:$0xff] %vm1729_vm8, %v1660_v0  ;;  %v1662_v62 = vpop.permute.xlu0 %1661  ;;  %v2444_v0 = vld [vmem:[#allocation3] sm:$0xff] }
 0x26c   : > { %1744 = vst.msk [vmem:[#allocation4 + $0x70] sm:$0xff] %vm1729_vm8, %v1662_v62 }
 0x26d   : > { %2476 = vst.msk [vmem:[#allocation4] sm:$0xff] %vm225_vm0, %v2444_v0 }
 0x26e   : > { %v1853_v2 = vpop.permute.xlu1 %1852  ;;  %v1966_v1 = vld [vmem:[#allocation4 + $0x58] sm:$0xff] }
 0x26f   : > { %1936 = vst.msk [vmem:[#allocation4 + $0x68] sm:$0xff] %vm1922_vm9, %v1853_v2  ;;  %4792 = vmatmul.mubr.msk.f32.gmra.mrb[10].mxu0 %vm2003_vm10, %v1966_v1  ;;  %v1855_v4 = vpop.permute.xlu0 %1854  ;;  %v1967_v3 = vld [vmem:[#allocation4 + $0x60] sm:$0xff]  ;;  %v6316_v1 = vld [vmem:[%s7379_s2] ss:$0 sm:$0xff] }
 0x270   : > { %1937 = vst.msk [vmem:[#allocation4 + $0x70] sm:$0xff] %vm1922_vm9, %v1855_v4  ;;  %4794 = vmatprep.mubr.msk.f32.mxu0 %vm2003_vm10, %v1967_v3 }
 0x272   : > { %v1664_v6 = vpop.permute.xlu1 %1663 }
 0x273   : > { %1745 = vst.msk [vmem:[#allocation4 + $0x78] sm:$0xff] %vm1729_vm8, %v1664_v6  ;;  %v1666_v5 = vpop.permute.xlu0 %1665 }
 0x274   : > { %1746 = vst.msk [vmem:[#allocation4 + $0x80] sm:$0xff] %vm1729_vm8, %v1666_v5 }
 0x276   : > { %v1857_v8 = vpop.permute.xlu1 %1856  ;;  %v1968_v7 = vld [vmem:[#allocation4 + $0x68] sm:$0xff] }
 0x277   : > { %1938 = vst.msk [vmem:[#allocation4 + $0x78] sm:$0xff] %vm1922_vm9, %v1857_v8  ;;  %4795 = vmatmul.mubr.msk.f32.gmra.mrb[12].mxu0 %vm2003_vm10, %v1968_v7  ;;  %v1859_v11 = vpop.permute.xlu0 %1858  ;;  %v1969_v41 = vld [vmem:[#allocation4 + $0x70] sm:$0xff] }
 0x278   : > { %1939 = vst.msk [vmem:[#allocation4 + $0x80] sm:$0xff] %vm1922_vm9, %v1859_v11  ;;  %4797 = vmatprep.mubr.msk.f32.mxu0 %vm2003_vm10, %v1969_v41 }
 0x27a   : > { %v1668_v9 = vpop.permute.xlu1 %1667 }
 0x27b   : > { %1747 = vst.msk [vmem:[#allocation4 + $0x88] sm:$0xff] %vm1729_vm8, %v1668_v9  ;;  %v1670_v42 = vpop.permute.xlu0 %1669 }
 0x27c   : > { %1748 = vst.msk [vmem:[#allocation4 + $0x90] sm:$0xff] %vm1729_vm8, %v1670_v42 }
 0x27e   : > { %v1861_v15 = vpop.permute.xlu1 %1860  ;;  %v1970_v43 = vld [vmem:[#allocation4 + $0x78] sm:$0xff] }
 0x27f   : > { %1940 = vst.msk [vmem:[#allocation4 + $0x88] sm:$0xff] %vm1922_vm9, %v1861_v15  ;;  %4798 = vmatmul.mubr.msk.f32.gmra.mrb[14].mxu0 %vm2003_vm10, %v1970_v43  ;;  %v1863_v12 = vpop.permute.xlu0 %1862  ;;  %v1971_v44 = vld [vmem:[#allocation4 + $0x80] sm:$0xff] }
 0x280   : > { %1941 = vst.msk [vmem:[#allocation4 + $0x90] sm:$0xff] %vm1922_vm9, %v1863_v12  ;;  %4800 = vmatprep.mubr.msk.f32.mxu0 %vm2003_vm10, %v1971_v44 }
 0x282   : > { %v1672_v19 = vpop.permute.xlu1 %1671 }
 0x283   : > { %1749 = vst.msk [vmem:[#allocation4 + $0x98] sm:$0xff] %vm1729_vm8, %v1672_v19  ;;  %v1674_v47 = vpop.permute.xlu0 %1673 }
 0x284   : > { %1750 = vst.msk [vmem:[#allocation4 + $0xa0] sm:$0xff] %vm1729_vm8, %v1674_v47 }
 0x286   : > { %v1865_v50 = vpop.permute.xlu1 %1864  ;;  %v1972_v16 = vld [vmem:[#allocation4 + $0x88] sm:$0xff] }
 0x287   : > { %1942 = vst.msk [vmem:[#allocation4 + $0x98] sm:$0xff] %vm1922_vm9, %v1865_v50  ;;  %4801 = vmatmul.mubr.msk.f32.gmra.mrb[16].mxu0 %vm2003_vm10, %v1972_v16  ;;  %v1867_v53 = vpop.permute.xlu0 %1866  ;;  %v1973_v23 = vld [vmem:[#allocation4 + $0x90] sm:$0xff] }
 0x288   : > { %1943 = vst.msk [vmem:[#allocation4 + $0xa0] sm:$0xff] %vm1922_vm9, %v1867_v53  ;;  %4803 = vmatprep.mubr.msk.f32.mxu0 %vm2003_vm10, %v1973_v23 }
 0x28a   : > { %v1676_v56 = vpop.permute.xlu1 %1675 }
 0x28b   : > { %1751 = vst.msk [vmem:[#allocation4 + $0xa8] sm:$0xff] %vm1729_vm8, %v1676_v56  ;;  %v1678_v28 = vpop.permute.xlu0 %1677 }
 0x28c   : > { %1752 = vst.msk [vmem:[#allocation4 + $0xb0] sm:$0xff] %vm1729_vm8, %v1678_v28 }
 0x28e   : > { %v1869_v63 = vpop.permute.xlu1 %1868  ;;  %v1974_v20 = vld [vmem:[#allocation4 + $0x98] sm:$0xff] }
 0x28f   : > { %1944 = vst.msk [vmem:[#allocation4 + $0xa8] sm:$0xff] %vm1922_vm9, %v1869_v63  ;;  %4804 = vmatmul.mubr.msk.f32.gmra.mrb[18].mxu0 %vm2003_vm10, %v1974_v20  ;;  %v1871_v26 = vpop.permute.xlu0 %1870  ;;  %v1975_v10 = vld [vmem:[#allocation4 + $0xa0] sm:$0xff] }
 0x290   : > { %1945 = vst.msk [vmem:[#allocation4 + $0xb0] sm:$0xff] %vm1922_vm9, %v1871_v26  ;;  %4806 = vmatprep.mubr.msk.f32.mxu0 %vm2003_vm10, %v1975_v10 }
 0x292   : > { %v1680_v13 = vpop.permute.xlu1 %1679 }
 0x293   : > { %1753 = vst.msk [vmem:[#allocation4 + $0xb8] sm:$0xff] %vm1729_vm8, %v1680_v13  ;;  %v1682_v27 = vpop.permute.xlu0 %1681 }
 0x294   : > { %1754 = vst.msk [vmem:[#allocation4 + $0xc0] sm:$0xff] %vm1729_vm8, %v1682_v27 }
 0x296   : > { %v1873_v36 = vpop.permute.xlu1 %1872  ;;  %v1976_v14 = vld [vmem:[#allocation4 + $0xa8] sm:$0xff] }
 0x297   : > { %1946 = vst.msk [vmem:[#allocation4 + $0xb8] sm:$0xff] %vm1922_vm9, %v1873_v36  ;;  %4807 = vmatmul.mubr.msk.f32.gmra.mrb[20].mxu0 %vm2003_vm10, %v1976_v14  ;;  %v1875_v31 = vpop.permute.xlu0 %1874  ;;  %v1977_v17 = vld [vmem:[#allocation4 + $0xb0] sm:$0xff] }
 0x298   : > { %1947 = vst.msk [vmem:[#allocation4 + $0xc0] sm:$0xff] %vm1922_vm9, %v1875_v31  ;;  %4809 = vmatprep.mubr.msk.f32.mxu0 %vm2003_vm10, %v1977_v17 }
 0x29a   : > { %v1684_v24 = vpop.permute.xlu1 %1683 }
 0x29b   : > { %1755 = vst.msk [vmem:[#allocation4 + $0xc8] sm:$0xff] %vm1729_vm8, %v1684_v24  ;;  %v1686_v18 = vpop.permute.xlu0 %1685 }
 0x29c   : > { %1756 = vst.msk [vmem:[#allocation4 + $0xd0] sm:$0xff] %vm1729_vm8, %v1686_v18 }
 0x29e   : > { %v1877_v22 = vpop.permute.xlu1 %1876  ;;  %v1978_v49 = vld [vmem:[#allocation4 + $0xb8] sm:$0xff] }
 0x29f   : > { %1948 = vst.msk [vmem:[#allocation4 + $0xc8] sm:$0xff] %vm1922_vm9, %v1877_v22  ;;  %4810 = vmatmul.mubr.msk.f32.gmra.mrb[22].mxu0 %vm2003_vm10, %v1978_v49  ;;  %v1879_v33 = vpop.permute.xlu0 %1878  ;;  %v1979_v45 = vld [vmem:[#allocation4 + $0xc0] sm:$0xff] }
 0x2a0   : > { %1949 = vst.msk [vmem:[#allocation4 + $0xd0] sm:$0xff] %vm1922_vm9, %v1879_v33  ;;  %4812 = vmatprep.mubr.msk.f32.mxu0 %vm2003_vm10, %v1979_v45 }
 0x2a2   : > { %v1688_v29 = vpop.permute.xlu1 %1687 }
 0x2a3   : > { %1757 = vst.msk [vmem:[#allocation4 + $0xd8] sm:$0xff] %vm1729_vm8, %v1688_v29  ;;  %v1690_v35 = vpop.permute.xlu0 %1689 }
 0x2a4   : > { %1758 = vst.msk [vmem:[#allocation4 + $0xe0] sm:$0xff] %vm1729_vm8, %v1690_v35 }
 0x2a6   : > { %v1881_v30 = vpop.permute.xlu1 %1880  ;;  %v1980_v34 = vld [vmem:[#allocation4 + $0xc8] sm:$0xff] }
 0x2a7   : > { %1950 = vst.msk [vmem:[#allocation4 + $0xd8] sm:$0xff] %vm1922_vm9, %v1881_v30  ;;  %4813 = vmatmul.mubr.msk.f32.gmra.mrb[24].mxu0 %vm2003_vm10, %v1980_v34  ;;  %v1883_v32 = vpop.permute.xlu0 %1882  ;;  %v1981_v38 = vld [vmem:[#allocation4 + $0xd0] sm:$0xff] }
 0x2a8   : > { %1951 = vst.msk [vmem:[#allocation4 + $0xe0] sm:$0xff] %vm1922_vm9, %v1883_v32  ;;  %4815 = vmatprep.mubr.msk.f32.mxu0 %vm2003_vm10, %v1981_v38 }
 0x2aa   : > { %v1692_v39 = vpop.permute.xlu1 %1691 }
 0x2ab   : > { %1759 = vst.msk [vmem:[#allocation4 + $0xe8] sm:$0xff] %vm1729_vm8, %v1692_v39  ;;  %v1501_v52 = vpop.permute.xlu0 %1500 }
 0x2ac   : > { %1567 = vst.msk [vmem:[#allocation4 + $0xf0] sm:$0xff] %vm1536_vm7, %v1501_v52 }
 0x2ae   : > { %v1885_v37 = vpop.permute.xlu1 %1884  ;;  %v1982_v51 = vld [vmem:[#allocation4 + $0xd8] sm:$0xff] }
 0x2af   : > { %1952 = vst.msk [vmem:[#allocation4 + $0xe8] sm:$0xff] %vm1922_vm9, %v1885_v37  ;;  %4816 = vmatmul.mubr.msk.f32.gmra.mrb[26].mxu0 %vm2003_vm10, %v1982_v51  ;;  %v1983_v40 = vld [vmem:[#allocation4 + $0xe0] sm:$0xff]  ;;  %v1694_v55 = vpop.permute.xlu0 %1693 }
 0x2b0   : > { %4818 = vmatprep.mubr.msk.f32.mxu0 %vm2003_vm10, %v1983_v40  ;;  %1760 = vst.msk [vmem:[#allocation4 + $0xf0] sm:$0xff] %vm1729_vm8, %v1694_v55 }
 0x2b2   : > { %v1503_v57 = vpop.permute.xlu1 %1502 }
 0x2b3   : > { %1568 = vst.msk [vmem:[#allocation4 + $0xf8] sm:$0xff] %vm1536_vm7, %v1503_v57 }
 0x2b6   : > { %v1984_v54 = vld [vmem:[#allocation4 + $0xe8] sm:$0xff]  ;;  %v1696_v59 = vpop.permute.xlu1 %1695 }
 0x2b7   : > { %4819 = vmatmul.mubr.msk.f32.gmra.mrb[28].mxu0 %vm2003_vm10, %v1984_v54  ;;  %1761 = vst.msk [vmem:[#allocation4 + $0xf8] sm:$0xff] %vm1729_vm8, %v1696_v59 }
 0x2bb   : > { %v1887_v58 = vpop.permute.xlu0 %1886  ;;  %v1889_v61 = vpop.permute.xlu1 %1888 }
 0x2bc   : > { %1953 = vst.msk [vmem:[#allocation4 + $0xf0] sm:$0xff] %vm1922_vm9, %v1887_v58  ;;  %1954 = vst.msk [vmem:[#allocation4 + $0xf8] sm:$0xff] %vm1922_vm9, %v1889_v61 }
 0x2c3   : > { %v2575_v62 = vpop.permute.xlu1 %2574  ;;  %v1985_v4 = vld [vmem:[#allocation4 + $0xf0] sm:$0xff]  ;;  %v1986_v3 = vld [vmem:[#allocation4 + $0xf8] sm:$0xff] }
 0x2c4   : > { %2669 = vst.msk [vmem:[#allocation4 + $0x8] sm:$0xff] %vm570_vm2, %v2575_v62  ;;  %4821 = vmatprep.mubr.msk.f32.mxu0 %vm2003_vm10, %v1985_v4 }
 0x2c5   : > { %4822 = vmatmul.mubr.msk.f32.gmra.mrb[30].mxu0 %vm2003_vm10, %v1986_v3 }
 0x2c6   : > { %v2573_v2 = vpop.permute.xlu0 %2572 }
 0x2c7   : > { %2668 = vst.msk [vmem:[#allocation4] sm:$0xff] %vm570_vm2, %v2573_v2 }
 0x31a   : > { %v4778_v6 = vpop.f32.mrb[0].mxu0 }
 0x31b   : > { %v2172_v5 = vadd.f32 %v4778_v6, %v6316_v1  ;;  %v2166_v8 = vpop.f32.mrb[1].mxu0 }
 0x31c   : > { %v2167_v7 = vadd.f32 %v6316_v1, %v2166_v8 }
 0x31d   : > { %v2326_v11 = vmax.f32 %v2172_v5, 0.0 }
 0x31e   : > { %v2325_v41 = vmax.f32 %v2167_v7, 0.0 }
 0x31f   : > { %2413 = vst.msk [vmem:[#allocation3 + $0x21] sm:$0xff] %vm225_vm0, %v2326_v11 }
 0x320   : > { %2412 = vst.msk [vmem:[#allocation3 + $0x19] sm:$0xff] %vm225_vm0, %v2325_v41 }
 0x322   : > { %v4781_v9 = vpop.f32.mrb[2].mxu0 }
 0x323   : > { %v2182_v42 = vadd.f32 %v4781_v9, %v6316_v1  ;;  %v2176_v15 = vpop.f32.mrb[3].mxu0 }
 0x324   : > { %v2177_v43 = vadd.f32 %v6316_v1, %v2176_v15 }
 0x325   : > { %v2328_v12 = vmax.f32 %v2182_v42, 0.0 }
 0x326   : > { %v2327_v44 = vmax.f32 %v2177_v43, 0.0  ;;  %v6326_v19 = vld [vmem:[#allocation3 + $0x21] sm:$0xff] }
 0x327   : > { %2415 = vst.msk [vmem:[#allocation3 + $0x39] sm:$0xff] %vm225_vm0, %v2328_v12  ;;  %2578 = vrot.lane.b32.xlu1 %v6326_v19, %s4948_s25  ;;  %v6331_v47 = vld [vmem:[#allocation3 + $0x19] sm:$0xff] }
 0x328   : > { %v6333_v50 = vld [vmem:[#allocation3 + $0x20] sm:$0xff]  ;;  %v6335_v16 = vld [vmem:[#allocation3 + $0x18] sm:$0xff]  ;;  %2414 = vst.msk [vmem:[#allocation3 + $0x31] sm:$0xff] %vm225_vm0, %v2327_v44  ;;  %2576 = vrot.lane.b32.xlu0 %v6331_v47, %s4948_s25 }
 0x329   : > { %2479 = vst.msk [vmem:[#allocation4 + $0x18] sm:$0xff] %vm225_vm0, %v6333_v50  ;;  %2478 = vst.msk [vmem:[#allocation4 + $0x10] sm:$0xff] %vm225_vm0, %v6335_v16 }
 0x32a   : > { %v4784_v53 = vpop.f32.mrb[4].mxu0 }
 0x32b   : > { %v2192_v23 = vadd.f32 %v4784_v53, %v6316_v1  ;;  %v2186_v56 = vpop.f32.mrb[5].mxu0 }
 0x32c   : > { %v2187_v28 = vadd.f32 %v6316_v1, %v2186_v56 }
 0x32d   : > { %v2330_v63 = vmax.f32 %v2192_v23, 0.0 }
 0x32e   : > { %v2329_v20 = vmax.f32 %v2187_v28, 0.0  ;;  %v6346_v26 = vld [vmem:[#allocation3 + $0x39] sm:$0xff] }
 0x32f   : > { %2417 = vst.msk [vmem:[#allocation3 + $0x51] sm:$0xff] %vm225_vm0, %v2330_v63  ;;  %2582 = vrot.lane.b32.xlu1 %v6346_v26, %s4948_s25  ;;  %v6351_v10 = vld [vmem:[#allocation3 + $0x31] sm:$0xff] }
 0x330   : > { %v6353_v13 = vld [vmem:[#allocation3 + $0x38] sm:$0xff]  ;;  %v6355_v27 = vld [vmem:[#allocation3 + $0x30] sm:$0xff]  ;;  %2416 = vst.msk [vmem:[#allocation3 + $0x49] sm:$0xff] %vm225_vm0, %v2329_v20  ;;  %2580 = vrot.lane.b32.xlu0 %v6351_v10, %s4948_s25 }
 0x331   : > { %2481 = vst.msk [vmem:[#allocation4 + $0x28] sm:$0xff] %vm225_vm0, %v6353_v13  ;;  %2480 = vst.msk [vmem:[#allocation4 + $0x20] sm:$0xff] %vm225_vm0, %v6355_v27 }
 0x332   : > { %v4787_v36 = vpop.f32.mrb[6].mxu0 }
 0x333   : > { %v2202_v14 = vadd.f32 %v4787_v36, %v6316_v1  ;;  %v2196_v31 = vpop.f32.mrb[7].mxu0 }
 0x334   : > { %v2197_v17 = vadd.f32 %v6316_v1, %v2196_v31 }
 0x335   : > { %v2332_v24 = vmax.f32 %v2202_v14, 0.0 }
 0x336   : > { %v2331_v18 = vmax.f32 %v2197_v17, 0.0  ;;  %v6366_v21 = vld [vmem:[#allocation3 + $0x51] sm:$0xff] }
 0x337   : > { %2419 = vst.msk [vmem:[#allocation3 + $0x69] sm:$0xff] %vm225_vm0, %v2332_v24  ;;  %2586 = vrot.lane.b32.xlu1 %v6366_v21, %s4948_s25  ;;  %v6371_v48 = vld [vmem:[#allocation3 + $0x49] sm:$0xff] }
 0x338   : > { %v6373_v22 = vld [vmem:[#allocation3 + $0x50] sm:$0xff]  ;;  %2418 = vst.msk [vmem:[#allocation3 + $0x61] sm:$0xff] %vm225_vm0, %v2331_v18  ;;  %2584 = vrot.lane.b32.xlu0 %v6371_v48, %s4948_s25  ;;  %v6380_v49 = vld [vmem:[#allocation3 + $0x48] sm:$0xff] }
 0x339   : > { %2483 = vst.msk [vmem:[#allocation4 + $0x38] sm:$0xff] %vm225_vm0, %v6373_v22  ;;  %2482 = vst.msk [vmem:[#allocation4 + $0x30] sm:$0xff] %vm225_vm0, %v6380_v49 }
 0x33a   : > { %v4790_v33 = vpop.f32.mrb[8].mxu0 }
 0x33b   : > { %v2212_v45 = vadd.f32 %v4790_v33, %v6316_v1  ;;  %v2206_v29 = vpop.f32.mrb[9].mxu0 }
 0x33c   : > { %v2207_v25 = vadd.f32 %v6316_v1, %v2206_v29 }
 0x33d   : > { %v2334_v46 = vmax.f32 %v2212_v45, 0.0 }
 0x33e   : > { %v2333_v35 = vmax.f32 %v2207_v25, 0.0  ;;  %v6386_v30 = vld [vmem:[#allocation3 + $0x69] sm:$0xff] }
 0x33f   : > { %2421 = vst.msk [vmem:[#allocation3 + $0x81] sm:$0xff] %vm225_vm0, %v2334_v46  ;;  %2590 = vrot.lane.b32.xlu1 %v6386_v30, %s4948_s25  ;;  %v6391_v34 = vld [vmem:[#allocation3 + $0x61] sm:$0xff] }
 0x340   : > { %v6393_v32 = vld [vmem:[#allocation3 + $0x68] sm:$0xff]  ;;  %2420 = vst.msk [vmem:[#allocation3 + $0x79] sm:$0xff] %vm225_vm0, %v2333_v35  ;;  %2588 = vrot.lane.b32.xlu0 %v6391_v34, %s4948_s25  ;;  %v6400_v38 = vld [vmem:[#allocation3 + $0x60] sm:$0xff] }
 0x341   : > { %2485 = vst.msk [vmem:[#allocation4 + $0x48] sm:$0xff] %vm225_vm0, %v6393_v32  ;;  %2484 = vst.msk [vmem:[#allocation4 + $0x40] sm:$0xff] %vm225_vm0, %v6400_v38 }
 0x342   : > { %v4793_v39 = vpop.f32.mrb[10].mxu0 }
 0x343   : > { %v2222_v37 = vadd.f32 %v4793_v39, %v6316_v1  ;;  %v2216_v51 = vpop.f32.mrb[11].mxu0 }
 0x344   : > { %v2217_v40 = vadd.f32 %v6316_v1, %v2216_v51 }
 0x345   : > { %v2336_v54 = vmax.f32 %v2222_v37, 0.0 }
 0x346   : > { %v2335_v52 = vmax.f32 %v2217_v40, 0.0  ;;  %v6406_v57 = vld [vmem:[#allocation3 + $0x81] sm:$0xff] }
 0x347   : > { %2423 = vst.msk [vmem:[#allocation3 + $0x99] sm:$0xff] %vm225_vm0, %v2336_v54  ;;  %2594 = vrot.lane.b32.xlu1 %v6406_v57, %s4948_s25  ;;  %v6411_v55 = vld [vmem:[#allocation3 + $0x79] sm:$0xff] }
 0x348   : > { %v6413_v59 = vld [vmem:[#allocation3 + $0x80] sm:$0xff]  ;;  %2422 = vst.msk [vmem:[#allocation3 + $0x91] sm:$0xff] %vm225_vm0, %v2335_v52  ;;  %2592 = vrot.lane.b32.xlu0 %v6411_v55, %s4948_s25  ;;  %v6420_v58 = vld [vmem:[#allocation3 + $0x78] sm:$0xff] }
 0x349   : > { %2487 = vst.msk [vmem:[#allocation4 + $0x58] sm:$0xff] %vm225_vm0, %v6413_v59  ;;  %2486 = vst.msk [vmem:[#allocation4 + $0x50] sm:$0xff] %vm225_vm0, %v6420_v58 }
 0x34a   : > { %v4796_v61 = vpop.f32.mrb[12].mxu0 }
 0x34b   : > { %v2232_v60 = vadd.f32 %v4796_v61, %v6316_v1  ;;  %v2226_v0 = vpop.f32.mrb[13].mxu0 }
 0x34c   : > { %v2227_v62 = vadd.f32 %v6316_v1, %v2226_v0 }
 0x34d   : > { %v2338_v2 = vmax.f32 %v2232_v60, 0.0 }
 0x34e   : > { %v2337_v4 = vmax.f32 %v2227_v62, 0.0  ;;  %v2521_v3 = vld [vmem:[#allocation3 + $0x99] sm:$0xff] }
 0x34f   : > { %2425 = vst.msk [vmem:[#allocation3 + $0xb1] sm:$0xff] %vm225_vm0, %v2338_v2  ;;  %2598 = vrot.lane.b32.xlu1 %v2521_v3, %s4948_s25  ;;  %v6428_v6 = vld [vmem:[#allocation3 + $0x91] sm:$0xff] }
 0x350   : > { %v6430_v5 = vld [vmem:[#allocation3 + $0x98] sm:$0xff]  ;;  %2424 = vst.msk [vmem:[#allocation3 + $0xa9] sm:$0xff] %vm225_vm0, %v2337_v4  ;;  %2596 = vrot.lane.b32.xlu0 %v6428_v6, %s4948_s25  ;;  %v6437_v8 = vld [vmem:[#allocation3 + $0x90] sm:$0xff] }
 0x351   : > { %2489 = vst.msk [vmem:[#allocation4 + $0x68] sm:$0xff] %vm225_vm0, %v6430_v5  ;;  %2488 = vst.msk [vmem:[#allocation4 + $0x60] sm:$0xff] %vm225_vm0, %v6437_v8 }
 0x352   : > { %v4799_v7 = vpop.f32.mrb[14].mxu0 }
 0x353   : > { %v2242_v11 = vadd.f32 %v4799_v7, %v6316_v1  ;;  %v2236_v41 = vpop.f32.mrb[15].mxu0 }
 0x354   : > { %v2237_v9 = vadd.f32 %v6316_v1, %v2236_v41 }
 0x355   : > { %v2340_v42 = vmax.f32 %v2242_v11, 0.0 }
 0x356   : > { %v2339_v15 = vmax.f32 %v2237_v9, 0.0  ;;  %v2523_v43 = vld [vmem:[#allocation3 + $0xb1] sm:$0xff] }
 0x357   : > { %2427 = vst.msk [vmem:[#allocation3 + $0xc9] sm:$0xff] %vm225_vm0, %v2340_v42  ;;  %2602 = vrot.lane.b32.xlu1 %v2523_v43, %s4948_s25  ;;  %v2522_v12 = vld [vmem:[#allocation3 + $0xa9] sm:$0xff] }
 0x358   : > { %v6445_v44 = vld [vmem:[#allocation3 + $0xb0] sm:$0xff]  ;;  %2426 = vst.msk [vmem:[#allocation3 + $0xc1] sm:$0xff] %vm225_vm0, %v2339_v15  ;;  %2600 = vrot.lane.b32.xlu0 %v2522_v12, %s4948_s25  ;;  %v6451_v53 = vld [vmem:[#allocation3 + $0xa8] sm:$0xff] }
 0x359   : > { %2491 = vst.msk [vmem:[#allocation4 + $0x78] sm:$0xff] %vm225_vm0, %v6445_v44  ;;  %2490 = vst.msk [vmem:[#allocation4 + $0x70] sm:$0xff] %vm225_vm0, %v6451_v53 }
 0x35a   : > { %v4802_v23 = vpop.f32.mrb[16].mxu0 }
 0x35b   : > { %v2252_v56 = vadd.f32 %v4802_v23, %v6316_v1  ;;  %v2246_v28 = vpop.f32.mrb[17].mxu0 }
 0x35c   : > { %v2247_v63 = vadd.f32 %v6316_v1, %v2246_v28 }
 0x35d   : > { %v2342_v20 = vmax.f32 %v2252_v56, 0.0 }
 0x35e   : > { %v2341_v36 = vmax.f32 %v2247_v63, 0.0  ;;  %v2525_v14 = vld [vmem:[#allocation3 + $0xc9] sm:$0xff] }
 0x35f   : > { %2429 = vst.msk [vmem:[#allocation3 + $0xe1] sm:$0xff] %vm225_vm0, %v2342_v20  ;;  %2606 = vrot.lane.b32.xlu1 %v2525_v14, %s4948_s25  ;;  %v2524_v31 = vld [vmem:[#allocation3 + $0xc1] sm:$0xff] }
 0x360   : > { %v6459_v17 = vld [vmem:[#allocation3 + $0xc8] sm:$0xff]  ;;  %2428 = vst.msk [vmem:[#allocation3 + $0xd9] sm:$0xff] %vm225_vm0, %v2341_v36  ;;  %2604 = vrot.lane.b32.xlu0 %v2524_v31, %s4948_s25  ;;  %v6465_v24 = vld [vmem:[#allocation3 + $0xc0] sm:$0xff] }
 0x361   : > { %2493 = vst.msk [vmem:[#allocation4 + $0x88] sm:$0xff] %vm225_vm0, %v6459_v17  ;;  %2492 = vst.msk [vmem:[#allocation4 + $0x80] sm:$0xff] %vm225_vm0, %v6465_v24 }
 0x362   : > { %v4805_v18 = vpop.f32.mrb[18].mxu0 }
 0x363   : > { %v2262_v33 = vadd.f32 %v4805_v18, %v6316_v1  ;;  %v2256_v45 = vpop.f32.mrb[19].mxu0 }
 0x364   : > { %v2257_v29 = vadd.f32 %v6316_v1, %v2256_v45 }
 0x365   : > { %v2344_v25 = vmax.f32 %v2262_v33, 0.0 }
 0x366   : > { %v2343_v46 = vmax.f32 %v2257_v29, 0.0  ;;  %v2527_v35 = vld [vmem:[#allocation3 + $0xe1] sm:$0xff] }
 0x367   : > { %2431 = vst.msk [vmem:[#allocation3 + $0xf9] sm:$0xff] %vm225_vm0, %v2344_v25  ;;  %2610 = vrot.lane.b32.xlu1 %v2527_v35, %s4948_s25  ;;  %v2526_v39 = vld [vmem:[#allocation3 + $0xd9] sm:$0xff] }
 0x368   : > { %v6473_v37 = vld [vmem:[#allocation3 + $0xe0] sm:$0xff]  ;;  %2430 = vst.msk [vmem:[#allocation3 + $0xf1] sm:$0xff] %vm225_vm0, %v2343_v46  ;;  %2608 = vrot.lane.b32.xlu0 %v2526_v39, %s4948_s25  ;;  %v6479_v51 = vld [vmem:[#allocation3 + $0xd8] sm:$0xff] }
 0x369   : > { %2495 = vst.msk [vmem:[#allocation4 + $0x98] sm:$0xff] %vm225_vm0, %v6473_v37  ;;  %2494 = vst.msk [vmem:[#allocation4 + $0x90] sm:$0xff] %vm225_vm0, %v6479_v51 }
 0x36a   : > { %v4808_v40 = vpop.f32.mrb[20].mxu0 }
 0x36b   : > { %v2272_v54 = vadd.f32 %v4808_v40, %v6316_v1  ;;  %v2266_v52 = vpop.f32.mrb[21].mxu0 }
 0x36c   : > { %v2267_v61 = vadd.f32 %v6316_v1, %v2266_v52 }
 0x36d   : > { %v2346_v60 = vmax.f32 %v2272_v54, 0.0 }
 0x36e   : > { %v2345_v0 = vmax.f32 %v2267_v61, 0.0  ;;  %v2529_v62 = vld [vmem:[#allocation3 + $0xf9] sm:$0xff] }
 0x36f   : > { %2433 = vst.msk [vmem:[#allocation3 + $0x111] sm:$0xff] %vm225_vm0, %v2346_v60  ;;  %2614 = vrot.lane.b32.xlu1 %v2529_v62, %s4948_s25  ;;  %v2528_v2 = vld [vmem:[#allocation3 + $0xf1] sm:$0xff] }
 0x370   : > { %v6487_v4 = vld [vmem:[#allocation3 + $0xf8] sm:$0xff]  ;;  %2432 = vst.msk [vmem:[#allocation3 + $0x109] sm:$0xff] %vm225_vm0, %v2345_v0  ;;  %2612 = vrot.lane.b32.xlu0 %v2528_v2, %s4948_s25  ;;  %v6493_v3 = vld [vmem:[#allocation3 + $0xf0] sm:$0xff] }
 0x371   : > { %2497 = vst.msk [vmem:[#allocation4 + $0xa8] sm:$0xff] %vm225_vm0, %v6487_v4  ;;  %2496 = vst.msk [vmem:[#allocation4 + $0xa0] sm:$0xff] %vm225_vm0, %v6493_v3 }
 0x372   : > { %v4811_v7 = vpop.f32.mrb[22].mxu0 }
 0x373   : > { %v2282_v11 = vadd.f32 %v4811_v7, %v6316_v1  ;;  %v2276_v41 = vpop.f32.mrb[23].mxu0 }
 0x374   : > { %v2277_v9 = vadd.f32 %v6316_v1, %v2276_v41 }
 0x375   : > { %v2348_v42 = vmax.f32 %v2282_v11, 0.0 }
 0x376   : > { %v2347_v15 = vmax.f32 %v2277_v9, 0.0  ;;  %v2531_v43 = vld [vmem:[#allocation3 + $0x111] sm:$0xff] }
 0x377   : > { %2435 = vst.msk [vmem:[#allocation3 + $0x129] sm:$0xff] %vm225_vm0, %v2348_v42  ;;  %2618 = vrot.lane.b32.xlu1 %v2531_v43, %s4948_s25  ;;  %v2530_v12 = vld [vmem:[#allocation3 + $0x109] sm:$0xff] }
 0x378   : > { %v6501_v23 = vld [vmem:[#allocation3 + $0x110] sm:$0xff]  ;;  %2434 = vst.msk [vmem:[#allocation3 + $0x121] sm:$0xff] %vm225_vm0, %v2347_v15  ;;  %2616 = vrot.lane.b32.xlu0 %v2530_v12, %s4948_s25  ;;  %v6507_v56 = vld [vmem:[#allocation3 + $0x108] sm:$0xff] }
 0x379   : > { %2499 = vst.msk [vmem:[#allocation4 + $0xb8] sm:$0xff] %vm225_vm0, %v6501_v23  ;;  %2498 = vst.msk [vmem:[#allocation4 + $0xb0] sm:$0xff] %vm225_vm0, %v6507_v56 }
 0x37a   : > { %v4814_v28 = vpop.f32.mrb[24].mxu0 }
 0x37b   : > { %v2292_v63 = vadd.f32 %v4814_v28, %v6316_v1  ;;  %v2286_v20 = vpop.f32.mrb[25].mxu0 }
 0x37c   : > { %v2287_v36 = vadd.f32 %v6316_v1, %v2286_v20 }
 0x37d   : > { %v2350_v14 = vmax.f32 %v2292_v63, 0.0 }
 0x37e   : > { %v2349_v31 = vmax.f32 %v2287_v36, 0.0  ;;  %v2533_v18 = vld [vmem:[#allocation3 + $0x129] sm:$0xff] }
 0x37f   : > { %2437 = vst.msk [vmem:[#allocation3 + $0x141] sm:$0xff] %vm225_vm0, %v2350_v14  ;;  %2622 = vrot.lane.b32.xlu1 %v2533_v18, %s4948_s25  ;;  %v2532_v33 = vld [vmem:[#allocation3 + $0x121] sm:$0xff]  ;;  %v2701_v36 = vld [vmem:[#allocation3 + $0xa] sm:$0xff] }
 0x380   : > { %v2469_v45 = vld [vmem:[#allocation3 + $0x128] sm:$0xff]  ;;  %2436 = vst.msk [vmem:[#allocation3 + $0x139] sm:$0xff] %vm225_vm0, %v2349_v31  ;;  %2620 = vrot.lane.b32.xlu0 %v2532_v33, %s4948_s25  ;;  %v6518_v29 = vld [vmem:[#allocation3 + $0x120] sm:$0xff] }
 0x381   : > { %2501 = vst.msk [vmem:[#allocation4 + $0xc8] sm:$0xff] %vm225_vm0, %v2469_v45  ;;  %2500 = vst.msk [vmem:[#allocation4 + $0xc0] sm:$0xff] %vm225_vm0, %v6518_v29  ;;  %v2700_v18 = vld [vmem:[#allocation3 + $0x2] sm:$0xff] }
 0x382   : > { %v4817_v25 = vpop.f32.mrb[26].mxu0  ;;  %v6546_v45 = vld [vmem:[#allocation3 + $0x22] sm:$0xff] }
 0x383   : > { %v2302_v46 = vadd.f32 %v4817_v25, %v6316_v1  ;;  %v2296_v35 = vpop.f32.mrb[27].mxu0  ;;  %v6550_v25 = vld [vmem:[#allocation3 + $0x1a] sm:$0xff] }
 0x384   : > { %v2297_v39 = vadd.f32 %v6316_v1, %v2296_v35 }
 0x385   : > { %v2352_v40 = vmax.f32 %v2302_v46, 0.0 }
 0x386   : > { %v2351_v54 = vmax.f32 %v2297_v39, 0.0  ;;  %v2535_v52 = vld [vmem:[#allocation3 + $0x141] sm:$0xff] }
 0x387   : > { %2439 = vst.msk [vmem:[#allocation3 + $0x159] sm:$0xff] %vm225_vm0, %v2352_v40  ;;  %2626 = vrot.lane.b32.xlu1 %v2535_v52, %s4948_s25  ;;  %v2534_v61 = vld [vmem:[#allocation3 + $0x139] sm:$0xff]  ;;  %v6568_v52 = vld [vmem:[#allocation3 + $0x4a] sm:$0xff] }
 0x388   : > { %v2471_v60 = vld [vmem:[#allocation3 + $0x140] sm:$0xff]  ;;  %2438 = vst.msk [vmem:[#allocation3 + $0x151] sm:$0xff] %vm225_vm0, %v2351_v54  ;;  %2624 = vrot.lane.b32.xlu0 %v2534_v61, %s4948_s25  ;;  %v2470_v0 = vld [vmem:[#allocation3 + $0x138] sm:$0xff] }
 0x389   : > { %2503 = vst.msk [vmem:[#allocation4 + $0xd8] sm:$0xff] %vm225_vm0, %v2471_v60  ;;  %2502 = vst.msk [vmem:[#allocation4 + $0xd0] sm:$0xff] %vm225_vm0, %v2470_v0  ;;  %v6555_v39 = vld [vmem:[#allocation3 + $0x3a] sm:$0xff]  ;;  %v6560_v40 = vld [vmem:[#allocation3 + $0x32] sm:$0xff] }
 0x38a   : > { %v4820_v62 = vpop.f32.mrb[28].mxu0  ;;  %v6564_v54 = vld [vmem:[#allocation3 + $0x52] sm:$0xff]  ;;  %v6573_v0 = vld [vmem:[#allocation3 + $0x6a] sm:$0xff] }
 0x38b   : > { %v2312_v2 = vadd.f32 %v4820_v62, %v6316_v1  ;;  %v2306_v7 = vpop.f32.mrb[29].mxu0  ;;  %v6578_v62 = vld [vmem:[#allocation3 + $0x62] sm:$0xff] }
 0x38c   : > { %v2307_v11 = vadd.f32 %v6316_v1, %v2306_v7  ;;  %v6586_v7 = vld [vmem:[#allocation3 + $0x7a] sm:$0xff] }
 0x38d   : > { %v2354_v41 = vmax.f32 %v2312_v2, 0.0  ;;  %v6582_v2 = vld [vmem:[#allocation3 + $0x82] sm:$0xff] }
 0x38e   : > { %v2353_v9 = vmax.f32 %v2307_v11, 0.0  ;;  %v2537_v42 = vld [vmem:[#allocation3 + $0x159] sm:$0xff] }
 0x38f   : > { %2441 = vst.msk [vmem:[#allocation3 + $0x171] sm:$0xff] %vm225_vm0, %v2354_v41  ;;  %2630 = vrot.lane.b32.xlu1 %v2537_v42, %s4948_s25  ;;  %v2536_v15 = vld [vmem:[#allocation3 + $0x151] sm:$0xff] }
 0x390   : > { %v2473_v43 = vld [vmem:[#allocation3 + $0x158] sm:$0xff]  ;;  %2440 = vst.msk [vmem:[#allocation3 + $0x169] sm:$0xff] %vm225_vm0, %v2353_v9  ;;  %2628 = vrot.lane.b32.xlu0 %v2536_v15, %s4948_s25  ;;  %v2472_v12 = vld [vmem:[#allocation3 + $0x150] sm:$0xff] }
 0x391   : > { %2505 = vst.msk [vmem:[#allocation4 + $0xe8] sm:$0xff] %vm225_vm0, %v2473_v43  ;;  %2504 = vst.msk [vmem:[#allocation4 + $0xe0] sm:$0xff] %vm225_vm0, %v2472_v12  ;;  %v6591_v9 = vld [vmem:[#allocation3 + $0x9a] sm:$0xff]  ;;  %v6596_v42 = vld [vmem:[#allocation3 + $0x92] sm:$0xff] }
 0x392   : > { %v6600_v15 = vld [vmem:[#allocation3 + $0xb2] sm:$0xff]  ;;  %v6604_v43 = vld [vmem:[#allocation3 + $0xaa] sm:$0xff] }
 0x396   : > { %v2539_v28 = vld [vmem:[#allocation3 + $0x171] sm:$0xff] }
 0x397   : > { %2634 = vrot.lane.b32.xlu1 %v2539_v28, %s4948_s25  ;;  %v2538_v63 = vld [vmem:[#allocation3 + $0x169] sm:$0xff] }
 0x398   : > { %v2475_v20 = vld [vmem:[#allocation3 + $0x170] sm:$0xff]  ;;  %2632 = vrot.lane.b32.xlu0 %v2538_v63, %s4948_s25  ;;  %v2474_v14 = vld [vmem:[#allocation3 + $0x168] sm:$0xff] }
 0x399   : > { %2507 = vst.msk [vmem:[#allocation4 + $0xf8] sm:$0xff] %vm225_vm0, %v2475_v20  ;;  %v2579_v31 = vpop.permute.xlu1 %2578  ;;  %2506 = vst.msk [vmem:[#allocation4 + $0xf0] sm:$0xff] %vm225_vm0, %v2474_v14  ;;  %v6609_v63 = vld [vmem:[#allocation3 + $0xca] sm:$0xff]  ;;  %v6614_v20 = vld [vmem:[#allocation3 + $0xc2] sm:$0xff] }
 0x39a   : > { %2671 = vst.msk [vmem:[#allocation4 + $0x18] sm:$0xff] %vm570_vm2, %v2579_v31  ;;  %v2577_v33 = vpop.permute.xlu0 %2576  ;;  %v6622_v14 = vld [vmem:[#allocation3 + $0xda] sm:$0xff] }
 0x39b   : > { %2670 = vst.msk [vmem:[#allocation4 + $0x10] sm:$0xff] %vm570_vm2, %v2577_v33  ;;  %2766 = vrot.lane.b32.xlu1 %v2701_v36, %s4949_s26  ;;  %v6618_v36 = vld [vmem:[#allocation3 + $0xe2] sm:$0xff]  ;;  %v2721_v33 = vld [vmem:[#allocation3 + $0xfa] sm:$0xff] }
 0x39c   : > { %2764 = vrot.lane.b32.xlu0 %v2700_v18, %s4949_s26 }
 0x39f   : > { %2770 = vrot.lane.b32.xlu1 %v6546_v45, %s4949_s26 }
 0x3a0   : > { %2768 = vrot.lane.b32.xlu0 %v6550_v25, %s4949_s26 }
 0x3a1   : > { %v2583_v46 = vpop.permute.xlu1 %2582 }
 0x3a2   : > { %2673 = vst.msk [vmem:[#allocation4 + $0x28] sm:$0xff] %vm570_vm2, %v2583_v46  ;;  %v2581_v35 = vpop.permute.xlu0 %2580  ;;  %v2720_v46 = vld [vmem:[#allocation3 + $0xf2] sm:$0xff] }
 0x3a3   : > { %2672 = vst.msk [vmem:[#allocation4 + $0x20] sm:$0xff] %vm570_vm2, %v2581_v35  ;;  %2774 = vrot.lane.b32.xlu1 %v6555_v39, %s4949_s26  ;;  %v2723_v35 = vld [vmem:[#allocation3 + $0x112] sm:$0xff] }
 0x3a4   : > { %2772 = vrot.lane.b32.xlu0 %v6560_v40, %s4949_s26 }
 0x3a7   : > { %2778 = vrot.lane.b32.xlu1 %v6564_v54, %s4949_s26 }
 0x3a8   : > { %2776 = vrot.lane.b32.xlu0 %v6568_v52, %s4949_s26 }
 0x3a9   : > { %v2587_v61 = vpop.permute.xlu1 %2586 }
 0x3aa   : > { %2675 = vst.msk [vmem:[#allocation4 + $0x38] sm:$0xff] %vm570_vm2, %v2587_v61  ;;  %v2585_v60 = vpop.permute.xlu0 %2584  ;;  %v2722_v61 = vld [vmem:[#allocation3 + $0x10a] sm:$0xff] }
 0x3ab   : > { %2674 = vst.msk [vmem:[#allocation4 + $0x30] sm:$0xff] %vm570_vm2, %v2585_v60  ;;  %2782 = vrot.lane.b32.xlu1 %v6573_v0, %s4949_s26 }
 0x3ac   : > { %2780 = vrot.lane.b32.xlu0 %v6578_v62, %s4949_s26 }
 0x3af   : > { %2786 = vrot.lane.b32.xlu1 %v6582_v2, %s4949_s26 }
 0x3b0   : > { %2784 = vrot.lane.b32.xlu0 %v6586_v7, %s4949_s26 }
 0x3b1   : > { %v2591_v11 = vpop.permute.xlu1 %2590 }
 0x3b2   : > { %2677 = vst.msk [vmem:[#allocation4 + $0x48] sm:$0xff] %vm570_vm2, %v2591_v11  ;;  %v2589_v41 = vpop.permute.xlu0 %2588 }
 0x3b3   : > { %2676 = vst.msk [vmem:[#allocation4 + $0x40] sm:$0xff] %vm570_vm2, %v2589_v41  ;;  %2790 = vrot.lane.b32.xlu1 %v6591_v9, %s4949_s26  ;;  %v2725_v41 = vld [vmem:[#allocation3 + $0x12a] sm:$0xff] }
 0x3b4   : > { %2788 = vrot.lane.b32.xlu0 %v6596_v42, %s4949_s26 }
 0x3b7   : > { %2794 = vrot.lane.b32.xlu1 %v6600_v15, %s4949_s26 }
 0x3b8   : > { %2792 = vrot.lane.b32.xlu0 %v6604_v43, %s4949_s26 }
 0x3b9   : > { %v2595_v12 = vpop.permute.xlu1 %2594 }
 0x3ba   : > { %2679 = vst.msk [vmem:[#allocation4 + $0x58] sm:$0xff] %vm570_vm2, %v2595_v12  ;;  %v2593_v28 = vpop.permute.xlu0 %2592  ;;  %v2724_v12 = vld [vmem:[#allocation3 + $0x122] sm:$0xff] }
 0x3bb   : > { %2678 = vst.msk [vmem:[#allocation4 + $0x50] sm:$0xff] %vm570_vm2, %v2593_v28  ;;  %2798 = vrot.lane.b32.xlu1 %v6609_v63, %s4949_s26  ;;  %v2727_v28 = vld [vmem:[#allocation3 + $0x142] sm:$0xff] }
 0x3bc   : > { %2796 = vrot.lane.b32.xlu0 %v6614_v20, %s4949_s26 }
 0x3bf   : > { %2802 = vrot.lane.b32.xlu1 %v6618_v36, %s4949_s26 }
 0x3c0   : > { %2800 = vrot.lane.b32.xlu0 %v6622_v14, %s4949_s26 }
 0x3c1   : > { %v2599_v31 = vpop.permute.xlu1 %2598 }
 0x3c2   : > { %2681 = vst.msk [vmem:[#allocation4 + $0x68] sm:$0xff] %vm570_vm2, %v2599_v31  ;;  %v2597_v18 = vpop.permute.xlu0 %2596  ;;  %v2726_v31 = vld [vmem:[#allocation3 + $0x13a] sm:$0xff] }
 0x3c3   : > { %2680 = vst.msk [vmem:[#allocation4 + $0x60] sm:$0xff] %vm570_vm2, %v2597_v18  ;;  %2806 = vrot.lane.b32.xlu1 %v2721_v33, %s4949_s26 }
 0x3c4   : > { %2804 = vrot.lane.b32.xlu0 %v2720_v46, %s4949_s26  ;;  %v2729_v46 = vld [vmem:[#allocation3 + $0x15a] sm:$0xff] }
 0x3c7   : > { %2810 = vrot.lane.b32.xlu1 %v2723_v35, %s4949_s26  ;;  %v2728_v35 = vld [vmem:[#allocation3 + $0x152] sm:$0xff] }
 0x3c8   : > { %2808 = vrot.lane.b32.xlu0 %v2722_v61, %s4949_s26  ;;  %v2731_v61 = vld [vmem:[#allocation3 + $0x172] sm:$0xff] }
 0x3c9   : > { %v2603_v60 = vpop.permute.xlu1 %2602 }
 0x3ca   : > { %2683 = vst.msk [vmem:[#allocation4 + $0x78] sm:$0xff] %vm570_vm2, %v2603_v60  ;;  %v2601_v11 = vpop.permute.xlu0 %2600  ;;  %v2730_v60 = vld [vmem:[#allocation3 + $0x16a] sm:$0xff] }
 0x3cb   : > { %2682 = vst.msk [vmem:[#allocation4 + $0x70] sm:$0xff] %vm570_vm2, %v2601_v11  ;;  %2814 = vrot.lane.b32.xlu1 %v2725_v41, %s4949_s26 }
 0x3cc   : > { %2812 = vrot.lane.b32.xlu0 %v2724_v12, %s4949_s26 }
 0x3cf   : > { %2818 = vrot.lane.b32.xlu1 %v2727_v28, %s4949_s26 }
 0x3d0   : > { %2816 = vrot.lane.b32.xlu0 %v2726_v31, %s4949_s26 }
 0x3d1   : > { %v2607_v18 = vpop.permute.xlu1 %2606 }
 0x3d2   : > { %2685 = vst.msk [vmem:[#allocation4 + $0x88] sm:$0xff] %vm570_vm2, %v2607_v18  ;;  %v2605_v33 = vpop.permute.xlu0 %2604 }
 0x3d3   : > { %2684 = vst.msk [vmem:[#allocation4 + $0x80] sm:$0xff] %vm570_vm2, %v2605_v33  ;;  %2822 = vrot.lane.b32.xlu1 %v2729_v46, %s4949_s26 }
 0x3d4   : > { %2820 = vrot.lane.b32.xlu0 %v2728_v35, %s4949_s26  ;;  %v4077_v35 = vld [vmem:[%s7380_s3] sm:$0xff] }
 0x3d7   : > { %2826 = vrot.lane.b32.xlu1 %v2731_v61, %s4949_s26  ;;  %v4078_v61 = vld [vmem:[%s7380_s3 + $0x8] sm:$0xff] }
 0x3d8   : > { %2824 = vrot.lane.b32.xlu0 %v2730_v60, %s4949_s26  ;;  %v4906_v60 = vpack.c.bf16 %v4078_v61, %v4077_v35 }
 0x3d9   : > { %v2611_v11 = vpop.permute.xlu1 %2610 }
 0x3da   : > { %2687 = vst.msk [vmem:[#allocation4 + $0x98] sm:$0xff] %vm570_vm2, %v2611_v11  ;;  %v2609_v41 = vpop.permute.xlu0 %2608  ;;  %4907 = vmatprep.subr.bf16.mxu1 %v4906_v60  ;;  %v4079_v11 = vld [vmem:[%s7380_s3 + $0x10] sm:$0xff] }
 0x3db   : > { %2686 = vst.msk [vmem:[#allocation4 + $0x90] sm:$0xff] %vm570_vm2, %v2609_v41  ;;  %2958 = vrot.lane.b32.xlu1 %v6333_v50, %s4950_s27  ;;  %4909 = vmatpush3.bf16.msra.mxu1 %v4906_v60  ;;  %v4080_v41 = vld [vmem:[%s7380_s3 + $0x18] sm:$0xff] }
 0x3dc   : > { %2956 = vrot.lane.b32.xlu0 %v6335_v16, %s4950_s27 }
 0x3df   : > { %2962 = vrot.lane.b32.xlu1 %v6353_v13, %s4950_s27 }
 0x3e0   : > { %2960 = vrot.lane.b32.xlu0 %v6355_v27, %s4950_s27 }
 0x3e1   : > { %v2615_v12 = vpop.permute.xlu1 %2614 }
 0x3e2   : > { %2689 = vst.msk [vmem:[#allocation4 + $0xa8] sm:$0xff] %vm570_vm2, %v2615_v12  ;;  %v2613_v28 = vpop.permute.xlu0 %2612  ;;  %v4910_v12 = vpack.c.bf16 %v4080_v41, %v4079_v11 }
 0x3e3   : > { %2688 = vst.msk [vmem:[#allocation4 + $0xa0] sm:$0xff] %vm570_vm2, %v2613_v28  ;;  %2966 = vrot.lane.b32.xlu1 %v6373_v22, %s4950_s27 }
 0x3e4   : > { %2964 = vrot.lane.b32.xlu0 %v6380_v49, %s4950_s27  ;;  %4911 = vmatprep.subr.bf16.mxu1 %v4910_v12 }
 0x3e5   : > { %4913 = vmatpush3.bf16.msra.mxu1 %v4910_v12 }
 0x3e7   : > { %2970 = vrot.lane.b32.xlu1 %v6393_v32, %s4950_s27 }
 0x3e8   : > { %2968 = vrot.lane.b32.xlu0 %v6400_v38, %s4950_s27 }
 0x3e9   : > { %v2619_v50 = vpop.permute.xlu1 %2618 }
 0x3ea   : > { %2691 = vst.msk [vmem:[#allocation4 + $0xb8] sm:$0xff] %vm570_vm2, %v2619_v50  ;;  %v2617_v16 = vpop.permute.xlu0 %2616  ;;  %v4081_v50 = vld [vmem:[%s7380_s3 + $0x20] sm:$0xff] }
 0x3eb   : > { %2690 = vst.msk [vmem:[#allocation4 + $0xb0] sm:$0xff] %vm570_vm2, %v2617_v16  ;;  %2974 = vrot.lane.b32.xlu1 %v6413_v59, %s4950_s27  ;;  %v4082_v16 = vld [vmem:[%s7380_s3 + $0x28] sm:$0xff] }
 0x3ec   : > { %2972 = vrot.lane.b32.xlu0 %v6420_v58, %s4950_s27 }
 0x3ef   : > { %2978 = vrot.lane.b32.xlu1 %v6430_v5, %s4950_s27 }
 0x3f0   : > { %2976 = vrot.lane.b32.xlu0 %v6437_v8, %s4950_s27 }
 0x3f1   : > { %v2623_v31 = vpop.permute.xlu1 %2622 }
 0x3f2   : > { %2693 = vst.msk [vmem:[#allocation4 + $0xc8] sm:$0xff] %vm570_vm2, %v2623_v31  ;;  %v2621_v18 = vpop.permute.xlu0 %2620  ;;  %v4084_v31 = vld [vmem:[%s7380_s3 + $0x38] sm:$0xff] }
 0x3f3   : > { %2692 = vst.msk [vmem:[#allocation4 + $0xc0] sm:$0xff] %vm570_vm2, %v2621_v18  ;;  %2982 = vrot.lane.b32.xlu1 %v6445_v44, %s4950_s27 }
 0x3f4   : > { %2980 = vrot.lane.b32.xlu0 %v6451_v53, %s4950_s27 }
 0x3f7   : > { %2986 = vrot.lane.b32.xlu1 %v6459_v17, %s4950_s27 }
 0x3f8   : > { %2984 = vrot.lane.b32.xlu0 %v6465_v24, %s4950_s27 }
 0x3f9   : > { %v2627_v33 = vpop.permute.xlu1 %2626 }
 0x3fa   : > { %2695 = vst.msk [vmem:[#allocation4 + $0xd8] sm:$0xff] %vm570_vm2, %v2627_v33  ;;  %v2625_v46 = vpop.permute.xlu0 %2624  ;;  %v4085_v33 = vld [vmem:[%s7380_s3 + $0x40] sm:$0xff] }
 0x3fb   : > { %2694 = vst.msk [vmem:[#allocation4 + $0xd0] sm:$0xff] %vm570_vm2, %v2625_v46  ;;  %3148 = vrot.lane.b32.xlu1 %v6331_v47, %s4951_s28 }
 0x3fc   : > { %2988 = vrot.lane.b32.xlu0 %v6479_v51, %s4950_s27 }
 0x3ff   : > { %3340 = vrot.lane.b32.xlu1 %v6550_v25, %s4952_s29  ;;  %v4083_v25 = vld [vmem:[%s7380_s3 + $0x30] sm:$0xff] }
 0x400   : > { %3150 = vrot.lane.b32.xlu0 %v6326_v19, %s4951_s28  ;;  %v4914_v19 = vpack.c.bf16 %v4082_v16, %v4081_v50  ;;  %v4918_v18 = vpack.c.bf16 %v4084_v31, %v4083_v25 }
 0x401   : > { %v2631_v47 = vpop.permute.xlu1 %2630 }
 0x402   : > { %2697 = vst.msk [vmem:[#allocation4 + $0xe8] sm:$0xff] %vm570_vm2, %v2631_v47  ;;  %v2629_v28 = vpop.permute.xlu0 %2628  ;;  %4915 = vmatprep.subr.bf16.mxu1 %v4914_v19  ;;  %v4823_v47 = vpop.f32.mrb[30].mxu0 }
 0x403   : > { %2696 = vst.msk [vmem:[#allocation4 + $0xe0] sm:$0xff] %vm570_vm2, %v2629_v28  ;;  %3533 = vrot.lane.b32.xlu1 %v6355_v27, %s4953_s30  ;;  %4917 = vmatpush3.bf16.msra.mxu1 %v4914_v19  ;;  %v2316_v28 = vpop.f32.mrb[31].mxu0 }
 0x404   : > { %3342 = vrot.lane.b32.xlu0 %v6546_v45, %s4952_s29  ;;  %4919 = vmatprep.subr.bf16.mxu1 %v4918_v18 }
 0x407   : > { %3725 = vrot.lane.b32.xlu1 %v6351_v10, %s4954_s7  ;;  %4921 = vmatpush3.bf16.msra.mxu1 %v4918_v18 }
 0x408   : > { %3535 = vrot.lane.b32.xlu0 %v6353_v13, %s4953_s30  ;;  %4840 = vmatprep.subr.mxu1 %v4085_v33 }
 0x409   : > { %v2635_v27 = vpop.permute.xlu1 %2634 }
 0x40a   : > { %2699 = vst.msk [vmem:[#allocation4 + $0xf8] sm:$0xff] %vm570_vm2, %v2635_v27  ;;  %v2633_v45 = vpop.permute.xlu0 %2632 }
 0x40b   : > { %2698 = vst.msk [vmem:[#allocation4 + $0xf0] sm:$0xff] %vm570_vm2, %v2633_v45  ;;  %3727 = vrot.lane.b32.xlu1 %v6346_v26, %s4954_s7  ;;  %4841 = vmatpush3.msra.mxu1 %v4085_v33 }
 0x40c   : > { %3152 = vrot.lane.b32.xlu0 %v6351_v10, %s4951_s28 }
 0x40d   : > { %v2767_v13 = vpop.permute.xlu1 %2766 }
 0x40e   : > { %2861 = vst.msk [vmem:[#allocation4 + $0x8] sm:$0xff] %vm763_vm3, %v2767_v13  ;;  %v2765_v46 = vpop.permute.xlu0 %2764 }
 0x40f   : > { %2860 = vst.msk [vmem:[#allocation4] sm:$0xff] %vm763_vm3, %v2765_v46  ;;  %3154 = vrot.lane.b32.xlu1 %v6346_v26, %s4951_s28 }
 0x410   : > { %3917 = vrot.lane.b32.xlu0 %v6560_v40, %s4955_s10 }
 0x411   : > { %v2771_v35 = vpop.permute.xlu1 %2770 }
 0x412   : > { %2863 = vst.msk [vmem:[#allocation4 + $0x18] sm:$0xff] %vm763_vm3, %v2771_v35  ;;  %v2769_v61 = vpop.permute.xlu0 %2768 }
 0x413   : > { %2862 = vst.msk [vmem:[#allocation4 + $0x10] sm:$0xff] %vm763_vm3, %v2769_v61  ;;  %3919 = vrot.lane.b32.xlu1 %v6555_v39, %s4955_s10 }
 0x414   : > { %3344 = vrot.lane.b32.xlu0 %v6560_v40, %s4952_s29 }
 0x415   : > { %v2775_v10 = vpop.permute.xlu1 %2774 }
 0x416   : > { %2865 = vst.msk [vmem:[#allocation4 + $0x28] sm:$0xff] %vm763_vm3, %v2775_v10  ;;  %v2773_v60 = vpop.permute.xlu0 %2772 }
 0x417   : > { %2864 = vst.msk [vmem:[#allocation4 + $0x20] sm:$0xff] %vm763_vm3, %v2773_v60  ;;  %3537 = vrot.lane.b32.xlu1 %v6380_v49, %s4953_s30 }
 0x418   : > { %3346 = vrot.lane.b32.xlu0 %v6555_v39, %s4952_s29 }
 0x419   : > { %v2779_v26 = vpop.permute.xlu1 %2778 }
 0x41a   : > { %2867 = vst.msk [vmem:[#allocation4 + $0x38] sm:$0xff] %vm763_vm3, %v2779_v26  ;;  %v2777_v11 = vpop.permute.xlu0 %2776 }
 0x41b   : > { %2866 = vst.msk [vmem:[#allocation4 + $0x30] sm:$0xff] %vm763_vm3, %v2777_v11  ;;  %3729 = vrot.lane.b32.xlu1 %v6371_v48, %s4954_s7 }
 0x41c   : > { %3539 = vrot.lane.b32.xlu0 %v6373_v22, %s4953_s30 }
 0x41d   : > { %v2783_v40 = vpop.permute.xlu1 %2782 }
 0x41e   : > { %2869 = vst.msk [vmem:[#allocation4 + $0x48] sm:$0xff] %vm763_vm3, %v2783_v40  ;;  %v2781_v41 = vpop.permute.xlu0 %2780 }
 0x41f   : > { %2868 = vst.msk [vmem:[#allocation4 + $0x40] sm:$0xff] %vm763_vm3, %v2781_v41  ;;  %3731 = vrot.lane.b32.xlu1 %v6366_v21, %s4954_s7 }
 0x420   : > { %3156 = vrot.lane.b32.xlu0 %v6371_v48, %s4951_s28  ;;  %v2322_v48 = vadd.f32 %v4823_v47, %v6316_v1 }
 0x421   : > { %v2787_v49 = vpop.permute.xlu1 %2786 }
 0x422   : > { %2871 = vst.msk [vmem:[#allocation4 + $0x58] sm:$0xff] %vm763_vm3, %v2787_v49  ;;  %v2785_v39 = vpop.permute.xlu0 %2784  ;;  %v2356_v16 = vmax.f32 %v2322_v48, 0.0 }
 0x423   : > { %2870 = vst.msk [vmem:[#allocation4 + $0x50] sm:$0xff] %vm763_vm3, %v2785_v39  ;;  %3158 = vrot.lane.b32.xlu1 %v6366_v21, %s4951_s28  ;;  %v2317_v21 = vadd.f32 %v6316_v1, %v2316_v28  ;;  %v3671_v39 = vld [vmem:[#allocation3 + $0xa9] sm:$0xff] }
 0x424   : > { %3921 = vrot.lane.b32.xlu0 %v6568_v52, %s4955_s10  ;;  %2443 = vst.msk [vmem:[#allocation3 + $0x189] sm:$0xff] %vm225_vm0, %v2356_v16  ;;  %v3673_v16 = vld [vmem:[#allocation3 + $0xc1] sm:$0xff] }
 0x425   : > { %v2791_v22 = vpop.permute.xlu1 %2790  ;;  %v2355_v25 = vmax.f32 %v2317_v21, 0.0 }
 0x426   : > { %2873 = vst.msk [vmem:[#allocation4 + $0x68] sm:$0xff] %vm763_vm3, %v2791_v22  ;;  %v2789_v12 = vpop.permute.xlu0 %2788 }
 0x427   : > { %2872 = vst.msk [vmem:[#allocation4 + $0x60] sm:$0xff] %vm763_vm3, %v2789_v12  ;;  %3923 = vrot.lane.b32.xlu1 %v6564_v54, %s4955_s10 }
 0x428   : > { %3348 = vrot.lane.b32.xlu0 %v6568_v52, %s4952_s29  ;;  %2442 = vst.msk [vmem:[#allocation3 + $0x181] sm:$0xff] %vm225_vm0, %v2355_v25 }
 0x429   : > { %v2795_v50 = vpop.permute.xlu1 %2794 }
 0x42a   : > { %2875 = vst.msk [vmem:[#allocation4 + $0x78] sm:$0xff] %vm763_vm3, %v2795_v50  ;;  %v2793_v19 = vpop.permute.xlu0 %2792 }
 0x42b   : > { %2874 = vst.msk [vmem:[#allocation4 + $0x70] sm:$0xff] %vm763_vm3, %v2793_v19  ;;  %3541 = vrot.lane.b32.xlu1 %v6400_v38, %s4953_s30 }
 0x42c   : > { %3350 = vrot.lane.b32.xlu0 %v6564_v54, %s4952_s29 }
 0x42d   : > { %v2799_v52 = vpop.permute.xlu1 %2798 }
 0x42e   : > { %2877 = vst.msk [vmem:[#allocation4 + $0x88] sm:$0xff] %vm763_vm3, %v2799_v52  ;;  %v2797_v1 = vpop.permute.xlu0 %2796 }
 0x42f   : > { %2876 = vst.msk [vmem:[#allocation4 + $0x80] sm:$0xff] %vm763_vm3, %v2797_v1  ;;  %3733 = vrot.lane.b32.xlu1 %v6391_v34, %s4954_s7 }
 0x430   : > { %3543 = vrot.lane.b32.xlu0 %v6393_v32, %s4953_s30 }
 0x431   : > { %v2803_v38 = vpop.permute.xlu1 %2802 }
 0x432   : > { %2879 = vst.msk [vmem:[#allocation4 + $0x98] sm:$0xff] %vm763_vm3, %v2803_v38  ;;  %v2801_v31 = vpop.permute.xlu0 %2800 }
 0x433   : > { %2878 = vst.msk [vmem:[#allocation4 + $0x90] sm:$0xff] %vm763_vm3, %v2801_v31  ;;  %3735 = vrot.lane.b32.xlu1 %v6386_v30, %s4954_s7 }
 0x434   : > { %3160 = vrot.lane.b32.xlu0 %v6391_v34, %s4951_s28 }
 0x435   : > { %v2807_v54 = vpop.permute.xlu1 %2806 }
 0x436   : > { %2881 = vst.msk [vmem:[#allocation4 + $0xa8] sm:$0xff] %vm763_vm3, %v2807_v54  ;;  %v2805_v18 = vpop.permute.xlu0 %2804 }
 0x437   : > { %2880 = vst.msk [vmem:[#allocation4 + $0xa0] sm:$0xff] %vm763_vm3, %v2805_v18  ;;  %3162 = vrot.lane.b32.xlu1 %v6386_v30, %s4951_s28 }
 0x438   : > { %3925 = vrot.lane.b32.xlu0 %v6578_v62, %s4955_s10 }
 0x439   : > { %v2811_v32 = vpop.permute.xlu1 %2810 }
 0x43a   : > { %2883 = vst.msk [vmem:[#allocation4 + $0xb8] sm:$0xff] %vm763_vm3, %v2811_v32  ;;  %v2809_v27 = vpop.permute.xlu0 %2808 }
 0x43b   : > { %2882 = vst.msk [vmem:[#allocation4 + $0xb0] sm:$0xff] %vm763_vm3, %v2809_v27  ;;  %3927 = vrot.lane.b32.xlu1 %v6573_v0, %s4955_s10 }
 0x43c   : > { %3352 = vrot.lane.b32.xlu0 %v6578_v62, %s4952_s29 }
 0x43d   : > { %v2815_v34 = vpop.permute.xlu1 %2814 }
 0x43e   : > { %2885 = vst.msk [vmem:[#allocation4 + $0xc8] sm:$0xff] %vm763_vm3, %v2815_v34  ;;  %v2813_v45 = vpop.permute.xlu0 %2812 }
 0x43f   : > { %2884 = vst.msk [vmem:[#allocation4 + $0xc0] sm:$0xff] %vm763_vm3, %v2813_v45  ;;  %3545 = vrot.lane.b32.xlu1 %v6420_v58, %s4953_s30  ;;  %v3676_v45 = vld [vmem:[#allocation3 + $0xe1] sm:$0xff] }
 0x440   : > { %3354 = vrot.lane.b32.xlu0 %v6573_v0, %s4952_s29 }
 0x441   : > { %v2819_v30 = vpop.permute.xlu1 %2818 }
 0x442   : > { %2887 = vst.msk [vmem:[#allocation4 + $0xd8] sm:$0xff] %vm763_vm3, %v2819_v30  ;;  %v2817_v33 = vpop.permute.xlu0 %2816 }
 0x443   : > { %2886 = vst.msk [vmem:[#allocation4 + $0xd0] sm:$0xff] %vm763_vm3, %v2817_v33  ;;  %3737 = vrot.lane.b32.xlu1 %v6411_v55, %s4954_s7 }
 0x444   : > { %3547 = vrot.lane.b32.xlu0 %v6413_v59, %s4953_s30 }
 0x445   : > { %v2823_v62 = vpop.permute.xlu1 %2822 }
 0x446   : > { %2889 = vst.msk [vmem:[#allocation4 + $0xe8] sm:$0xff] %vm763_vm3, %v2823_v62  ;;  %v2821_v13 = vpop.permute.xlu0 %2820 }
 0x447   : > { %2888 = vst.msk [vmem:[#allocation4 + $0xe0] sm:$0xff] %vm763_vm3, %v2821_v13  ;;  %3739 = vrot.lane.b32.xlu1 %v6406_v57, %s4954_s7 }
 0x448   : > { %3164 = vrot.lane.b32.xlu0 %v6411_v55, %s4951_s28 }
 0x449   : > { %v2827_v58 = vpop.permute.xlu1 %2826 }
 0x44a   : > { %2891 = vst.msk [vmem:[#allocation4 + $0xf8] sm:$0xff] %vm763_vm3, %v2827_v58  ;;  %v2825_v0 = vpop.permute.xlu0 %2824 }
 0x44b   : > { %2890 = vst.msk [vmem:[#allocation4 + $0xf0] sm:$0xff] %vm763_vm3, %v2825_v0  ;;  %3166 = vrot.lane.b32.xlu1 %v6406_v57, %s4951_s28 }
 0x44c   : > { %3929 = vrot.lane.b32.xlu0 %v6586_v7, %s4955_s10 }
 0x44d   : > { %v2959_v59 = vpop.permute.xlu1 %2958 }
 0x44e   : > { %3053 = vst.msk [vmem:[#allocation4 + $0x8] sm:$0xff] %vm956_vm4, %v2959_v59  ;;  %v2957_v46 = vpop.permute.xlu0 %2956 }
 0x44f   : > { %3052 = vst.msk [vmem:[#allocation4] sm:$0xff] %vm956_vm4, %v2957_v46  ;;  %3931 = vrot.lane.b32.xlu1 %v6582_v2, %s4955_s10 }
 0x450   : > { %3356 = vrot.lane.b32.xlu0 %v6586_v7, %s4952_s29 }
 0x451   : > { %v2963_v55 = vpop.permute.xlu1 %2962 }
 0x452   : > { %3055 = vst.msk [vmem:[#allocation4 + $0x18] sm:$0xff] %vm956_vm4, %v2963_v55  ;;  %v2961_v35 = vpop.permute.xlu0 %2960  ;;  %v3677_v55 = vld [vmem:[#allocation3 + $0xf1] sm:$0xff] }
 0x453   : > { %3054 = vst.msk [vmem:[#allocation4 + $0x10] sm:$0xff] %vm956_vm4, %v2961_v35  ;;  %3549 = vrot.lane.b32.xlu1 %v6437_v8, %s4953_s30  ;;  %v3670_v8 = vld [vmem:[#allocation3 + $0x99] sm:$0xff] }
 0x454   : > { %3358 = vrot.lane.b32.xlu0 %v6582_v2, %s4952_s29  ;;  %v3094_v2 = vld [vmem:[#allocation3 + $0x91] sm:$0xff] }
 0x455   : > { %v2967_v57 = vpop.permute.xlu1 %2966 }
 0x456   : > { %3057 = vst.msk [vmem:[#allocation4 + $0x28] sm:$0xff] %vm956_vm4, %v2967_v57  ;;  %v2965_v61 = vpop.permute.xlu0 %2964 }
 0x457   : > { %3056 = vst.msk [vmem:[#allocation4 + $0x20] sm:$0xff] %vm956_vm4, %v2965_v61  ;;  %3741 = vrot.lane.b32.xlu1 %v6428_v6, %s4954_s7  ;;  %v3869_v61 = vld [vmem:[#allocation3 + $0xf2] sm:$0xff] }
 0x458   : > { %3551 = vrot.lane.b32.xlu0 %v6430_v5, %s4953_s30 }
 0x459   : > { %v2971_v7 = vpop.permute.xlu1 %2970 }
 0x45a   : > { %3059 = vst.msk [vmem:[#allocation4 + $0x38] sm:$0xff] %vm956_vm4, %v2971_v7  ;;  %v2969_v10 = vpop.permute.xlu0 %2968 }
 0x45b   : > { %3058 = vst.msk [vmem:[#allocation4 + $0x30] sm:$0xff] %vm956_vm4, %v2969_v10  ;;  %3743 = vrot.lane.b32.xlu1 %v3670_v8, %s4954_s7  ;;  %v3678_v10 = vld [vmem:[#allocation3 + $0xf9] sm:$0xff] }
 0x45c   : > { %3168 = vrot.lane.b32.xlu0 %v3094_v2, %s4951_s28 }
 0x45d   : > { %v2975_v60 = vpop.permute.xlu1 %2974 }
 0x45e   : > { %3061 = vst.msk [vmem:[#allocation4 + $0x48] sm:$0xff] %vm956_vm4, %v2975_v60  ;;  %v2973_v26 = vpop.permute.xlu0 %2972 }
 0x45f   : > { %3060 = vst.msk [vmem:[#allocation4 + $0x40] sm:$0xff] %vm956_vm4, %v2973_v26  ;;  %3170 = vrot.lane.b32.xlu1 %v3670_v8, %s4951_s28 }
 0x460   : > { %3933 = vrot.lane.b32.xlu0 %v6596_v42, %s4955_s10 }
 0x461   : > { %v2979_v6 = vpop.permute.xlu1 %2978 }
 0x462   : > { %3063 = vst.msk [vmem:[#allocation4 + $0x58] sm:$0xff] %vm956_vm4, %v2979_v6  ;;  %v2977_v5 = vpop.permute.xlu0 %2976  ;;  %v3295_v6 = vld [vmem:[#allocation3 + $0xfa] sm:$0xff] }
 0x463   : > { %3062 = vst.msk [vmem:[#allocation4 + $0x50] sm:$0xff] %vm956_vm4, %v2977_v5  ;;  %3935 = vrot.lane.b32.xlu1 %v6591_v9, %s4955_s10 }
 0x464   : > { %3360 = vrot.lane.b32.xlu0 %v6596_v42, %s4952_s29 }
 0x465   : > { %v2983_v11 = vpop.permute.xlu1 %2982 }
 0x466   : > { %3065 = vst.msk [vmem:[#allocation4 + $0x68] sm:$0xff] %vm956_vm4, %v2983_v11  ;;  %v2981_v40 = vpop.permute.xlu0 %2980 }
 0x467   : > { %3064 = vst.msk [vmem:[#allocation4 + $0x60] sm:$0xff] %vm956_vm4, %v2981_v40  ;;  %3553 = vrot.lane.b32.xlu1 %v6451_v53, %s4953_s30  ;;  %v3672_v53 = vld [vmem:[#allocation3 + $0xb1] sm:$0xff] }
 0x468   : > { %3362 = vrot.lane.b32.xlu0 %v6591_v9, %s4952_s29 }
 0x469   : > { %v2987_v41 = vpop.permute.xlu1 %2986 }
 0x46a   : > { %3067 = vst.msk [vmem:[#allocation4 + $0x78] sm:$0xff] %vm956_vm4, %v2987_v41  ;;  %v2985_v49 = vpop.permute.xlu0 %2984 }
 0x46b   : > { %3066 = vst.msk [vmem:[#allocation4 + $0x70] sm:$0xff] %vm956_vm4, %v2985_v49  ;;  %3745 = vrot.lane.b32.xlu1 %v3671_v39, %s4954_s7  ;;  %v3679_v49 = vld [vmem:[#allocation3 + $0x109] sm:$0xff] }
 0x46c   : > { %3555 = vrot.lane.b32.xlu0 %v6445_v44, %s4953_s30 }
 0x46d   : > { %v3149_v42 = vpop.permute.xlu1 %3148 }
 0x46e   : > { %3244 = vst.msk [vmem:[#allocation4] sm:$0xff] %vm1149_vm5, %v3149_v42  ;;  %v2989_v22 = vpop.permute.xlu0 %2988 }
 0x46f   : > { %3068 = vst.msk [vmem:[#allocation4 + $0x80] sm:$0xff] %vm956_vm4, %v2989_v22  ;;  %3747 = vrot.lane.b32.xlu1 %v3672_v53, %s4954_s7 }
 0x470   : > { %3172 = vrot.lane.b32.xlu0 %v3671_v39, %s4951_s28 }
 0x471   : > { %v3341_v9 = vpop.permute.xlu1 %3340 }
 0x472   : > { %3436 = vst.msk [vmem:[#allocation4] sm:$0xff] %vm1342_vm6, %v3341_v9  ;;  %v3151_v12 = vpop.permute.xlu0 %3150 }
 0x473   : > { %3245 = vst.msk [vmem:[#allocation4 + $0x8] sm:$0xff] %vm1149_vm5, %v3151_v12  ;;  %3174 = vrot.lane.b32.xlu1 %v3672_v53, %s4951_s28  ;;  %v3871_v12 = vld [vmem:[#allocation3 + $0x10a] sm:$0xff] }
 0x474   : > { %3937 = vrot.lane.b32.xlu0 %v6604_v43, %s4955_s10 }
 0x475   : > { %v3534_v44 = vpop.permute.xlu1 %3533 }
 0x476   : > { %3629 = vst.msk [vmem:[#allocation4] sm:$0xff] %vm1536_vm7, %v3534_v44  ;;  %v3343_v47 = vpop.permute.xlu0 %3342  ;;  %v3680_v44 = vld [vmem:[#allocation3 + $0x111] sm:$0xff] }
 0x477   : > { %3437 = vst.msk [vmem:[#allocation4 + $0x8] sm:$0xff] %vm1342_vm6, %v3343_v47  ;;  %3939 = vrot.lane.b32.xlu1 %v6600_v15, %s4955_s10 }
 0x478   : > { %3364 = vrot.lane.b32.xlu0 %v6604_v43, %s4952_s29 }
 0x479   : > { %v3726_v48 = vpop.permute.xlu1 %3725 }
 0x47a   : > { %3821 = vst.msk [vmem:[#allocation4] sm:$0xff] %vm1729_vm8, %v3726_v48  ;;  %v3536_v28 = vpop.permute.xlu0 %3535 }
 0x47b   : > { %3630 = vst.msk [vmem:[#allocation4 + $0x8] sm:$0xff] %vm1536_vm7, %v3536_v28  ;;  %3557 = vrot.lane.b32.xlu1 %v6465_v24, %s4953_s30  ;;  %v3674_v24 = vld [vmem:[#allocation3 + $0xc9] sm:$0xff] }
 0x47c   : > { %3366 = vrot.lane.b32.xlu0 %v6600_v15, %s4952_s29 }
 0x47d   : > { %v3728_v21 = vpop.permute.xlu1 %3727 }
 0x47e   : > { %3822 = vst.msk [vmem:[#allocation4 + $0x8] sm:$0xff] %vm1729_vm8, %v3728_v21  ;;  %v3153_v50 = vpop.permute.xlu0 %3152  ;;  %v3297_v21 = vld [vmem:[#allocation3 + $0x112] sm:$0xff] }
 0x47f   : > { %3246 = vst.msk [vmem:[#allocation4 + $0x10] sm:$0xff] %vm1149_vm5, %v3153_v50  ;;  %3749 = vrot.lane.b32.xlu1 %v3673_v16, %s4954_s7 }
 0x480   : > { %3559 = vrot.lane.b32.xlu0 %v6459_v17, %s4953_s30 }
 0x481   : > { %v3155_v43 = vpop.permute.xlu1 %3154 }
 0x482   : > { %3247 = vst.msk [vmem:[#allocation4 + $0x18] sm:$0xff] %vm1149_vm5, %v3155_v43  ;;  %v3918_v19 = vpop.permute.xlu0 %3917 }
 0x483   : > { %4013 = vst.msk [vmem:[#allocation4] sm:$0xff] %vm1922_vm9, %v3918_v19  ;;  %3751 = vrot.lane.b32.xlu1 %v3674_v24, %s4954_s7 }
 0x484   : > { %3176 = vrot.lane.b32.xlu0 %v3673_v16, %s4951_s28 }
 0x485   : > { %v3920_v15 = vpop.permute.xlu1 %3919 }
 0x486   : > { %4014 = vst.msk [vmem:[#allocation4 + $0x8] sm:$0xff] %vm1922_vm9, %v3920_v15  ;;  %v3345_v25 = vpop.permute.xlu0 %3344 }
 0x487   : > { %3438 = vst.msk [vmem:[#allocation4 + $0x10] sm:$0xff] %vm1342_vm6, %v3345_v25  ;;  %3178 = vrot.lane.b32.xlu1 %v3674_v24, %s4951_s28  ;;  %v3681_v24 = vld [vmem:[#allocation3 + $0x121] sm:$0xff] }
 0x488   : > { %3941 = vrot.lane.b32.xlu0 %v6614_v20, %s4955_s10  ;;  %v3490_v25 = vld [vmem:[#allocation3 + $0x128] sm:$0xff] }
 0x489   : > { %v3538_v17 = vpop.permute.xlu1 %3537 }
 0x48a   : > { %3631 = vst.msk [vmem:[#allocation4 + $0x10] sm:$0xff] %vm1536_vm7, %v3538_v17  ;;  %v3347_v52 = vpop.permute.xlu0 %3346  ;;  %v4045_v1 = vld [vmem:[#allocation4] sm:$0xff] }
 0x48b   : > { %3439 = vst.msk [vmem:[#allocation4 + $0x18] sm:$0xff] %vm1342_vm6, %v3347_v52  ;;  %3943 = vrot.lane.b32.xlu1 %v6609_v63, %s4955_s10  ;;  %4842 = vmatprep.mubr.msk.f32.mxu1 %vm2003_vm10, %v4045_v1 }
 0x48c   : > { %3368 = vrot.lane.b32.xlu0 %v6614_v20, %s4952_s29  ;;  %v3675_v20 = vld [vmem:[#allocation3 + $0xd9] sm:$0xff] }
 0x48d   : > { %v3730_v38 = vpop.permute.xlu1 %3729  ;;  %v4046_v31 = vld [vmem:[#allocation4 + $0x8] sm:$0xff] }
 0x48e   : > { %3823 = vst.msk [vmem:[#allocation4 + $0x10] sm:$0xff] %vm1729_vm8, %v3730_v38  ;;  %4843 = vmatmul.mubr.msk.f32.vlgmr.msra.gmra.mrb[0].mxu1 %vm2003_vm10, %v4046_v31  ;;  %v3540_v54 = vpop.permute.xlu0 %3539  ;;  %v3873_v31 = vld [vmem:[#allocation3 + $0x122] sm:$0xff] }
 0x48f   : > { %3632 = vst.msk [vmem:[#allocation4 + $0x18] sm:$0xff] %vm1536_vm7, %v3540_v54  ;;  %3561 = vrot.lane.b32.xlu1 %v6479_v51, %s4953_s30  ;;  %v3682_v54 = vld [vmem:[#allocation3 + $0x129] sm:$0xff] }
 0x490   : > { %3370 = vrot.lane.b32.xlu0 %v6609_v63, %s4952_s29 }
 0x491   : > { %v3732_v18 = vpop.permute.xlu1 %3731 }
 0x492   : > { %3824 = vst.msk [vmem:[#allocation4 + $0x18] sm:$0xff] %vm1729_vm8, %v3732_v18  ;;  %v3157_v32 = vpop.permute.xlu0 %3156 }
 0x493   : > { %3248 = vst.msk [vmem:[#allocation4 + $0x20] sm:$0xff] %vm1149_vm5, %v3157_v32  ;;  %3753 = vrot.lane.b32.xlu1 %v3675_v20, %s4954_s7 }
 0x494   : > { %3563 = vrot.lane.b32.xlu0 %v6473_v37, %s4953_s30 }
 0x495   : > { %v3159_v27 = vpop.permute.xlu1 %3158 }
 0x496   : > { %3249 = vst.msk [vmem:[#allocation4 + $0x28] sm:$0xff] %vm1149_vm5, %v3159_v27  ;;  %v3922_v34 = vpop.permute.xlu0 %3921 }
 0x497   : > { %4015 = vst.msk [vmem:[#allocation4 + $0x10] sm:$0xff] %vm1922_vm9, %v3922_v34  ;;  %3180 = vrot.lane.b32.xlu1 %v3675_v20, %s4951_s28  ;;  %v3299_v34 = vld [vmem:[#allocation3 + $0x12a] sm:$0xff] }
 0x498   : > { %2990 = vrot.lane.b32.xlu0 %v6473_v37, %s4950_s27 }
 0x499   : > { %v3924_v51 = vpop.permute.xlu1 %3923 }
 0x49a   : > { %4016 = vst.msk [vmem:[#allocation4 + $0x18] sm:$0xff] %vm1922_vm9, %v3924_v51  ;;  %v3349_v63 = vpop.permute.xlu0 %3348 }
 0x49b   : > { %3440 = vst.msk [vmem:[#allocation4 + $0x20] sm:$0xff] %vm1342_vm6, %v3349_v63  ;;  %3945 = vrot.lane.b32.xlu1 %v6622_v14, %s4955_s10 }
 0x49c   : > { %3755 = vrot.lane.b32.xlu0 %v3676_v45, %s4954_s7 }
 0x49d   : > { %v3542_v30 = vpop.permute.xlu1 %3541 }
 0x49e   : > { %3633 = vst.msk [vmem:[#allocation4 + $0x20] sm:$0xff] %vm1536_vm7, %v3542_v30  ;;  %v3351_v33 = vpop.permute.xlu0 %3350  ;;  %v4047_v62 = vld [vmem:[#allocation4 + $0x10] sm:$0xff] }
 0x49f   : > { %3441 = vst.msk [vmem:[#allocation4 + $0x28] sm:$0xff] %vm1342_vm6, %v3351_v33  ;;  %3372 = vrot.lane.b32.xlu1 %v6622_v14, %s4952_s29  ;;  %4845 = vmatprep.mubr.msk.f32.mxu1 %vm2003_vm10, %v4047_v62 }
 0x4a0   : > { %3182 = vrot.lane.b32.xlu0 %v3676_v45, %s4951_s28  ;;  %v2916_v45 = vld [vmem:[#allocation3 + $0x138] sm:$0xff] }
 0x4a1   : > { %v3734_v37 = vpop.permute.xlu1 %3733  ;;  %v4048_v13 = vld [vmem:[#allocation4 + $0x18] sm:$0xff] }
 0x4a2   : > { %3825 = vst.msk [vmem:[#allocation4 + $0x20] sm:$0xff] %vm1729_vm8, %v3734_v37  ;;  %4846 = vmatmul.mubr.msk.f32.gmra.mrb[2].mxu1 %vm2003_vm10, %v4048_v13  ;;  %v3544_v58 = vpop.permute.xlu0 %3543  ;;  %v3683_v13 = vld [vmem:[#allocation3 + $0x139] sm:$0xff] }
 0x4a3   : > { %3634 = vst.msk [vmem:[#allocation4 + $0x28] sm:$0xff] %vm1536_vm7, %v3544_v58  ;;  %3374 = vrot.lane.b32.xlu1 %v6618_v36, %s4952_s29  ;;  %v3492_v58 = vld [vmem:[#allocation3 + $0x140] sm:$0xff] }
 0x4a4   : > { %3947 = vrot.lane.b32.xlu0 %v6618_v36, %s4955_s10 }
 0x4a5   : > { %v3736_v14 = vpop.permute.xlu1 %3735 }
 0x4a6   : > { %3826 = vst.msk [vmem:[#allocation4 + $0x28] sm:$0xff] %vm1729_vm8, %v3736_v14  ;;  %v3161_v0 = vpop.permute.xlu0 %3160 }
 0x4a7   : > { %3250 = vst.msk [vmem:[#allocation4 + $0x30] sm:$0xff] %vm1149_vm5, %v3161_v0  ;;  %2992 = vrot.lane.b32.xlu1 %v6493_v3, %s4950_s27 }
 0x4a8   : > { %3565 = vrot.lane.b32.xlu0 %v6493_v3, %s4953_s30 }
 0x4a9   : > { %v3163_v59 = vpop.permute.xlu1 %3162 }
 0x4aa   : > { %3251 = vst.msk [vmem:[#allocation4 + $0x38] sm:$0xff] %vm1149_vm5, %v3163_v59  ;;  %v3926_v46 = vpop.permute.xlu0 %3925 }
 0x4ab   : > { %4017 = vst.msk [vmem:[#allocation4 + $0x20] sm:$0xff] %vm1922_vm9, %v3926_v46  ;;  %3757 = vrot.lane.b32.xlu1 %v3677_v55, %s4954_s7 }
 0x4ac   : > { %3567 = vrot.lane.b32.xlu0 %v6487_v4, %s4953_s30 }
 0x4ad   : > { %v3928_v36 = vpop.permute.xlu1 %3927 }
 0x4ae   : > { %4018 = vst.msk [vmem:[#allocation4 + $0x28] sm:$0xff] %vm1922_vm9, %v3928_v36  ;;  %v3353_v35 = vpop.permute.xlu0 %3352  ;;  %v3684_v36 = vld [vmem:[#allocation3 + $0x141] sm:$0xff] }
 0x4af   : > { %3442 = vst.msk [vmem:[#allocation4 + $0x30] sm:$0xff] %vm1342_vm6, %v3353_v35  ;;  %3184 = vrot.lane.b32.xlu1 %v3677_v55, %s4951_s28  ;;  %v3875_v55 = vld [vmem:[#allocation3 + $0x13a] sm:$0xff] }
 0x4b0   : > { %2994 = vrot.lane.b32.xlu0 %v6487_v4, %s4950_s27 }
 0x4b1   : > { %v3546_v3 = vpop.permute.xlu1 %3545 }
 0x4b2   : > { %3635 = vst.msk [vmem:[#allocation4 + $0x30] sm:$0xff] %vm1536_vm7, %v3546_v3  ;;  %v3355_v57 = vpop.permute.xlu0 %3354  ;;  %v4049_v7 = vld [vmem:[#allocation4 + $0x20] sm:$0xff] }
 0x4b3   : > { %3443 = vst.msk [vmem:[#allocation4 + $0x38] sm:$0xff] %vm1342_vm6, %v3355_v57  ;;  %3949 = vrot.lane.b32.xlu1 %v3869_v61, %s4955_s10  ;;  %4848 = vmatprep.mubr.msk.f32.mxu1 %vm2003_vm10, %v4049_v7  ;;  %v3301_v7 = vld [vmem:[#allocation3 + $0x142] sm:$0xff] }
 0x4b4   : > { %3759 = vrot.lane.b32.xlu0 %v3678_v10, %s4954_s7 }
 0x4b5   : > { %v3738_v8 = vpop.permute.xlu1 %3737  ;;  %v4050_v2 = vld [vmem:[#allocation4 + $0x28] sm:$0xff] }
 0x4b6   : > { %3827 = vst.msk [vmem:[#allocation4 + $0x30] sm:$0xff] %vm1729_vm8, %v3738_v8  ;;  %v3548_v4 = vpop.permute.xlu0 %3547  ;;  %4849 = vmatmul.mubr.msk.f32.gmra.mrb[4].mxu1 %vm2003_vm10, %v4050_v2 }
 0x4b7   : > { %3636 = vst.msk [vmem:[#allocation4 + $0x38] sm:$0xff] %vm1536_vm7, %v3548_v4  ;;  %3376 = vrot.lane.b32.xlu1 %v3869_v61, %s4952_s29 }
 0x4b8   : > { %3186 = vrot.lane.b32.xlu0 %v3678_v10, %s4951_s28 }
 0x4b9   : > { %v3740_v60 = vpop.permute.xlu1 %3739 }
 0x4ba   : > { %3828 = vst.msk [vmem:[#allocation4 + $0x38] sm:$0xff] %vm1729_vm8, %v3740_v60  ;;  %v3165_v26 = vpop.permute.xlu0 %3164  ;;  %v2918_v60 = vld [vmem:[#allocation3 + $0x150] sm:$0xff] }
 0x4bb   : > { %3252 = vst.msk [vmem:[#allocation4 + $0x40] sm:$0xff] %vm1149_vm5, %v3165_v26  ;;  %3378 = vrot.lane.b32.xlu1 %v3295_v6, %s4952_s29 }
 0x4bc   : > { %3951 = vrot.lane.b32.xlu0 %v3295_v6, %s4955_s10 }
 0x4bd   : > { %v3167_v5 = vpop.permute.xlu1 %3166 }
 0x4be   : > { %3253 = vst.msk [vmem:[#allocation4 + $0x48] sm:$0xff] %vm1149_vm5, %v3167_v5  ;;  %v3930_v11 = vpop.permute.xlu0 %3929  ;;  %v3685_v5 = vld [vmem:[#allocation3 + $0x151] sm:$0xff] }
 0x4bf   : > { %4019 = vst.msk [vmem:[#allocation4 + $0x30] sm:$0xff] %vm1922_vm9, %v3930_v11  ;;  %2996 = vrot.lane.b32.xlu1 %v6507_v56, %s4950_s27  ;;  %v3494_v11 = vld [vmem:[#allocation3 + $0x158] sm:$0xff] }
 0x4c0   : > { %3569 = vrot.lane.b32.xlu0 %v6507_v56, %s4953_s30 }
 0x4c1   : > { %v3932_v40 = vpop.permute.xlu1 %3931 }
 0x4c2   : > { %4020 = vst.msk [vmem:[#allocation4 + $0x38] sm:$0xff] %vm1922_vm9, %v3932_v40  ;;  %v3357_v41 = vpop.permute.xlu0 %3356 }
 0x4c3   : > { %3444 = vst.msk [vmem:[#allocation4 + $0x40] sm:$0xff] %vm1342_vm6, %v3357_v41  ;;  %3761 = vrot.lane.b32.xlu1 %v3679_v49, %s4954_s7 }
 0x4c4   : > { %3571 = vrot.lane.b32.xlu0 %v6501_v23, %s4953_s30 }
 0x4c5   : > { %v3550_v39 = vpop.permute.xlu1 %3549 }
 0x4c6   : > { %3637 = vst.msk [vmem:[#allocation4 + $0x40] sm:$0xff] %vm1536_vm7, %v3550_v39  ;;  %v3359_v42 = vpop.permute.xlu0 %3358  ;;  %v4051_v22 = vld [vmem:[#allocation4 + $0x30] sm:$0xff] }
 0x4c7   : > { %3445 = vst.msk [vmem:[#allocation4 + $0x48] sm:$0xff] %vm1342_vm6, %v3359_v42  ;;  %3188 = vrot.lane.b32.xlu1 %v3679_v49, %s4951_s28  ;;  %4851 = vmatprep.mubr.msk.f32.mxu1 %vm2003_vm10, %v4051_v22  ;;  %v3877_v42 = vld [vmem:[#allocation3 + $0x152] sm:$0xff] }
 0x4c8   : > { %2998 = vrot.lane.b32.xlu0 %v6501_v23, %s4950_s27  ;;  %v3686_v22 = vld [vmem:[#allocation3 + $0x159] sm:$0xff] }
 0x4c9   : > { %v3742_v56 = vpop.permute.xlu1 %3741  ;;  %v4052_v53 = vld [vmem:[#allocation4 + $0x38] sm:$0xff] }
 0x4ca   : > { %3829 = vst.msk [vmem:[#allocation4 + $0x40] sm:$0xff] %vm1729_vm8, %v3742_v56  ;;  %v3552_v9 = vpop.permute.xlu0 %3551  ;;  %4852 = vmatmul.mubr.msk.f32.gmra.mrb[6].mxu1 %vm2003_vm10, %v4052_v53 }
 0x4cb   : > { %3638 = vst.msk [vmem:[#allocation4 + $0x48] sm:$0xff] %vm1536_vm7, %v3552_v9  ;;  %3953 = vrot.lane.b32.xlu1 %v3871_v12, %s4955_s10 }
 0x4cc   : > { %3763 = vrot.lane.b32.xlu0 %v3680_v44, %s4954_s7 }
 0x4cd   : > { %v3744_v47 = vpop.permute.xlu1 %3743 }
 0x4ce   : > { %3830 = vst.msk [vmem:[#allocation4 + $0x48] sm:$0xff] %vm1729_vm8, %v3744_v47  ;;  %v3169_v48 = vpop.permute.xlu0 %3168  ;;  %v3303_v47 = vld [vmem:[#allocation3 + $0x15a] sm:$0xff] }
 0x4cf   : > { %3254 = vst.msk [vmem:[#allocation4 + $0x50] sm:$0xff] %vm1149_vm5, %v3169_v48  ;;  %3380 = vrot.lane.b32.xlu1 %v3871_v12, %s4952_s29 }
 0x4d0   : > { %3190 = vrot.lane.b32.xlu0 %v3680_v44, %s4951_s28 }
 0x4d1   : > { %v3171_v23 = vpop.permute.xlu1 %3170 }
 0x4d2   : > { %3255 = vst.msk [vmem:[#allocation4 + $0x58] sm:$0xff] %vm1149_vm5, %v3171_v23  ;;  %v3934_v28 = vpop.permute.xlu0 %3933 }
 0x4d3   : > { %4021 = vst.msk [vmem:[#allocation4 + $0x40] sm:$0xff] %vm1922_vm9, %v3934_v28  ;;  %3382 = vrot.lane.b32.xlu1 %v3297_v21, %s4952_s29  ;;  %v2920_v28 = vld [vmem:[#allocation3 + $0x168] sm:$0xff] }
 0x4d4   : > { %3955 = vrot.lane.b32.xlu0 %v3297_v21, %s4955_s10 }
 0x4d5   : > { %v3936_v50 = vpop.permute.xlu1 %3935 }
 0x4d6   : > { %4022 = vst.msk [vmem:[#allocation4 + $0x48] sm:$0xff] %vm1922_vm9, %v3936_v50  ;;  %v3361_v16 = vpop.permute.xlu0 %3360 }
 0x4d7   : > { %3446 = vst.msk [vmem:[#allocation4 + $0x50] sm:$0xff] %vm1342_vm6, %v3361_v16  ;;  %3000 = vrot.lane.b32.xlu1 %v6518_v29, %s4950_s27 }
 0x4d8   : > { %3573 = vrot.lane.b32.xlu0 %v6518_v29, %s4953_s30 }
 0x4d9   : > { %v3554_v43 = vpop.permute.xlu1 %3553 }
 0x4da   : > { %3639 = vst.msk [vmem:[#allocation4 + $0x50] sm:$0xff] %vm1536_vm7, %v3554_v43  ;;  %v3363_v19 = vpop.permute.xlu0 %3362  ;;  %v4053_v15 = vld [vmem:[#allocation4 + $0x40] sm:$0xff] }
 0x4db   : > { %3447 = vst.msk [vmem:[#allocation4 + $0x58] sm:$0xff] %vm1342_vm6, %v3363_v19  ;;  %3765 = vrot.lane.b32.xlu1 %v3681_v24, %s4954_s7  ;;  %4854 = vmatprep.mubr.msk.f32.mxu1 %vm2003_vm10, %v4053_v15  ;;  %v3687_v43 = vld [vmem:[#allocation3 + $0x169] sm:$0xff] }
 0x4dc   : > { %3575 = vrot.lane.b32.xlu0 %v3490_v25, %s4953_s30  ;;  %v3496_v19 = vld [vmem:[#allocation3 + $0x170] sm:$0xff] }
 0x4dd   : > { %v3746_v17 = vpop.permute.xlu1 %3745  ;;  %v4054_v52 = vld [vmem:[#allocation4 + $0x48] sm:$0xff] }
 0x4de   : > { %3831 = vst.msk [vmem:[#allocation4 + $0x50] sm:$0xff] %vm1729_vm8, %v3746_v17  ;;  %v3556_v29 = vpop.permute.xlu0 %3555  ;;  %4855 = vmatmul.mubr.msk.f32.gmra.mrb[8].mxu1 %vm2003_vm10, %v4054_v52  ;;  %v3879_v52 = vld [vmem:[#allocation3 + $0x16a] sm:$0xff] }
 0x4df   : > { %3640 = vst.msk [vmem:[#allocation4 + $0x58] sm:$0xff] %vm1536_vm7, %v3556_v29  ;;  %3192 = vrot.lane.b32.xlu1 %v3681_v24, %s4951_s28  ;;  %v3688_v29 = vld [vmem:[#allocation3 + $0x171] sm:$0xff] }
 0x4e0   : > { %3002 = vrot.lane.b32.xlu0 %v3490_v25, %s4950_s27 }
 0x4e1   : > { %v3748_v1 = vpop.permute.xlu1 %3747 }
 0x4e2   : > { %3832 = vst.msk [vmem:[#allocation4 + $0x58] sm:$0xff] %vm1729_vm8, %v3748_v1  ;;  %v3173_v38 = vpop.permute.xlu0 %3172 }
 0x4e3   : > { %3256 = vst.msk [vmem:[#allocation4 + $0x60] sm:$0xff] %vm1149_vm5, %v3173_v38  ;;  %3957 = vrot.lane.b32.xlu1 %v3873_v31, %s4955_s10 }
 0x4e4   : > { %3767 = vrot.lane.b32.xlu0 %v3682_v54, %s4954_s7 }
 0x4e5   : > { %v3175_v18 = vpop.permute.xlu1 %3174 }
 0x4e6   : > { %3257 = vst.msk [vmem:[#allocation4 + $0x68] sm:$0xff] %vm1149_vm5, %v3175_v18  ;;  %v3938_v32 = vpop.permute.xlu0 %3937 }
 0x4e7   : > { %4023 = vst.msk [vmem:[#allocation4 + $0x50] sm:$0xff] %vm1922_vm9, %v3938_v32  ;;  %3384 = vrot.lane.b32.xlu1 %v3873_v31, %s4952_s29  ;;  %v3305_v32 = vld [vmem:[#allocation3 + $0x172] sm:$0xff] }
 0x4e8   : > { %3194 = vrot.lane.b32.xlu0 %v3682_v54, %s4951_s28 }
 0x4e9   : > { %v3940_v20 = vpop.permute.xlu1 %3939 }
 0x4ea   : > { %4024 = vst.msk [vmem:[#allocation4 + $0x58] sm:$0xff] %vm1922_vm9, %v3940_v20  ;;  %v3365_v27 = vpop.permute.xlu0 %3364 }
 0x4eb   : > { %3448 = vst.msk [vmem:[#allocation4 + $0x60] sm:$0xff] %vm1342_vm6, %v3365_v27  ;;  %3386 = vrot.lane.b32.xlu1 %v3299_v34, %s4952_s29 }
 0x4ec   : > { %3959 = vrot.lane.b32.xlu0 %v3299_v34, %s4955_s10  ;;  %v2922_v34 = vld [vmem:[#allocation3 + $0x180] sm:$0xff] }
 0x4ed   : > { %v3558_v51 = vpop.permute.xlu1 %3557 }
 0x4ee   : > { %3641 = vst.msk [vmem:[#allocation4 + $0x60] sm:$0xff] %vm1536_vm7, %v3558_v51  ;;  %v3367_v63 = vpop.permute.xlu0 %3366  ;;  %v4055_v30 = vld [vmem:[#allocation4 + $0x50] sm:$0xff] }
 0x4ef   : > { %3449 = vst.msk [vmem:[#allocation4 + $0x68] sm:$0xff] %vm1342_vm6, %v3367_v63  ;;  %3004 = vrot.lane.b32.xlu1 %v2916_v45, %s4950_s27  ;;  %4857 = vmatprep.mubr.msk.f32.mxu1 %vm2003_vm10, %v4055_v30  ;;  %v3689_v30 = vld [vmem:[#allocation3 + $0x181] sm:$0xff] }
 0x4f0   : > { %3577 = vrot.lane.b32.xlu0 %v2916_v45, %s4953_s30 }
 0x4f1   : > { %v3750_v33 = vpop.permute.xlu1 %3749  ;;  %v4056_v62 = vld [vmem:[#allocation4 + $0x58] sm:$0xff] }
 0x4f2   : > { %3833 = vst.msk [vmem:[#allocation4 + $0x60] sm:$0xff] %vm1729_vm8, %v3750_v33  ;;  %v3560_v37 = vpop.permute.xlu0 %3559  ;;  %4858 = vmatmul.mubr.msk.f32.gmra.mrb[10].mxu1 %vm2003_vm10, %v4056_v62  ;;  %v3498_v33 = vld [vmem:[#allocation3 + $0x188] sm:$0xff] }
 0x4f3   : > { %3642 = vst.msk [vmem:[#allocation4 + $0x68] sm:$0xff] %vm1536_vm7, %v3560_v37  ;;  %3769 = vrot.lane.b32.xlu1 %v3683_v13, %s4954_s7 }
 0x4f4   : > { %3579 = vrot.lane.b32.xlu0 %v3492_v58, %s4953_s30 }
 0x4f5   : > { %v3752_v14 = vpop.permute.xlu1 %3751 }
 0x4f6   : > { %3834 = vst.msk [vmem:[#allocation4 + $0x68] sm:$0xff] %vm1729_vm8, %v3752_v14  ;;  %v3177_v0 = vpop.permute.xlu0 %3176  ;;  %v3881_v14 = vld [vmem:[#allocation3 + $0x182] sm:$0xff] }
 0x4f7   : > { %3258 = vst.msk [vmem:[#allocation4 + $0x70] sm:$0xff] %vm1149_vm5, %v3177_v0  ;;  %3196 = vrot.lane.b32.xlu1 %v3683_v13, %s4951_s28  ;;  %v3690_v0 = vld [vmem:[#allocation3 + $0x189] sm:$0xff] }
 0x4f8   : > { %3006 = vrot.lane.b32.xlu0 %v3492_v58, %s4950_s27 }
 0x4f9   : > { %v3179_v59 = vpop.permute.xlu1 %3178 }
 0x4fa   : > { %3259 = vst.msk [vmem:[#allocation4 + $0x78] sm:$0xff] %vm1149_vm5, %v3179_v59  ;;  %v3942_v46 = vpop.permute.xlu0 %3941 }
 0x4fb   : > { %4025 = vst.msk [vmem:[#allocation4 + $0x60] sm:$0xff] %vm1922_vm9, %v3942_v46  ;;  %3961 = vrot.lane.b32.xlu1 %v3875_v55, %s4955_s10 }
 0x4fc   : > { %3771 = vrot.lane.b32.xlu0 %v3684_v36, %s4954_s7 }
 0x4fd   : > { %v3944_v35 = vpop.permute.xlu1 %3943 }
 0x4fe   : > { %4026 = vst.msk [vmem:[#allocation4 + $0x68] sm:$0xff] %vm1922_vm9, %v3944_v35  ;;  %v3369_v3 = vpop.permute.xlu0 %3368 }
 0x4ff   : > { %3450 = vst.msk [vmem:[#allocation4 + $0x70] sm:$0xff] %vm1342_vm6, %v3369_v3  ;;  %3388 = vrot.lane.b32.xlu1 %v3875_v55, %s4952_s29  ;;  %v3307_v3 = vld [vmem:[#allocation3 + $0x18a] sm:$0xff] }
 0x500   : > { %3198 = vrot.lane.b32.xlu0 %v3684_v36, %s4951_s28 }
 0x501   : > { %v3562_v57 = vpop.permute.xlu1 %3561 }
 0x502   : > { %3643 = vst.msk [vmem:[#allocation4 + $0x70] sm:$0xff] %vm1536_vm7, %v3562_v57  ;;  %v3371_v61 = vpop.permute.xlu0 %3370  ;;  %v4057_v10 = vld [vmem:[#allocation4 + $0x60] sm:$0xff]  ;;  %v3500_v57 = vld [vmem:[#allocation3 + $0x1a0] sm:$0xff] }
 0x503   : > { %3451 = vst.msk [vmem:[#allocation4 + $0x78] sm:$0xff] %vm1342_vm6, %v3371_v61  ;;  %3390 = vrot.lane.b32.xlu1 %v3301_v7, %s4952_s29  ;;  %4860 = vmatprep.mubr.msk.f32.mxu1 %vm2003_vm10, %v4057_v10 }
 0x504   : > { %3963 = vrot.lane.b32.xlu0 %v3301_v7, %s4955_s10  ;;  %v3499_v7 = vld [vmem:[#allocation3 + $0x198] sm:$0xff] }
 0x505   : > { %v3754_v8 = vpop.permute.xlu1 %3753  ;;  %v4058_v2 = vld [vmem:[#allocation4 + $0x68] sm:$0xff] }
 0x506   : > { %3835 = vst.msk [vmem:[#allocation4 + $0x70] sm:$0xff] %vm1729_vm8, %v3754_v8  ;;  %v3564_v4 = vpop.permute.xlu0 %3563  ;;  %4861 = vmatmul.mubr.msk.f32.gmra.mrb[12].mxu1 %vm2003_vm10, %v4058_v2  ;;  %v3692_v2 = vld [vmem:[#allocation3 + $0x1a1] sm:$0xff] }
 0x507   : > { %3644 = vst.msk [vmem:[#allocation4 + $0x78] sm:$0xff] %vm1536_vm7, %v3564_v4  ;;  %3008 = vrot.lane.b32.xlu1 %v2918_v60, %s4950_s27 }
 0x508   : > { %3581 = vrot.lane.b32.xlu0 %v2918_v60, %s4953_s30  ;;  %v3691_v60 = vld [vmem:[#allocation3 + $0x199] sm:$0xff] }
 0x509   : > { %v3181_v26 = vpop.permute.xlu1 %3180 }
 0x50a   : > { %3260 = vst.msk [vmem:[#allocation4 + $0x80] sm:$0xff] %vm1149_vm5, %v3181_v26  ;;  %v2991_v6 = vpop.permute.xlu0 %2990 }
 0x50b   : > { %3069 = vst.msk [vmem:[#allocation4 + $0x88] sm:$0xff] %vm956_vm4, %v2991_v6  ;;  %3773 = vrot.lane.b32.xlu1 %v3685_v5, %s4954_s7  ;;  %v3884_v6 = vld [vmem:[#allocation3 + $0x1a2] sm:$0xff] }
 0x50c   : > { %3583 = vrot.lane.b32.xlu0 %v3494_v11, %s4953_s30 }
 0x50d   : > { %v3946_v40 = vpop.permute.xlu1 %3945 }
 0x50e   : > { %4027 = vst.msk [vmem:[#allocation4 + $0x70] sm:$0xff] %vm1922_vm9, %v3946_v40  ;;  %v3756_v41 = vpop.permute.xlu0 %3755 }
 0x50f   : > { %3836 = vst.msk [vmem:[#allocation4 + $0x78] sm:$0xff] %vm1729_vm8, %v3756_v41  ;;  %3200 = vrot.lane.b32.xlu1 %v3685_v5, %s4951_s28 }
 0x510   : > { %3010 = vrot.lane.b32.xlu0 %v3494_v11, %s4950_s27  ;;  %v3883_v11 = vld [vmem:[#allocation3 + $0x19a] sm:$0xff] }
 0x511   : > { %v3373_v49 = vpop.permute.xlu1 %3372 }
 0x512   : > { %3452 = vst.msk [vmem:[#allocation4 + $0x80] sm:$0xff] %vm1342_vm6, %v3373_v49  ;;  %v3183_v39 = vpop.permute.xlu0 %3182 }
 0x513   : > { %3261 = vst.msk [vmem:[#allocation4 + $0x88] sm:$0xff] %vm1149_vm5, %v3183_v39  ;;  %3965 = vrot.lane.b32.xlu1 %v3877_v42, %s4955_s10 }
 0x514   : > { %3775 = vrot.lane.b32.xlu0 %v3686_v22, %s4954_s7 }
 0x515   : > { %v3375_v56 = vpop.permute.xlu1 %3374  ;;  %v4059_v53 = vld [vmem:[#allocation4 + $0x70] sm:$0xff] }
 0x516   : > { %3453 = vst.msk [vmem:[#allocation4 + $0x88] sm:$0xff] %vm1342_vm6, %v3375_v56  ;;  %v3948_v9 = vpop.permute.xlu0 %3947  ;;  %4863 = vmatprep.mubr.msk.f32.mxu1 %vm2003_vm10, %v4059_v53  ;;  %v7172_v56 = vld [vmem:[%s7381_s4] ss:$0 sm:$0xff] }
 0x517   : > { %4028 = vst.msk [vmem:[#allocation4 + $0x78] sm:$0xff] %vm1922_vm9, %v3948_v9  ;;  %3392 = vrot.lane.b32.xlu1 %v3877_v42, %s4952_s29 }
 0x518   : > { %3202 = vrot.lane.b32.xlu0 %v3686_v22, %s4951_s28 }
 0x519   : > { %v2993_v12 = vpop.permute.xlu1 %2992 }
 0x51a   : > { %3070 = vst.msk [vmem:[#allocation4 + $0x90] sm:$0xff] %vm956_vm4, %v2993_v12  ;;  %v3566_v44 = vpop.permute.xlu0 %3565  ;;  %v4415_v12 = vld [vmem:[%s5228_s24 + $0x8] sm:$0xff] }
 0x51b   : > { %3645 = vst.msk [vmem:[#allocation4 + $0x80] sm:$0xff] %vm1536_vm7, %v3566_v44  ;;  %3394 = vrot.lane.b32.xlu1 %v3303_v47, %s4952_s29 }
 0x51c   : > { %3967 = vrot.lane.b32.xlu0 %v3303_v47, %s4955_s10 }
 0x51d   : > { %v3758_v48 = vpop.permute.xlu1 %3757 }
 0x51e   : > { %3837 = vst.msk [vmem:[#allocation4 + $0x80] sm:$0xff] %vm1729_vm8, %v3758_v48  ;;  %v3568_v23 = vpop.permute.xlu0 %3567  ;;  %v4060_v21 = vld [vmem:[#allocation4 + $0x78] sm:$0xff]  ;;  %v4414_v48 = vld [vmem:[%s5228_s24] sm:$0xff] }
 0x51f   : > { %3646 = vst.msk [vmem:[#allocation4 + $0x88] sm:$0xff] %vm1536_vm7, %v3568_v23  ;;  %3012 = vrot.lane.b32.xlu1 %v2920_v28, %s4950_s27  ;;  %4864 = vmatmul.mubr.msk.f32.gmra.mrb[14].mxu1 %vm2003_vm10, %v4060_v21 }
 0x520   : > { %3585 = vrot.lane.b32.xlu0 %v2920_v28, %s4953_s30 }
 0x521   : > { %v3185_v50 = vpop.permute.xlu1 %3184 }
 0x522   : > { %3262 = vst.msk [vmem:[#allocation4 + $0x90] sm:$0xff] %vm1149_vm5, %v3185_v50  ;;  %v2995_v16 = vpop.permute.xlu0 %2994 }
 0x523   : > { %3071 = vst.msk [vmem:[#allocation4 + $0x98] sm:$0xff] %vm956_vm4, %v2995_v16  ;;  %3777 = vrot.lane.b32.xlu1 %v3687_v43, %s4954_s7 }
 0x524   : > { %3587 = vrot.lane.b32.xlu0 %v3496_v19, %s4953_s30 }
 0x525   : > { %v3950_v24 = vpop.permute.xlu1 %3949 }
 0x526   : > { %4029 = vst.msk [vmem:[#allocation4 + $0x80] sm:$0xff] %vm1922_vm9, %v3950_v24  ;;  %v3760_v15 = vpop.permute.xlu0 %3759 }
 0x527   : > { %3838 = vst.msk [vmem:[#allocation4 + $0x88] sm:$0xff] %vm1729_vm8, %v3760_v15  ;;  %3204 = vrot.lane.b32.xlu1 %v3687_v43, %s4951_s28 }
 0x528   : > { %3014 = vrot.lane.b32.xlu0 %v3496_v19, %s4950_s27 }
 0x529   : > { %v3377_v25 = vpop.permute.xlu1 %3376 }
 0x52a   : > { %3454 = vst.msk [vmem:[#allocation4 + $0x90] sm:$0xff] %vm1342_vm6, %v3377_v25  ;;  %v3187_v17 = vpop.permute.xlu0 %3186 }
 0x52b   : > { %3263 = vst.msk [vmem:[#allocation4 + $0x98] sm:$0xff] %vm1149_vm5, %v3187_v17  ;;  %3969 = vrot.lane.b32.xlu1 %v3879_v52, %s4955_s10 }
 0x52c   : > { %3779 = vrot.lane.b32.xlu0 %v3688_v29, %s4954_s7 }
 0x52d   : > { %v3379_v1 = vpop.permute.xlu1 %3378  ;;  %v4061_v38 = vld [vmem:[#allocation4 + $0x80] sm:$0xff] }
 0x52e   : > { %3455 = vst.msk [vmem:[#allocation4 + $0x98] sm:$0xff] %vm1342_vm6, %v3379_v1  ;;  %v3952_v31 = vpop.permute.xlu0 %3951  ;;  %4866 = vmatprep.mubr.msk.f32.mxu1 %vm2003_vm10, %v4061_v38 }
 0x52f   : > { %4030 = vst.msk [vmem:[#allocation4 + $0x88] sm:$0xff] %vm1922_vm9, %v3952_v31  ;;  %3396 = vrot.lane.b32.xlu1 %v3879_v52, %s4952_s29 }
 0x530   : > { %3206 = vrot.lane.b32.xlu0 %v3688_v29, %s4951_s28 }
 0x531   : > { %v2997_v54 = vpop.permute.xlu1 %2996 }
 0x532   : > { %3072 = vst.msk [vmem:[#allocation4 + $0xa0] sm:$0xff] %vm956_vm4, %v2997_v54  ;;  %v3570_v18 = vpop.permute.xlu0 %3569 }
 0x533   : > { %3647 = vst.msk [vmem:[#allocation4 + $0x90] sm:$0xff] %vm1536_vm7, %v3570_v18  ;;  %3398 = vrot.lane.b32.xlu1 %v3305_v32, %s4952_s29  ;;  %v4417_v18 = vld [vmem:[%s5228_s24 + $0x18] sm:$0xff] }
 0x534   : > { %3971 = vrot.lane.b32.xlu0 %v3305_v32, %s4955_s10 }
 0x535   : > { %v3762_v20 = vpop.permute.xlu1 %3761 }
 0x536   : > { %3839 = vst.msk [vmem:[#allocation4 + $0x90] sm:$0xff] %vm1729_vm8, %v3762_v20  ;;  %v3572_v27 = vpop.permute.xlu0 %3571  ;;  %v4062_v51 = vld [vmem:[#allocation4 + $0x88] sm:$0xff] }
 0x537   : > { %3648 = vst.msk [vmem:[#allocation4 + $0x98] sm:$0xff] %vm1536_vm7, %v3572_v27  ;;  %3016 = vrot.lane.b32.xlu1 %v2922_v34, %s4950_s27  ;;  %4867 = vmatmul.mubr.msk.f32.gmra.mrb[16].mxu1 %vm2003_vm10, %v4062_v51 }
 0x538   : > { %3589 = vrot.lane.b32.xlu0 %v2922_v34, %s4953_s30  ;;  %v4416_v34 = vld [vmem:[%s5228_s24 + $0x10] sm:$0xff] }
 0x539   : > { %v3189_v63 = vpop.permute.xlu1 %3188 }
 0x53a   : > { %3264 = vst.msk [vmem:[#allocation4 + $0xa0] sm:$0xff] %vm1149_vm5, %v3189_v63  ;;  %v2999_v45 = vpop.permute.xlu0 %2998 }
 0x53b   : > { %3073 = vst.msk [vmem:[#allocation4 + $0xa8] sm:$0xff] %vm956_vm4, %v2999_v45  ;;  %3781 = vrot.lane.b32.xlu1 %v3689_v30, %s4954_s7 }
 0x53c   : > { %3591 = vrot.lane.b32.xlu0 %v3498_v33, %s4953_s30 }
 0x53d   : > { %v3954_v62 = vpop.permute.xlu1 %3953 }
 0x53e   : > { %4031 = vst.msk [vmem:[#allocation4 + $0x90] sm:$0xff] %vm1922_vm9, %v3954_v62  ;;  %v3764_v37 = vpop.permute.xlu0 %3763 }
 0x53f   : > { %3840 = vst.msk [vmem:[#allocation4 + $0x98] sm:$0xff] %vm1729_vm8, %v3764_v37  ;;  %3208 = vrot.lane.b32.xlu1 %v3689_v30, %s4951_s28 }
 0x540   : > { %3018 = vrot.lane.b32.xlu0 %v3498_v33, %s4950_s27 }
 0x541   : > { %v3381_v13 = vpop.permute.xlu1 %3380 }
 0x542   : > { %3456 = vst.msk [vmem:[#allocation4 + $0xa0] sm:$0xff] %vm1342_vm6, %v3381_v13  ;;  %v3191_v58 = vpop.permute.xlu0 %3190 }
 0x543   : > { %3265 = vst.msk [vmem:[#allocation4 + $0xa8] sm:$0xff] %vm1149_vm5, %v3191_v58  ;;  %3973 = vrot.lane.b32.xlu1 %v3881_v14, %s4955_s10 }
 0x544   : > { %3783 = vrot.lane.b32.xlu0 %v3690_v0, %s4954_s7 }
 0x545   : > { %v3383_v59 = vpop.permute.xlu1 %3382  ;;  %v4063_v46 = vld [vmem:[#allocation4 + $0x90] sm:$0xff] }
 0x546   : > { %3457 = vst.msk [vmem:[#allocation4 + $0xa8] sm:$0xff] %vm1342_vm6, %v3383_v59  ;;  %v3956_v55 = vpop.permute.xlu0 %3955  ;;  %4869 = vmatprep.mubr.msk.f32.mxu1 %vm2003_vm10, %v4063_v46 }
 0x547   : > { %4032 = vst.msk [vmem:[#allocation4 + $0x98] sm:$0xff] %vm1922_vm9, %v3956_v55  ;;  %3400 = vrot.lane.b32.xlu1 %v3881_v14, %s4952_s29 }
 0x548   : > { %3210 = vrot.lane.b32.xlu0 %v3690_v0, %s4951_s28 }
 0x549   : > { %v3001_v36 = vpop.permute.xlu1 %3000 }
 0x54a   : > { %3074 = vst.msk [vmem:[#allocation4 + $0xb0] sm:$0xff] %vm956_vm4, %v3001_v36  ;;  %v3574_v35 = vpop.permute.xlu0 %3573 }
 0x54b   : > { %3649 = vst.msk [vmem:[#allocation4 + $0xa0] sm:$0xff] %vm1536_vm7, %v3574_v35  ;;  %3402 = vrot.lane.b32.xlu1 %v3307_v3, %s4952_s29 }
 0x54c   : > { %3975 = vrot.lane.b32.xlu0 %v3307_v3, %s4955_s10 }
 0x54d   : > { %v3766_v61 = vpop.permute.xlu1 %3765 }
 0x54e   : > { %3841 = vst.msk [vmem:[#allocation4 + $0xa0] sm:$0xff] %vm1729_vm8, %v3766_v61  ;;  %v3576_v10 = vpop.permute.xlu0 %3575  ;;  %v4064_v8 = vld [vmem:[#allocation4 + $0x98] sm:$0xff] }
 0x54f   : > { %3650 = vst.msk [vmem:[#allocation4 + $0xa8] sm:$0xff] %vm1536_vm7, %v3576_v10  ;;  %4870 = vmatmul.mubr.msk.f32.gmra.mrb[18].mxu1 %vm2003_vm10, %v4064_v8  ;;  %3595 = vrot.lane.b32.xlu1 %v3500_v57, %s4953_s30  ;;  %v4419_v57 = vld [vmem:[%s5228_s24 + $0x28] sm:$0xff]  ;;  %v4418_v8 = vld [vmem:[%s5228_s24 + $0x20] sm:$0xff] }
 0x550   : > { %3593 = vrot.lane.b32.xlu0 %v3499_v7, %s4953_s30 }
 0x551   : > { %v3193_v4 = vpop.permute.xlu1 %3192 }
 0x552   : > { %3266 = vst.msk [vmem:[#allocation4 + $0xb0] sm:$0xff] %vm1149_vm5, %v3193_v4  ;;  %v3003_v26 = vpop.permute.xlu0 %3002 }
 0x553   : > { %3075 = vst.msk [vmem:[#allocation4 + $0xb8] sm:$0xff] %vm956_vm4, %v3003_v26  ;;  %3787 = vrot.lane.b32.xlu1 %v3692_v2, %s4954_s7 }
 0x554   : > { %3785 = vrot.lane.b32.xlu0 %v3691_v60, %s4954_s7  ;;  %s7185_s7 = scalar_lea.vmem %s7382_s5, %s4674_s21 }
 0x555   : > { %v3958_v5 = vpop.permute.xlu1 %3957 }
 0x556   : > { %4033 = vst.msk [vmem:[#allocation4 + $0xa0] sm:$0xff] %vm1922_vm9, %v3958_v5  ;;  %v3768_v40 = vpop.permute.xlu0 %3767 }
 0x557   : > { %3842 = vst.msk [vmem:[#allocation4 + $0xa8] sm:$0xff] %vm1729_vm8, %v3768_v40  ;;  %3979 = vrot.lane.b32.xlu1 %v3884_v6, %s4955_s10 }
 0x558   : > { %3977 = vrot.lane.b32.xlu0 %v3883_v11, %s4955_s10 }
 0x559   : > { %v3385_v41 = vpop.permute.xlu1 %3384 }
 0x55a   : > { %3458 = vst.msk [vmem:[#allocation4 + $0xb0] sm:$0xff] %vm1342_vm6, %v3385_v41  ;;  %v3195_v49 = vpop.permute.xlu0 %3194 }
 0x55b   : > { %3267 = vst.msk [vmem:[#allocation4 + $0xb8] sm:$0xff] %vm1149_vm5, %v3195_v49 }
 0x55d   : > { %v3387_v39 = vpop.permute.xlu1 %3386  ;;  %v4065_v42 = vld [vmem:[#allocation4 + $0xa0] sm:$0xff] }
 0x55e   : > { %3459 = vst.msk [vmem:[#allocation4 + $0xb8] sm:$0xff] %vm1342_vm6, %v3387_v39  ;;  %v3960_v22 = vpop.permute.xlu0 %3959  ;;  %4872 = vmatprep.mubr.msk.f32.mxu1 %vm2003_vm10, %v4065_v42 }
 0x55f   : > { %4034 = vst.msk [vmem:[#allocation4 + $0xa8] sm:$0xff] %vm1922_vm9, %v3960_v22 }
 0x561   : > { %v3005_v53 = vpop.permute.xlu1 %3004  ;;  %v4844_v9 = vpop.f32.mrb[0].mxu1 }
 0x562   : > { %3076 = vst.msk [vmem:[#allocation4 + $0xc0] sm:$0xff] %vm956_vm4, %v3005_v53  ;;  %v4261_v44 = vadd.f32 %v4844_v9, %v7172_v56  ;;  %v4255_v47 = vpop.f32.mrb[1].mxu1  ;;  %v3578_v23 = vpop.permute.xlu0 %3577 }
 0x563   : > { %v4256_v28 = vadd.f32 %v7172_v56, %v4255_v47  ;;  %3651 = vst.msk [vmem:[#allocation4 + $0xb0] sm:$0xff] %vm1536_vm7, %v3578_v23  ;;  %v4421_v47 = vld [vmem:[%s5228_s24 + $0x38] sm:$0xff] }
 0x564   : > { %v4447_v21 = vadd.f32 %v4415_v12, %v4261_v44 }
 0x565   : > { %v4446_v50 = vadd.f32 %v4414_v48, %v4256_v28  ;;  %v3770_v16 = vpop.permute.xlu1 %3769 }
 0x566   : > { %v4479_v43 = vmax.f32 %v4447_v21, 0.0  ;;  %3843 = vst.msk [vmem:[#allocation4 + $0xb0] sm:$0xff] %vm1729_vm8, %v3770_v16  ;;  %v3580_v19 = vpop.permute.xlu0 %3579  ;;  %v4066_v24 = vld [vmem:[#allocation4 + $0xa8] sm:$0xff]  ;;  %v4420_v21 = vld [vmem:[%s5228_s24 + $0x30] sm:$0xff] }
 0x567   : > { %v4478_v15 = vmax.f32 %v4446_v50, 0.0  ;;  %3652 = vst.msk [vmem:[#allocation4 + $0xb8] sm:$0xff] %vm1536_vm7, %v3580_v19  ;;  %4873 = vmatmul.mubr.msk.f32.gmra.mrb[20].mxu1 %vm2003_vm10, %v4066_v24 }
 0x568   : > { %4511 = vst.msk [vmem:[%s7185_s7 + $0x8] sm:$0xff] %vm225_vm0, %v4479_v43 }
 0x569   : > { %4510 = vst.msk [vmem:[%s7185_s7] sm:$0xff] %vm225_vm0, %v4478_v15  ;;  %v3197_v25 = vpop.permute.xlu1 %3196 }
 0x56a   : > { %3268 = vst.msk [vmem:[#allocation4 + $0xc0] sm:$0xff] %vm1149_vm5, %v3197_v25  ;;  %v3007_v17 = vpop.permute.xlu0 %3006 }
 0x56b   : > { %3077 = vst.msk [vmem:[#allocation4 + $0xc8] sm:$0xff] %vm956_vm4, %v3007_v17 }
 0x56d   : > { %v3962_v52 = vpop.permute.xlu1 %3961 }
 0x56e   : > { %4035 = vst.msk [vmem:[#allocation4 + $0xb0] sm:$0xff] %vm1922_vm9, %v3962_v52  ;;  %v3772_v29 = vpop.permute.xlu0 %3771 }
 0x56f   : > { %3844 = vst.msk [vmem:[#allocation4 + $0xb8] sm:$0xff] %vm1729_vm8, %v3772_v29 }
 0x571   : > { %v3389_v1 = vpop.permute.xlu1 %3388 }
 0x572   : > { %3460 = vst.msk [vmem:[#allocation4 + $0xc0] sm:$0xff] %vm1342_vm6, %v3389_v1  ;;  %v3199_v38 = vpop.permute.xlu0 %3198 }
 0x573   : > { %3269 = vst.msk [vmem:[#allocation4 + $0xc8] sm:$0xff] %vm1149_vm5, %v3199_v38 }
 0x575   : > { %v3391_v31 = vpop.permute.xlu1 %3390  ;;  %v4847_v54 = vpop.f32.mrb[2].mxu1  ;;  %v4067_v32 = vld [vmem:[#allocation4 + $0xb0] sm:$0xff] }
 0x576   : > { %3461 = vst.msk [vmem:[#allocation4 + $0xc8] sm:$0xff] %vm1342_vm6, %v3391_v31  ;;  %v4271_v20 = vadd.f32 %v4847_v54, %v7172_v56  ;;  %v4265_v27 = vpop.f32.mrb[3].mxu1  ;;  %v3964_v51 = vpop.permute.xlu0 %3963  ;;  %4875 = vmatprep.mubr.msk.f32.mxu1 %vm2003_vm10, %v4067_v32 }
 0x577   : > { %v4266_v63 = vadd.f32 %v7172_v56, %v4265_v27  ;;  %4036 = vst.msk [vmem:[#allocation4 + $0xb8] sm:$0xff] %vm1922_vm9, %v3964_v51  ;;  %v4423_v27 = vld [vmem:[%s5228_s24 + $0x48] sm:$0xff] }
 0x578   : > { %v4449_v45 = vadd.f32 %v4417_v18, %v4271_v20 }
 0x579   : > { %v4448_v30 = vadd.f32 %v4416_v34, %v4266_v63  ;;  %v3009_v33 = vpop.permute.xlu1 %3008 }
 0x57a   : > { %v4481_v62 = vmax.f32 %v4449_v45, 0.0  ;;  %3078 = vst.msk [vmem:[#allocation4 + $0xd0] sm:$0xff] %vm956_vm4, %v3009_v33  ;;  %v3582_v37 = vpop.permute.xlu0 %3581  ;;  %v4422_v45 = vld [vmem:[%s5228_s24 + $0x40] sm:$0xff] }
 0x57b   : > { %v4480_v13 = vmax.f32 %v4448_v30, 0.0  ;;  %3653 = vst.msk [vmem:[#allocation4 + $0xc0] sm:$0xff] %vm1536_vm7, %v3582_v37 }
 0x57c   : > { %4513 = vst.msk [vmem:[%s7185_s7 + $0x18] sm:$0xff] %vm225_vm0, %v4481_v62 }
 0x57d   : > { %4512 = vst.msk [vmem:[%s7185_s7 + $0x10] sm:$0xff] %vm225_vm0, %v4480_v13  ;;  %v3774_v58 = vpop.permute.xlu1 %3773 }
 0x57e   : > { %3845 = vst.msk [vmem:[#allocation4 + $0xc0] sm:$0xff] %vm1729_vm8, %v3774_v58  ;;  %v3584_v14 = vpop.permute.xlu0 %3583  ;;  %v4068_v0 = vld [vmem:[#allocation4 + $0xb8] sm:$0xff] }
 0x57f   : > { %3654 = vst.msk [vmem:[#allocation4 + $0xc8] sm:$0xff] %vm1536_vm7, %v3584_v14  ;;  %4876 = vmatmul.mubr.msk.f32.gmra.mrb[22].mxu1 %vm2003_vm10, %v4068_v0 }
 0x581   : > { %v3201_v59 = vpop.permute.xlu1 %3200 }
 0x582   : > { %3270 = vst.msk [vmem:[#allocation4 + $0xd0] sm:$0xff] %vm1149_vm5, %v3201_v59  ;;  %v3011_v46 = vpop.permute.xlu0 %3010 }
 0x583   : > { %3079 = vst.msk [vmem:[#allocation4 + $0xd8] sm:$0xff] %vm956_vm4, %v3011_v46 }
 0x585   : > { %v3966_v55 = vpop.permute.xlu1 %3965 }
 0x586   : > { %4037 = vst.msk [vmem:[#allocation4 + $0xc0] sm:$0xff] %vm1922_vm9, %v3966_v55  ;;  %v3776_v36 = vpop.permute.xlu0 %3775 }
 0x587   : > { %3846 = vst.msk [vmem:[#allocation4 + $0xc8] sm:$0xff] %vm1729_vm8, %v3776_v36 }
 0x589   : > { %v3393_v35 = vpop.permute.xlu1 %3392  ;;  %v4850_v3 = vpop.f32.mrb[4].mxu1 }
 0x58a   : > { %3462 = vst.msk [vmem:[#allocation4 + $0xd0] sm:$0xff] %vm1342_vm6, %v3393_v35  ;;  %v4281_v61 = vadd.f32 %v4850_v3, %v7172_v56  ;;  %v3203_v7 = vpop.permute.xlu0 %3202  ;;  %v4275_v10 = vpop.f32.mrb[5].mxu1 }
 0x58b   : > { %3271 = vst.msk [vmem:[#allocation4 + $0xd8] sm:$0xff] %vm1149_vm5, %v3203_v7  ;;  %v4276_v2 = vadd.f32 %v7172_v56, %v4275_v10 }
 0x58c   : > { %v4451_v4 = vadd.f32 %v4419_v57, %v4281_v61  ;;  %v4425_v61 = vld [vmem:[%s5228_s24 + $0x58] sm:$0xff] }
 0x58d   : > { %v4450_v60 = vadd.f32 %v4418_v8, %v4276_v2  ;;  %v3395_v26 = vpop.permute.xlu1 %3394  ;;  %v4069_v6 = vld [vmem:[#allocation4 + $0xc0] sm:$0xff] }
 0x58e   : > { %v4483_v5 = vmax.f32 %v4451_v4, 0.0  ;;  %3463 = vst.msk [vmem:[#allocation4 + $0xd8] sm:$0xff] %vm1342_vm6, %v3395_v26  ;;  %v3968_v11 = vpop.permute.xlu0 %3967  ;;  %4878 = vmatprep.mubr.msk.f32.mxu1 %vm2003_vm10, %v4069_v6  ;;  %v4424_v4 = vld [vmem:[%s5228_s24 + $0x50] sm:$0xff] }
 0x58f   : > { %v4482_v40 = vmax.f32 %v4450_v60, 0.0  ;;  %4038 = vst.msk [vmem:[#allocation4 + $0xc8] sm:$0xff] %vm1922_vm9, %v3968_v11 }
 0x590   : > { %4515 = vst.msk [vmem:[%s7185_s7 + $0x28] sm:$0xff] %vm225_vm0, %v4483_v5 }
 0x591   : > { %4514 = vst.msk [vmem:[%s7185_s7 + $0x20] sm:$0xff] %vm225_vm0, %v4482_v40  ;;  %v3013_v41 = vpop.permute.xlu1 %3012 }
 0x592   : > { %3080 = vst.msk [vmem:[#allocation4 + $0xe0] sm:$0xff] %vm956_vm4, %v3013_v41  ;;  %v3586_v49 = vpop.permute.xlu0 %3585 }
 0x593   : > { %3655 = vst.msk [vmem:[#allocation4 + $0xd0] sm:$0xff] %vm1536_vm7, %v3586_v49 }
 0x595   : > { %v3778_v39 = vpop.permute.xlu1 %3777 }
 0x596   : > { %3847 = vst.msk [vmem:[#allocation4 + $0xd0] sm:$0xff] %vm1729_vm8, %v3778_v39  ;;  %v3588_v42 = vpop.permute.xlu0 %3587  ;;  %v4070_v22 = vld [vmem:[#allocation4 + $0xc8] sm:$0xff] }
 0x597   : > { %3656 = vst.msk [vmem:[#allocation4 + $0xd8] sm:$0xff] %vm1536_vm7, %v3588_v42  ;;  %4879 = vmatmul.mubr.msk.f32.gmra.mrb[24].mxu1 %vm2003_vm10, %v4070_v22 }
 0x599   : > { %v3205_v53 = vpop.permute.xlu1 %3204 }
 0x59a   : > { %3272 = vst.msk [vmem:[#allocation4 + $0xe0] sm:$0xff] %vm1149_vm5, %v3205_v53  ;;  %v3015_v9 = vpop.permute.xlu0 %3014  ;;  %v4427_v53 = vld [vmem:[%s5228_s24 + $0x68] sm:$0xff] }
 0x59b   : > { %3081 = vst.msk [vmem:[#allocation4 + $0xe8] sm:$0xff] %vm956_vm4, %v3015_v9 }
 0x59d   : > { %v3970_v12 = vpop.permute.xlu1 %3969  ;;  %v4853_v44 = vpop.f32.mrb[6].mxu1 }
 0x59e   : > { %4039 = vst.msk [vmem:[#allocation4 + $0xd0] sm:$0xff] %vm1922_vm9, %v3970_v12  ;;  %v4291_v48 = vadd.f32 %v4853_v44, %v7172_v56  ;;  %v3780_v23 = vpop.permute.xlu0 %3779  ;;  %v4285_v28 = vpop.f32.mrb[7].mxu1  ;;  %v4426_v44 = vld [vmem:[%s5228_s24 + $0x60] sm:$0xff] }
 0x59f   : > { %3848 = vst.msk [vmem:[#allocation4 + $0xd8] sm:$0xff] %vm1729_vm8, %v3780_v23  ;;  %v4286_v50 = vadd.f32 %v7172_v56, %v4285_v28 }
 0x5a0   : > { %v4453_v16 = vadd.f32 %v4421_v47, %v4291_v48 }
 0x5a1   : > { %v4452_v43 = vadd.f32 %v4420_v21, %v4286_v50  ;;  %v3397_v19 = vpop.permute.xlu1 %3396 }
 0x5a2   : > { %v4485_v24 = vmax.f32 %v4453_v16, 0.0  ;;  %3464 = vst.msk [vmem:[#allocation4 + $0xe0] sm:$0xff] %vm1342_vm6, %v3397_v19  ;;  %v3207_v15 = vpop.permute.xlu0 %3206  ;;  %v4429_v16 = vld [vmem:[%s5228_s24 + $0x78] sm:$0xff] }
 0x5a3   : > { %v4484_v25 = vmax.f32 %v4452_v43, 0.0  ;;  %3273 = vst.msk [vmem:[#allocation4 + $0xe8] sm:$0xff] %vm1149_vm5, %v3207_v15 }
 0x5a4   : > { %4517 = vst.msk [vmem:[%s7185_s7 + $0x38] sm:$0xff] %vm225_vm0, %v4485_v24  ;;  %v4428_v24 = vld [vmem:[%s5228_s24 + $0x70] sm:$0xff] }
 0x5a5   : > { %4516 = vst.msk [vmem:[%s7185_s7 + $0x30] sm:$0xff] %vm225_vm0, %v4484_v25  ;;  %v3399_v17 = vpop.permute.xlu1 %3398  ;;  %v4071_v52 = vld [vmem:[#allocation4 + $0xd0] sm:$0xff] }
 0x5a6   : > { %3465 = vst.msk [vmem:[#allocation4 + $0xe8] sm:$0xff] %vm1342_vm6, %v3399_v17  ;;  %v3972_v29 = vpop.permute.xlu0 %3971  ;;  %4881 = vmatprep.mubr.msk.f32.mxu1 %vm2003_vm10, %v4071_v52 }
 0x5a7   : > { %4040 = vst.msk [vmem:[#allocation4 + $0xd8] sm:$0xff] %vm1922_vm9, %v3972_v29 }
 0x5a9   : > { %v3017_v1 = vpop.permute.xlu1 %3016 }
 0x5aa   : > { %3082 = vst.msk [vmem:[#allocation4 + $0xf0] sm:$0xff] %vm956_vm4, %v3017_v1  ;;  %v3590_v38 = vpop.permute.xlu0 %3589 }
 0x5ab   : > { %3657 = vst.msk [vmem:[#allocation4 + $0xe0] sm:$0xff] %vm1536_vm7, %v3590_v38  ;;  %v4431_v38 = vld [vmem:[%s5228_s24 + $0x88] sm:$0xff] }
 0x5ad   : > { %v3782_v31 = vpop.permute.xlu1 %3781 }
 0x5ae   : > { %3849 = vst.msk [vmem:[#allocation4 + $0xe0] sm:$0xff] %vm1729_vm8, %v3782_v31  ;;  %v3592_v54 = vpop.permute.xlu0 %3591  ;;  %v4072_v18 = vld [vmem:[#allocation4 + $0xd8] sm:$0xff] }
 0x5af   : > { %3658 = vst.msk [vmem:[#allocation4 + $0xe8] sm:$0xff] %vm1536_vm7, %v3592_v54  ;;  %4882 = vmatmul.mubr.msk.f32.gmra.mrb[26].mxu1 %vm2003_vm10, %v4072_v18  ;;  %v4430_v18 = vld [vmem:[%s5228_s24 + $0x80] sm:$0xff] }
 0x5b1   : > { %v3209_v32 = vpop.permute.xlu1 %3208  ;;  %v4856_v20 = vpop.f32.mrb[8].mxu1 }
 0x5b2   : > { %3274 = vst.msk [vmem:[#allocation4 + $0xf0] sm:$0xff] %vm1149_vm5, %v3209_v32  ;;  %v4301_v34 = vadd.f32 %v4856_v20, %v7172_v56  ;;  %v3019_v51 = vpop.permute.xlu0 %3018  ;;  %v4295_v63 = vpop.f32.mrb[9].mxu1 }
 0x5b3   : > { %3083 = vst.msk [vmem:[#allocation4 + $0xf8] sm:$0xff] %vm956_vm4, %v3019_v51  ;;  %v4296_v30 = vadd.f32 %v7172_v56, %v4295_v63 }
 0x5b4   : > { %v4455_v33 = vadd.f32 %v4423_v27, %v4301_v34 }
 0x5b5   : > { %v4454_v62 = vadd.f32 %v4422_v45, %v4296_v30  ;;  %v3974_v37 = vpop.permute.xlu1 %3973  ;;  %v4433_v45 = vld [vmem:[%s5228_s24 + $0x98] sm:$0xff] }
 0x5b6   : > { %v4487_v13 = vmax.f32 %v4455_v33, 0.0  ;;  %4041 = vst.msk [vmem:[#allocation4 + $0xe0] sm:$0xff] %vm1922_vm9, %v3974_v37  ;;  %v3784_v58 = vpop.permute.xlu0 %3783 }
 0x5b7   : > { %v4486_v14 = vmax.f32 %v4454_v62, 0.0  ;;  %3850 = vst.msk [vmem:[#allocation4 + $0xe8] sm:$0xff] %vm1729_vm8, %v3784_v58  ;;  %v4432_v62 = vld [vmem:[%s5228_s24 + $0x90] sm:$0xff] }
 0x5b8   : > { %4519 = vst.msk [vmem:[%s7185_s7 + $0x48] sm:$0xff] %vm225_vm0, %v4487_v13 }
 0x5b9   : > { %4518 = vst.msk [vmem:[%s7185_s7 + $0x40] sm:$0xff] %vm225_vm0, %v4486_v14  ;;  %v3401_v0 = vpop.permute.xlu1 %3400 }
 0x5ba   : > { %3466 = vst.msk [vmem:[#allocation4 + $0xf0] sm:$0xff] %vm1342_vm6, %v3401_v0  ;;  %v3211_v59 = vpop.permute.xlu0 %3210 }
 0x5bb   : > { %3275 = vst.msk [vmem:[#allocation4 + $0xf8] sm:$0xff] %vm1149_vm5, %v3211_v59 }
 0x5bd   : > { %v3403_v46 = vpop.permute.xlu1 %3402  ;;  %v4073_v55 = vld [vmem:[#allocation4 + $0xe0] sm:$0xff] }
 0x5be   : > { %3467 = vst.msk [vmem:[#allocation4 + $0xf8] sm:$0xff] %vm1342_vm6, %v3403_v46  ;;  %v3976_v36 = vpop.permute.xlu0 %3975  ;;  %4884 = vmatprep.mubr.msk.f32.mxu1 %vm2003_vm10, %v4073_v55  ;;  %v4435_v46 = vld [vmem:[%s5228_s24 + $0xa8] sm:$0xff] }
 0x5bf   : > { %4042 = vst.msk [vmem:[#allocation4 + $0xe8] sm:$0xff] %vm1922_vm9, %v3976_v36 }
 0x5c1   : > { %v3596_v35 = vpop.permute.xlu1 %3595 }
 0x5c2   : > { %v3594_v3 = vpop.permute.xlu0 %3593  ;;  %3660 = vst.msk [vmem:[#allocation4 + $0xf8] sm:$0xff] %vm1536_vm7, %v3596_v35  ;;  %v4434_v35 = vld [vmem:[%s5228_s24 + $0xa0] sm:$0xff] }
 0x5c3   : > { %3659 = vst.msk [vmem:[#allocation4 + $0xf0] sm:$0xff] %vm1536_vm7, %v3594_v3 }
 0x5c5   : > { %v4859_v57 = vpop.f32.mrb[10].mxu1  ;;  %v3788_v7 = vpop.permute.xlu1 %3787 }
 0x5c6   : > { %v4311_v10 = vadd.f32 %v4859_v57, %v7172_v56  ;;  %v3786_v8 = vpop.permute.xlu0 %3785  ;;  %v4305_v2 = vpop.f32.mrb[11].mxu1  ;;  %3852 = vst.msk [vmem:[#allocation4 + $0xf8] sm:$0xff] %vm1729_vm8, %v3788_v7  ;;  %v4074_v60 = vld [vmem:[#allocation4 + $0xe8] sm:$0xff] }
 0x5c7   : > { %3851 = vst.msk [vmem:[#allocation4 + $0xf0] sm:$0xff] %vm1729_vm8, %v3786_v8  ;;  %v4306_v26 = vadd.f32 %v7172_v56, %v4305_v2  ;;  %4885 = vmatmul.mubr.msk.f32.gmra.mrb[28].mxu1 %vm2003_vm10, %v4074_v60  ;;  %v4437_v2 = vld [vmem:[%s5228_s24 + $0xb8] sm:$0xff] }
 0x5c8   : > { %v4457_v6 = vadd.f32 %v4425_v61, %v4311_v10 }
 0x5c9   : > { %v4456_v5 = vadd.f32 %v4424_v4, %v4306_v26  ;;  %v3980_v11 = vpop.permute.xlu1 %3979  ;;  %v4436_v26 = vld [vmem:[%s5228_s24 + $0xb0] sm:$0xff] }
 0x5ca   : > { %v4489_v40 = vmax.f32 %v4457_v6, 0.0  ;;  %v3978_v41 = vpop.permute.xlu0 %3977  ;;  %4044 = vst.msk [vmem:[#allocation4 + $0xf8] sm:$0xff] %vm1922_vm9, %v3980_v11 }
 0x5cb   : > { %v4488_v49 = vmax.f32 %v4456_v5, 0.0  ;;  %4043 = vst.msk [vmem:[#allocation4 + $0xf0] sm:$0xff] %vm1922_vm9, %v3978_v41 }
 0x5cc   : > { %4521 = vst.msk [vmem:[%s7185_s7 + $0x58] sm:$0xff] %vm225_vm0, %v4489_v40 }
 0x5cd   : > { %4520 = vst.msk [vmem:[%s7185_s7 + $0x50] sm:$0xff] %vm225_vm0, %v4488_v49 }
 0x5d1   : > { %v4076_v39 = vld [vmem:[#allocation4 + $0xf8] sm:$0xff] }
 0x5d2   : > { %v4075_v42 = vld [vmem:[#allocation4 + $0xf0] sm:$0xff] }
 0x5d3   : > { %4887 = vmatprep.mubr.msk.f32.mxu1 %vm2003_vm10, %v4075_v42 }
 0x5d4   : > { %4888 = vmatmul.mubr.msk.f32.gmra.mrb[30].mxu1 %vm2003_vm10, %v4076_v39  ;;  %v4439_v39 = vld [vmem:[%s5228_s24 + $0xc8] sm:$0xff] }
 0x5d9   : > { %v4862_v22 = vpop.f32.mrb[12].mxu1 }
 0x5da   : > { %v4321_v9 = vadd.f32 %v4862_v22, %v7172_v56  ;;  %v4315_v12 = vpop.f32.mrb[13].mxu1 }
 0x5db   : > { %v4316_v47 = vadd.f32 %v7172_v56, %v4315_v12 }
 0x5dc   : > { %v4459_v48 = vadd.f32 %v4427_v53, %v4321_v9  ;;  %v4438_v53 = vld [vmem:[%s5228_s24 + $0xc0] sm:$0xff] }
 0x5dd   : > { %v4458_v23 = vadd.f32 %v4426_v44, %v4316_v47 }
 0x5de   : > { %v4491_v28 = vmax.f32 %v4459_v48, 0.0 }
 0x5df   : > { %v4490_v21 = vmax.f32 %v4458_v23, 0.0 }
 0x5e0   : > { %4523 = vst.msk [vmem:[%s7185_s7 + $0x68] sm:$0xff] %vm225_vm0, %v4491_v28  ;;  %v4441_v28 = vld [vmem:[%s5228_s24 + $0xd8] sm:$0xff] }
 0x5e1   : > { %4522 = vst.msk [vmem:[%s7185_s7 + $0x60] sm:$0xff] %vm225_vm0, %v4490_v21 }
 0x5f2   : > { %v4865_v50 = vpop.f32.mrb[14].mxu1 }
 0x5f3   : > { %v4331_v43 = vadd.f32 %v4865_v50, %v7172_v56  ;;  %v4325_v19 = vpop.f32.mrb[15].mxu1 }
 0x5f4   : > { %v4326_v15 = vadd.f32 %v7172_v56, %v4325_v19 }
 0x5f5   : > { %v4461_v25 = vadd.f32 %v4429_v16, %v4331_v43  ;;  %v4440_v16 = vld [vmem:[%s5228_s24 + $0xd0] sm:$0xff] }
 0x5f6   : > { %v4460_v17 = vadd.f32 %v4428_v24, %v4326_v15 }
 0x5f7   : > { %v4493_v52 = vmax.f32 %v4461_v25, 0.0 }
 0x5f8   : > { %v4492_v29 = vmax.f32 %v4460_v17, 0.0 }
 0x5f9   : > { %4525 = vst.msk [vmem:[%s7185_s7 + $0x78] sm:$0xff] %vm225_vm0, %v4493_v52  ;;  %v4443_v52 = vld [vmem:[%s5228_s24 + $0xe8] sm:$0xff] }
 0x5fa   : > { %4524 = vst.msk [vmem:[%s7185_s7 + $0x70] sm:$0xff] %vm225_vm0, %v4492_v29 }
 0x60a   : > { %v4868_v1 = vpop.f32.mrb[16].mxu1 }
 0x60b   : > { %v4341_v31 = vadd.f32 %v4868_v1, %v7172_v56  ;;  %v4335_v54 = vpop.f32.mrb[17].mxu1 }
 0x60c   : > { %v4336_v32 = vadd.f32 %v7172_v56, %v4335_v54 }
 0x60d   : > { %v4463_v20 = vadd.f32 %v4431_v38, %v4341_v31  ;;  %v4442_v38 = vld [vmem:[%s5228_s24 + $0xe0] sm:$0xff] }
 0x60e   : > { %v4462_v27 = vadd.f32 %v4430_v18, %v4336_v32 }
 0x60f   : > { %v4495_v34 = vmax.f32 %v4463_v20, 0.0 }
 0x610   : > { %v4494_v51 = vmax.f32 %v4462_v27, 0.0 }
 0x611   : > { %4527 = vst.msk [vmem:[%s7185_s7 + $0x88] sm:$0xff] %vm225_vm0, %v4495_v34  ;;  %v4445_v34 = vld [vmem:[%s5228_s24 + $0xf8] sm:$0xff] }
 0x612   : > { %4526 = vst.msk [vmem:[%s7185_s7 + $0x80] sm:$0xff] %vm225_vm0, %v4494_v51 }
 0x622   : > { %v4871_v63 = vpop.f32.mrb[18].mxu1 }
 0x623   : > { %v4351_v30 = vadd.f32 %v4871_v63, %v7172_v56  ;;  %v4345_v33 = vpop.f32.mrb[19].mxu1 }
 0x624   : > { %v4346_v37 = vadd.f32 %v7172_v56, %v4345_v33 }
 0x625   : > { %v4465_v13 = vadd.f32 %v4433_v45, %v4351_v30  ;;  %v4444_v45 = vld [vmem:[%s5228_s24 + $0xf0] sm:$0xff] }
 0x626   : > { %v4464_v58 = vadd.f32 %v4432_v62, %v4346_v37 }
 0x627   : > { %v4497_v14 = vmax.f32 %v4465_v13, 0.0 }
 0x628   : > { %v4496_v0 = vmax.f32 %v4464_v58, 0.0 }
 0x629   : > { %4529 = vst.msk [vmem:[%s7185_s7 + $0x98] sm:$0xff] %vm225_vm0, %v4497_v14 }
 0x62a   : > { %4528 = vst.msk [vmem:[%s7185_s7 + $0x90] sm:$0xff] %vm225_vm0, %v4496_v0 }
 0x63a   : > { %v4874_v59 = vpop.f32.mrb[20].mxu1 }
 0x63b   : > { %v4361_v55 = vadd.f32 %v4874_v59, %v7172_v56  ;;  %v4355_v36 = vpop.f32.mrb[21].mxu1 }
 0x63c   : > { %v4356_v3 = vadd.f32 %v7172_v56, %v4355_v36 }
 0x63d   : > { %v4467_v57 = vadd.f32 %v4435_v46, %v4361_v55 }
 0x63e   : > { %v4466_v61 = vadd.f32 %v4434_v35, %v4356_v3 }
 0x63f   : > { %v4499_v7 = vmax.f32 %v4467_v57, 0.0 }
 0x640   : > { %v4498_v10 = vmax.f32 %v4466_v61, 0.0 }
 0x641   : > { %4531 = vst.msk [vmem:[%s7185_s7 + $0xa8] sm:$0xff] %vm225_vm0, %v4499_v7 }
 0x642   : > { %4530 = vst.msk [vmem:[%s7185_s7 + $0xa0] sm:$0xff] %vm225_vm0, %v4498_v10 }
 0x652   : > { %v4877_v8 = vpop.f32.mrb[22].mxu1 }
 0x653   : > { %v4371_v4 = vadd.f32 %v4877_v8, %v7172_v56  ;;  %v4365_v60 = vpop.f32.mrb[23].mxu1 }
 0x654   : > { %v4366_v6 = vadd.f32 %v7172_v56, %v4365_v60 }
 0x655   : > { %v4469_v5 = vadd.f32 %v4437_v2, %v4371_v4 }
 0x656   : > { %v4468_v11 = vadd.f32 %v4436_v26, %v4366_v6 }
 0x657   : > { %v4501_v40 = vmax.f32 %v4469_v5, 0.0 }
 0x658   : > { %v4500_v41 = vmax.f32 %v4468_v11, 0.0 }
 0x659   : > { %4533 = vst.msk [vmem:[%s7185_s7 + $0xb8] sm:$0xff] %vm225_vm0, %v4501_v40 }
 0x65a   : > { %4532 = vst.msk [vmem:[%s7185_s7 + $0xb0] sm:$0xff] %vm225_vm0, %v4500_v41 }
 0x66a   : > { %v4880_v49 = vpop.f32.mrb[24].mxu1 }
 0x66b   : > { %v4381_v42 = vadd.f32 %v4880_v49, %v7172_v56  ;;  %v4375_v22 = vpop.f32.mrb[25].mxu1 }
 0x66c   : > { %v4376_v9 = vadd.f32 %v7172_v56, %v4375_v22 }
 0x66d   : > { %v4471_v12 = vadd.f32 %v4439_v39, %v4381_v42 }
 0x66e   : > { %v4470_v44 = vadd.f32 %v4438_v53, %v4376_v9 }
 0x66f   : > { %v4503_v47 = vmax.f32 %v4471_v12, 0.0 }
 0x670   : > { %v4502_v48 = vmax.f32 %v4470_v44, 0.0 }
 0x671   : > { %4535 = vst.msk [vmem:[%s7185_s7 + $0xc8] sm:$0xff] %vm225_vm0, %v4503_v47 }
 0x672   : > { %4534 = vst.msk [vmem:[%s7185_s7 + $0xc0] sm:$0xff] %vm225_vm0, %v4502_v48 }
 0x682   : > { %v4883_v23 = vpop.f32.mrb[26].mxu1 }
 0x683   : > { %v4391_v21 = vadd.f32 %v4883_v23, %v7172_v56  ;;  %v4385_v50 = vpop.f32.mrb[27].mxu1 }
 0x684   : > { %v4386_v43 = vadd.f32 %v7172_v56, %v4385_v50 }
 0x685   : > { %v4473_v19 = vadd.f32 %v4441_v28, %v4391_v21 }
 0x686   : > { %v4472_v24 = vadd.f32 %v4440_v16, %v4386_v43 }
 0x687   : > { %v4505_v15 = vmax.f32 %v4473_v19, 0.0 }
 0x688   : > { %v4504_v25 = vmax.f32 %v4472_v24, 0.0 }
 0x689   : > { %4537 = vst.msk [vmem:[%s7185_s7 + $0xd8] sm:$0xff] %vm225_vm0, %v4505_v15 }
 0x68a   : > { %4536 = vst.msk [vmem:[%s7185_s7 + $0xd0] sm:$0xff] %vm225_vm0, %v4504_v25 }
 0x69a   : > { %v4886_v17 = vpop.f32.mrb[28].mxu1 }
 0x69b   : > { %v4401_v29 = vadd.f32 %v4886_v17, %v7172_v56  ;;  %v4395_v1 = vpop.f32.mrb[29].mxu1 }
 0x69c   : > { %v4396_v31 = vadd.f32 %v7172_v56, %v4395_v1 }
 0x69d   : > { %v4475_v54 = vadd.f32 %v4443_v52, %v4401_v29 }
 0x69e   : > { %v4474_v18 = vadd.f32 %v4442_v38, %v4396_v31 }
 0x69f   : > { %v4507_v32 = vmax.f32 %v4475_v54, 0.0 }
 0x6a0   : > { %v4506_v20 = vmax.f32 %v4474_v18, 0.0 }
 0x6a1   : > { %4539 = vst.msk [vmem:[%s7185_s7 + $0xe8] sm:$0xff] %vm225_vm0, %v4507_v32 }
 0x6a2   : > { %4538 = vst.msk [vmem:[%s7185_s7 + $0xe0] sm:$0xff] %vm225_vm0, %v4506_v20 }
 0x6a7   : > { %v4889_v27 = vpop.f32.mrb[30].mxu1 }
 0x6a8   : > { %v4411_v51 = vadd.f32 %v4889_v27, %v7172_v56  ;;  %v4405_v63 = vpop.f32.mrb[31].mxu1 }
 0x6a9   : > { %v4406_v30 = vadd.f32 %v7172_v56, %v4405_v63 }
 0x6aa   : > { %v4477_v33 = vadd.f32 %v4445_v34, %v4411_v51 }
 0x6ab   : > { %v4476_v62 = vadd.f32 %v4444_v45, %v4406_v30 }
 0x6ac   : > { %v4509_v37 = vmax.f32 %v4477_v33, 0.0 }
 0x6ad   : > { %v4508_v13 = vmax.f32 %v4476_v62, 0.0 }
 0x6ae   : > { %4541 = vst.msk [vmem:[%s7185_s7 + $0xf8] sm:$0xff] %vm225_vm0, %v4509_v37 }
 0x6af   : > { %4540 = vst.msk [vmem:[%s7185_s7 + $0xf0] sm:$0xff] %vm225_vm0, %v4508_v13 }
 0x6b0 PF: > { %s15_s18 = sadd.s32 1, %s4945_s18  }
 0x6b1   : > { %p12_p4 = scmp.ge.s32.totalorder %s15_s18, 4  }
 0x6b3   :  { %14 = sbr.rel (!%p12_p4) target bundleno = 1 (0x1), region = 74 }

</bundles_post_ra>
